<compile_context>
chip_gen: v7x
topology: tpu7x:2x2x1
jax: 0.10.0
libtpu: 0.0.40
codegen_flags: <defaults>
</compile_context>

<pallas_src>
import functools

import jax
import jax.numpy as jnp
from jax.experimental import pallas as pl
from jax.experimental.pallas import tpu as pltpu

CUTOFF = 5.0
HIGHEST = jax.lax.Precision.HIGHEST

PACKED_ORDER = ["w1a", "w1b", "w1c", "b1", "w2", "b2",
                "wn1a", "wn1b", "bn1", "wn2", "bn2",
                "wc1", "bc1", "wc2row"]


def _e_gcl_kernel(h_ref, hk_ref, x_ref, xk_ref, mj_ref, mk_ref,
                  w1a_ref, w1b_ref, w1c_ref, b1_ref, w2_ref, b2_ref,
                  wn1a_ref, wn1b_ref, bn1_ref, wn2_ref, bn2_ref,
                  wc1_ref, bc1_ref, wc2_ref,
                  hout_ref, xout_ref,
                  mi_sc, upd_sc):
    Bt, N, H = h_ref.shape
    Tk = hk_ref.shape[1]
    f32 = jnp.float32
    bf16 = jnp.bfloat16
    rc = CUTOFF

    k_idx = pl.program_id(1)
    kt = pl.num_programs(1)
    ko = k_idx * Tk                       # global element offset of the k block

    def silu(v):  # exact: sigmoid(x) = 0.5*(1+tanh(x/2)) -> single EUP op
        return v * (0.5 * jnp.tanh(0.5 * v) + 0.5)

    def mxu_bf16(a, w_ref):               # bf16 operands, f32 accumulation
        return jnp.dot(a.astype(bf16), w_ref[...], preferred_element_type=f32)

    def mxu_hp(a, w_ref):                 # accuracy-critical node-row matmuls
        return jnp.dot(a, w_ref[...], preferred_element_type=f32,
                       precision=HIGHEST)

    h = h_ref[...]                        # (Bt, N, H)  f32
    x = x_ref[...]                        # (Bt, N, 3)  f32
    h2d = h.reshape(Bt * N, H)

    @pl.when(k_idx == 0)
    def _():
        mi_sc[...] = jnp.zeros_like(mi_sc)
        upd_sc[...] = jnp.zeros_like(upd_sc)

    # ---- pairwise geometry, lane-dense in k: (Bt, N, Tk) slabs ----
    xk = xk_ref[...]                      # (Bt, Tk, 3)
    dxs = []
    for c in range(3):
        dc = x[:, :, c:c + 1] - xk[:, :, c].reshape(Bt, 1, Tk)   # (Bt,N,Tk)
        dxs.append(dc)
    d2 = dxs[0] * dxs[0] + dxs[1] * dxs[1] + dxs[2] * dxs[2]
    D = jnp.sqrt(d2)

    # smooth cubic cutoff + neighbor mask, folded into one per-pair gate
    x_cut = 1.0 + (-1.5 / rc ** 2) * d2 + (0.5 / rc ** 3) * (d2 * D)
    cut = jnp.where(D <= 0.0, 1.0, jnp.where(D >= rc, 0.0, x_cut))
    jj = jax.lax.broadcasted_iota(jnp.int32, (1, N, Tk), 1)
    kk = jax.lax.broadcasted_iota(jnp.int32, (1, N, Tk), 2) + ko
    pair_ok = jnp.logical_and(D < rc, jj != kk)
    mj = mj_ref[...]                      # (Bt, N, 1)
    mk = mk_ref[...].reshape(Bt, 1, Tk)   # (Bt, Tk, 1) -> k in lanes
    valid = jnp.where(pair_ok, mj * mk, 0.0)                     # (Bt,N,Tk)
    gate = valid * cut                                           # (Bt,N,Tk)

    # ---- edge MLP (eq. 3): Linear(cat[h_j, h_k, d^2]) -> silu -> Linear ----
    # hwj/hwk are recomputed per k step; cost is ~1/(2*Tk) of the pair matmuls.
    hwj = mxu_bf16(h2d, w1a_ref).reshape(Bt, N, 1, H)
    hwk = mxu_bf16(hk_ref[...].reshape(Bt * Tk, H),
                   w1b_ref).reshape(Bt, 1, Tk, H)
    lin1 = hwj + hwk + d2[..., None] * w1c_ref[...] + b1_ref[...]  # (Bt,N,Tk,H)
    mid = silu(lin1)
    P = Bt * N * Tk
    m = silu(mxu_bf16(mid.reshape(P, H), w2_ref) + b2_ref[...])    # (P,H) f32

    # ---- gate-factored message aggregation (eq. 5) ----
    m4 = m.reshape(Bt, N, Tk, H)
    gate4 = gate[..., None]                                        # one bcast
    mi_sc[...] = mi_sc[...] + jnp.sum(m4 * gate4, axis=2)          # (Bt,N,H)

    # ---- coord model (eq. 4): c1 = silu(gate*(m@wc1)+bc1) == silu(mij@wc1+bc1)
    tc = mxu_bf16(m, wc1_ref).reshape(Bt, N, Tk, H)
    c1 = silu(gate4 * tc + bc1_ref[...])
    phi = jnp.sum(c1 * wc2_ref[...], axis=-1)                      # lane reduce
    coeff = valid * phi * (1.0 / (N - 1.0))                        # (Bt,N,Tk)
    upd = jnp.stack([jnp.sum(dxs[c] * coeff, axis=-1)              # lane reduce
                     for c in range(3)], axis=-1)                  # (Bt,N,3)
    upd_sc[...] = upd_sc[...] + upd

    # ---- finalize at last k block: node model (eqs. 5,6) + coord write ----
    @pl.when(k_idx == kt - 1)
    def _():
        mi2d = mi_sc[...].reshape(Bt * N, H)
        n1 = silu(mxu_hp(h2d, wn1a_ref) + mxu_hp(mi2d, wn1b_ref)
                  + bn1_ref[...])
        h_out = h + (mxu_hp(n1, wn2_ref) + bn2_ref[...]).reshape(Bt, N, H)
        hout_ref[...] = h_out.astype(hout_ref.dtype)               # recurrent
        xout_ref[...] = jnp.clip(x + upd_sc[...], -1000.0,
                                 1000.0).astype(xout_ref.dtype)


def pack_params(params):
    f32 = jnp.float32
    bf16 = jnp.bfloat16
    return dict(
        w1a=params["w1a"].astype(bf16),
        w1b=params["w1b"].astype(bf16),
        w1c=params["w1c"].astype(f32),
        b1=params["b1"].astype(f32),
        w2=params["w2"].astype(bf16),      # pair-row matmul operand
        b2=params["b2"].astype(f32),
        wn1a=params["wn1a"].astype(f32),
        wn1b=params["wn1b"].astype(f32),
        bn1=params["bn1"].astype(f32),
        wn2=params["wn2"].astype(f32),
        bn2=params["bn2"].astype(f32),
        wc1=params["wc1"].astype(bf16),    # pair-row matmul operand
        bc1=params["bc1"].astype(f32),
        wc2row=params["wc2"].T.astype(f32),  # (1, H) row for the lane reduce
    )


def _vmem_limit_bytes():
    # Derive the scoped-VMEM limit from the chip (64 MiB on v7x, 128 MiB on
    # v5e/v6e); leave headroom for double-buffered I/O blocks + compiler scratch.
    try:
        cap = int(pltpu.get_tpu_info().vmem_capacity_bytes)
    except Exception:
        cap = 128 * 1024 * 1024
    return min(int(cap * 0.40), 64 * 1024 * 1024)


def _pick_tiles(B, N, H, vmem_limit):
    """Choose (batch block, neighbor block) so pair intermediates fit VMEM."""
    budget = int(vmem_limit * 0.55)      # the rest: I/O blocks, weights, slack
    per_pair = 20 * H + 48               # live f32/bf16 (.,H) temps + geometry
    bt_max = max(1, B // 2)              # >= 2 batch blocks -> megacore on v7x

    tks = [N] + [t for t in range(N - N % 8, 7, -8) if N % t == 0 and t != N]
    for tk in tks:
        for bt in range(min(B, bt_max), 0, -1):
            if B % bt == 0 and bt * N * tk * per_pair <= budget:
                return bt, tk
    # TODO(synk): N with no multiple-of-8 divisor and an over-budget block falls
    #             back to Tk=N; acceptable (compiles), just larger VMEM use.
    return 1, tks[-1]


def e_gcl_sparse_forward(h, x, node_mask, params, block_b=None, block_k=None):
    B, N, H = h.shape
    assert N > 1
    h = h.astype(jnp.float32)
    x = x.astype(jnp.float32)
    mask_f = node_mask.astype(jnp.float32).reshape(B, N, 1)
    packed = pack_params(params)
    weights = [packed[k] for k in PACKED_ORDER]

    vmem_limit = _vmem_limit_bytes()
    bt, tk = _pick_tiles(B, N, H, vmem_limit)
    if block_b is not None:
        bt = block_b
    if block_k is not None:
        tk = block_k
    assert B % bt == 0 and N % tk == 0
    assert tk == N or tk % 8 == 0

    def wspec(w):
        nd = w.ndim
        return pl.BlockSpec(w.shape, lambda b, k: (0,) * nd)

    in_specs = [
        pl.BlockSpec((bt, N, H), lambda b, k: (b, 0, 0)),   # h (j rows + node)
        pl.BlockSpec((bt, tk, H), lambda b, k: (b, k, 0)),  # h (k block)
        pl.BlockSpec((bt, N, 3), lambda b, k: (b, 0, 0)),   # x (j rows)
        pl.BlockSpec((bt, tk, 3), lambda b, k: (b, k, 0)),  # x (k block)
        pl.BlockSpec((bt, N, 1), lambda b, k: (b, 0, 0)),   # mask (j)
        pl.BlockSpec((bt, tk, 1), lambda b, k: (b, k, 0)),  # mask (k block)
    ] + [wspec(w) for w in weights]
    out_specs = [
        pl.BlockSpec((bt, N, H), lambda b, k: (b, 0, 0)),
        pl.BlockSpec((bt, N, 3), lambda b, k: (b, 0, 0)),
    ]
    out_shape = [
        jax.ShapeDtypeStruct((B, N, H), jnp.float32),
        jax.ShapeDtypeStruct((B, N, 3), jnp.float32),
    ]
    scratch_shapes = [
        pltpu.VMEM((bt, N, H), jnp.float32),   # mi accumulator
        pltpu.VMEM((bt, N, 3), jnp.float32),   # coord-update accumulator
    ]

    kt = N // tk
    pair = B * N * N
    mm_flops = 2 * (2 * pair * H * H               # edge 2nd + coord 1st layers
                    + kt * 2 * B * N * H * H       # per-step w1a / w1b rows
                    + 3 * B * N * H * H)           # node model
    vpu_flops = pair * (14 * H + 96)
    weight_bytes = sum(int(w.size) * w.dtype.itemsize for w in weights)
    cost = pl.CostEstimate(
        flops=int(mm_flops + vpu_flops),
        transcendentals=int(3 * pair * H + B * N * H),
        bytes_accessed=int(4 * B * N * (3 * H + 10)) + weight_bytes,
    )

    fn = pl.pallas_call(
        _e_gcl_kernel,
        grid=(B // bt, N // tk),
        in_specs=in_specs,
        out_specs=out_specs,
        out_shape=out_shape,
        scratch_shapes=scratch_shapes,
        compiler_params=pltpu.CompilerParams(
            dimension_semantics=("parallel", "arbitrary"),
            vmem_limit_bytes=vmem_limit),
        cost_estimate=cost,
    )
    h_new, x_new = fn(h, h, x, x, mask_f, mask_f, *weights)
    return h_new, x_new


def make_params(key, H):
    ks = jax.random.split(key, 6)

    def lin(k, fan_in, fan_out):
        k1, k2 = jax.random.split(k)
        bound = 1.0 / (fan_in ** 0.5)
        W = jax.random.uniform(k1, (fan_in, fan_out), jnp.float32, -bound, bound)
        b = jax.random.uniform(k2, (1, fan_out), jnp.float32, -bound, bound)
        return W, b

    W_e1, b1 = lin(ks[0], 2 * H + 1, H)   # edge_mlp Linear(2H+1, H)
    W_e2, b2 = lin(ks[1], H, H)           # edge_mlp Linear(H, H)
    W_n1, bn1 = lin(ks[2], 2 * H, H)      # node_mlp Linear(H + H, H)
    W_n2, bn2 = lin(ks[3], H, H)          # node_mlp Linear(H, H)
    W_c1, bc1 = lin(ks[4], H, H)          # coord_mlp Linear(H, H)
    gain = 0.001                          # xavier_uniform(gain=0.001), no bias
    limit = gain * (6.0 / (H + 1)) ** 0.5
    w_c2 = jax.random.uniform(ks[5], (H, 1), jnp.float32, -limit, limit)

    return dict(
        w1a=W_e1[:H], w1b=W_e1[H:2 * H], w1c=W_e1[2 * H:2 * H + 1], b1=b1,
        w2=W_e2, b2=b2,
        wn1a=W_n1[:H], wn1b=W_n1[H:], bn1=bn1, wn2=W_n2, bn2=bn2,
        wc1=W_c1, bc1=bc1, wc2=w_c2)


def reference_forward(h, x, node_mask, params):
    """Plain-JAX dense f32 reference of the same forward pass."""
    B, N, H = h.shape
    rc = CUTOFF
    mm = functools.partial(jnp.matmul, precision=HIGHEST)
    mask = node_mask.astype(jnp.float32)

    diff = x[:, :, None, :] - x[:, None, :, :]
    d2 = jnp.sum(diff * diff, -1)
    D = jnp.sqrt(d2)
    D2 = D * D
    xc = 1.0 - 1.5 / rc ** 2 * D2 + 0.5 / rc ** 3 * (D * D * D)
    cut = jnp.where(D <= 0, 1.0, jnp.where(D >= rc, 0.0, xc))
    eye = jnp.eye(N, dtype=bool)[None]
    valid = (mask[:, :, None] * mask[:, None, :]) \
        * jnp.where(D < rc, 1.0, 0.0) * jnp.where(eye, 0.0, 1.0)

    A = mm(h, params["w1a"])
    Bm = mm(h, params["w1b"])
    lin1 = A[:, :, None, :] + Bm[:, None, :, :] \
        + D2[..., None] * params["w1c"] + params["b1"]
    mid = jax.nn.silu(lin1)
    m = jax.nn.silu(mm(mid, params["w2"]) + params["b2"])
    mij = m * (cut * valid)[..., None]

    mi = jnp.sum(mij, axis=2)
    n1 = jax.nn.silu(mm(h, params["wn1a"]) + mm(mi, params["wn1b"])
                     + params["bn1"])
    h_new = h + mm(n1, params["wn2"]) + params["bn2"]

    c1 = jax.nn.silu(mm(mij, params["wc1"]) + params["bc1"])
    phi = mm(c1, params["wc2"])                    # (B,N,N,1)
    Cn = 1.0 / (N - 1.0)
    upd = jnp.sum(valid[..., None] * diff * phi * Cn, axis=2)
    x_new = jnp.clip(x + upd, -1000.0, 1000.0)
    return h_new, x_new


if __name__ == "__main__":
    B, N, H = 2, 16, 32
    key = jax.random.PRNGKey(0)
    kh, kx, kp = jax.random.split(key, 3)

    h = jax.random.normal(kh, (B, N, H), jnp.float32)
    x = jax.random.uniform(kx, (B, N, 3), jnp.float32, 0.0, 8.0)
    node_mask = jnp.ones((B, N), jnp.float32).at[1, 13:].set(0.0)
    params = make_params(kp, H)

    h_new, x_new = e_gcl_sparse_forward(h, x, node_mask, params)
    jax.block_until_ready((h_new, x_new))

    h_ref, x_ref = reference_forward(h, x, node_mask, params)
    err_h = float(jnp.max(jnp.abs(h_new - h_ref)))
    err_x = float(jnp.max(jnp.abs(x_new - x_ref)))
    # bf16 MXU operands (with f32 accumulation) on the edge first/second layers
    # and the coord layer => looser h tolerance than pure f32; a wrong formula
    # would give O(0.1-1) errors.
    assert err_h < 2e-2 and err_x < 5e-3, (err_h, err_x)
    print("KERNEL_OK")
</pallas_src>

<mosaic_0001>
module attributes {stable_mosaic.version = 11 : i64} {
  func.func @_e_gcl_kernel(%arg0: i32, %arg1: i32, %arg2: memref<1x16x32xf32, #tpu.memory_space<vmem>>, %arg3: memref<1x16x32xf32, #tpu.memory_space<vmem>>, %arg4: memref<1x16x3xf32, #tpu.memory_space<vmem>>, %arg5: memref<1x16x3xf32, #tpu.memory_space<vmem>>, %arg6: memref<1x16x1xf32, #tpu.memory_space<vmem>>, %arg7: memref<1x16x1xf32, #tpu.memory_space<vmem>>, %arg8: memref<32x32xbf16, #tpu.memory_space<vmem>>, %arg9: memref<32x32xbf16, #tpu.memory_space<vmem>>, %arg10: memref<1x32xf32, #tpu.memory_space<vmem>>, %arg11: memref<1x32xf32, #tpu.memory_space<vmem>>, %arg12: memref<32x32xbf16, #tpu.memory_space<vmem>>, %arg13: memref<1x32xf32, #tpu.memory_space<vmem>>, %arg14: memref<32x32xf32, #tpu.memory_space<vmem>>, %arg15: memref<32x32xf32, #tpu.memory_space<vmem>>, %arg16: memref<1x32xf32, #tpu.memory_space<vmem>>, %arg17: memref<32x32xf32, #tpu.memory_space<vmem>>, %arg18: memref<1x32xf32, #tpu.memory_space<vmem>>, %arg19: memref<32x32xbf16, #tpu.memory_space<vmem>>, %arg20: memref<1x32xf32, #tpu.memory_space<vmem>>, %arg21: memref<1x32xf32, #tpu.memory_space<vmem>>, %arg22: memref<1x16x32xf32, #tpu.memory_space<vmem>>, %arg23: memref<1x16x3xf32, #tpu.memory_space<vmem>>, %arg24: memref<1x16x32xf32, #tpu.memory_space<vmem>>, %arg25: memref<1x16x3xf32, #tpu.memory_space<vmem>>) attributes {dimension_semantics = [#tpu.dimension_semantics<parallel>, #tpu.dimension_semantics<arbitrary>], iteration_bounds = array<i64: 2, 1>, scalar_prefetch = 0 : i64, scratch_operands = 2 : i64, tpu.core_type = #tpu.core_type<tc>, window_params = [{transform_indices = @transform_0, window_bounds = array<i64: 1, 16, 32>}, {transform_indices = @transform_1, window_bounds = array<i64: 1, 16, 32>}, {transform_indices = @transform_2, window_bounds = array<i64: 1, 16, 3>}, {transform_indices = @transform_3, window_bounds = array<i64: 1, 16, 3>}, {transform_indices = @transform_4, window_bounds = array<i64: 1, 16, 1>}, {transform_indices = @transform_5, window_bounds = array<i64: 1, 16, 1>}, {pipeline_mode = #tpu.pipeline_mode<synchronous>, transform_indices = @transform_6, window_bounds = array<i64: 32, 32>}, {pipeline_mode = #tpu.pipeline_mode<synchronous>, transform_indices = @transform_7, window_bounds = array<i64: 32, 32>}, {pipeline_mode = #tpu.pipeline_mode<synchronous>, transform_indices = @transform_8, window_bounds = array<i64: 1, 32>}, {pipeline_mode = #tpu.pipeline_mode<synchronous>, transform_indices = @transform_9, window_bounds = array<i64: 1, 32>}, {pipeline_mode = #tpu.pipeline_mode<synchronous>, transform_indices = @transform_10, window_bounds = array<i64: 32, 32>}, {pipeline_mode = #tpu.pipeline_mode<synchronous>, transform_indices = @transform_11, window_bounds = array<i64: 1, 32>}, {pipeline_mode = #tpu.pipeline_mode<synchronous>, transform_indices = @transform_12, window_bounds = array<i64: 32, 32>}, {pipeline_mode = #tpu.pipeline_mode<synchronous>, transform_indices = @transform_13, window_bounds = array<i64: 32, 32>}, {pipeline_mode = #tpu.pipeline_mode<synchronous>, transform_indices = @transform_14, window_bounds = array<i64: 1, 32>}, {pipeline_mode = #tpu.pipeline_mode<synchronous>, transform_indices = @transform_15, window_bounds = array<i64: 32, 32>}, {pipeline_mode = #tpu.pipeline_mode<synchronous>, transform_indices = @transform_16, window_bounds = array<i64: 1, 32>}, {pipeline_mode = #tpu.pipeline_mode<synchronous>, transform_indices = @transform_17, window_bounds = array<i64: 32, 32>}, {pipeline_mode = #tpu.pipeline_mode<synchronous>, transform_indices = @transform_18, window_bounds = array<i64: 1, 32>}, {pipeline_mode = #tpu.pipeline_mode<synchronous>, transform_indices = @transform_19, window_bounds = array<i64: 1, 32>}, {transform_indices = @transform_20, window_bounds = array<i64: 1, 16, 32>}, {transform_indices = @transform_21, window_bounds = array<i64: 1, 16, 3>}]} {
    %c16_i32 = arith.constant 16 : i32
    %0 = arith.muli %arg1, %c16_i32 : i32
    %c0 = arith.constant 0 : index
    %c0_0 = arith.constant 0 : index
    %c0_1 = arith.constant 0 : index
    %1 = vector.load %arg2[%c0, %c0_0, %c0_1] : memref<1x16x32xf32, #tpu.memory_space<vmem>>, vector<1x16x32xf32>
    %c0_2 = arith.constant 0 : index
    %c0_3 = arith.constant 0 : index
    %c0_4 = arith.constant 0 : index
    %2 = vector.load %arg4[%c0_2, %c0_3, %c0_4] : memref<1x16x3xf32, #tpu.memory_space<vmem>>, vector<1x16x3xf32>
    %3 = vector.shape_cast %1 : vector<1x16x32xf32> to vector<16x32xf32>
    %c0_i32 = arith.constant 0 : i32
    %4 = arith.cmpi eq, %arg1, %c0_i32 : i32
    %5 = arith.extui %4 : i1 to i32
    %c0_i32_5 = arith.constant 0 : i32
    %6 = arith.cmpi ne, %5, %c0_i32_5 : i32
    scf.if %6 {
      %cst_77 = arith.constant 0.000000e+00 : f32
      %165 = vector.broadcast %cst_77 : f32 to vector<1x16x32xf32>
      %c0_78 = arith.constant 0 : index
      %c0_79 = arith.constant 0 : index
      %c0_80 = arith.constant 0 : index
      %166 = vector.load %arg24[%c0_78, %c0_79, %c0_80] : memref<1x16x32xf32, #tpu.memory_space<vmem>>, vector<1x16x32xf32>
      tpu.vector_store %arg24[%c0_78, %c0_79, %c0_80], %165 {strides = array<i32>} : memref<1x16x32xf32, #tpu.memory_space<vmem>>, vector<1x16x32xf32>,
      %cst_81 = arith.constant 0.000000e+00 : f32
      %167 = vector.broadcast %cst_81 : f32 to vector<1x16x3xf32>
      %c0_82 = arith.constant 0 : index
      %c0_83 = arith.constant 0 : index
      %c0_84 = arith.constant 0 : index
      %168 = vector.load %arg25[%c0_82, %c0_83, %c0_84] : memref<1x16x3xf32, #tpu.memory_space<vmem>>, vector<1x16x3xf32>
      tpu.vector_store %arg25[%c0_82, %c0_83, %c0_84], %167 {strides = array<i32>} : memref<1x16x3xf32, #tpu.memory_space<vmem>>, vector<1x16x3xf32>,
    } else {
    }
    %c0_6 = arith.constant 0 : index
    %c0_7 = arith.constant 0 : index
    %c0_8 = arith.constant 0 : index
    %7 = vector.load %arg5[%c0_6, %c0_7, %c0_8] : memref<1x16x3xf32, #tpu.memory_space<vmem>>, vector<1x16x3xf32>
    %8 = vector.extract_strided_slice %2 {offsets = [0, 0, 0], sizes = [1, 16, 1], strides = [1, 1, 1]} : vector<1x16x3xf32> to vector<1x16x1xf32>
    %9 = vector.extract_strided_slice %7 {offsets = [0, 0, 0], sizes = [1, 16, 1], strides = [1, 1, 1]} : vector<1x16x3xf32> to vector<1x16x1xf32>
    %10 = vector.shape_cast %9 : vector<1x16x1xf32> to vector<1x16xf32>
    %11 = vector.shape_cast %10 : vector<1x16xf32> to vector<1x1x16xf32>
    %12 = vector.broadcast %8 : vector<1x16x1xf32> to vector<1x16x16xf32>
    %13 = vector.broadcast %11 : vector<1x1x16xf32> to vector<1x16x16xf32>
    %14 = arith.subf %12, %13 : vector<1x16x16xf32>
    %15 = vector.extract_strided_slice %2 {offsets = [0, 0, 1], sizes = [1, 16, 1], strides = [1, 1, 1]} : vector<1x16x3xf32> to vector<1x16x1xf32>
    %16 = vector.extract_strided_slice %7 {offsets = [0, 0, 1], sizes = [1, 16, 1], strides = [1, 1, 1]} : vector<1x16x3xf32> to vector<1x16x1xf32>
    %17 = vector.shape_cast %16 : vector<1x16x1xf32> to vector<1x16xf32>
    %18 = vector.shape_cast %17 : vector<1x16xf32> to vector<1x1x16xf32>
    %19 = vector.broadcast %15 : vector<1x16x1xf32> to vector<1x16x16xf32>
    %20 = vector.broadcast %18 : vector<1x1x16xf32> to vector<1x16x16xf32>
    %21 = arith.subf %19, %20 : vector<1x16x16xf32>
    %22 = vector.extract_strided_slice %2 {offsets = [0, 0, 2], sizes = [1, 16, 1], strides = [1, 1, 1]} : vector<1x16x3xf32> to vector<1x16x1xf32>
    %23 = vector.extract_strided_slice %7 {offsets = [0, 0, 2], sizes = [1, 16, 1], strides = [1, 1, 1]} : vector<1x16x3xf32> to vector<1x16x1xf32>
    %24 = vector.shape_cast %23 : vector<1x16x1xf32> to vector<1x16xf32>
    %25 = vector.shape_cast %24 : vector<1x16xf32> to vector<1x1x16xf32>
    %26 = vector.broadcast %22 : vector<1x16x1xf32> to vector<1x16x16xf32>
    %27 = vector.broadcast %25 : vector<1x1x16xf32> to vector<1x16x16xf32>
    %28 = arith.subf %26, %27 : vector<1x16x16xf32>
    %29 = arith.mulf %14, %14 : vector<1x16x16xf32>
    %30 = arith.mulf %21, %21 : vector<1x16x16xf32>
    %31 = arith.addf %29, %30 : vector<1x16x16xf32>
    %32 = arith.mulf %28, %28 : vector<1x16x16xf32>
    %33 = arith.addf %31, %32 : vector<1x16x16xf32>
    %34 = math.sqrt %33 : vector<1x16x16xf32>
    %cst = arith.constant -6.000000e-02 : f32
    %35 = vector.broadcast %cst : f32 to vector<1x16x16xf32>
    %36 = arith.mulf %35, %33 : vector<1x16x16xf32>
    %cst_9 = arith.constant 1.000000e+00 : f32
    %37 = vector.broadcast %cst_9 : f32 to vector<1x16x16xf32>
    %38 = arith.addf %37, %36 : vector<1x16x16xf32>
    %39 = arith.mulf %33, %34 : vector<1x16x16xf32>
    %cst_10 = arith.constant 4.000000e-03 : f32
    %40 = vector.broadcast %cst_10 : f32 to vector<1x16x16xf32>
    %41 = arith.mulf %40, %39 : vector<1x16x16xf32>
    %42 = arith.addf %38, %41 : vector<1x16x16xf32>
    %cst_11 = arith.constant 0.000000e+00 : f32
    %43 = vector.broadcast %cst_11 : f32 to vector<1x16x16xf32>
    %44 = arith.cmpf ole, %34, %43 : vector<1x16x16xf32>
    %cst_12 = arith.constant 5.000000e+00 : f32
    %45 = vector.broadcast %cst_12 : f32 to vector<1x16x16xf32>
    %46 = arith.cmpf oge, %34, %45 : vector<1x16x16xf32>
    %cst_13 = arith.constant 0.000000e+00 : f32
    %47 = vector.broadcast %cst_13 : f32 to vector<1x16x16xf32>
    %48 = arith.select %46, %47, %42 : vector<1x16x16xi1>, vector<1x16x16xf32>
    %cst_14 = arith.constant 1.000000e+00 : f32
    %49 = vector.broadcast %cst_14 : f32 to vector<1x16x16xf32>
    %50 = arith.select %44, %49, %48 : vector<1x16x16xi1>, vector<1x16x16xf32>
    %51 = tpu.iota {dimensions = array<i32: 1>} : vector<1x16x16xi32>
    %52 = tpu.iota {dimensions = array<i32: 2>} : vector<1x16x16xi32>
    %53 = vector.broadcast %0 : i32 to vector<1x16x16xi32>
    %54 = arith.addi %52, %53 : vector<1x16x16xi32>
    %cst_15 = arith.constant 5.000000e+00 : f32
    %55 = vector.broadcast %cst_15 : f32 to vector<1x16x16xf32>
    %56 = arith.cmpf olt, %34, %55 : vector<1x16x16xf32>
    %57 = arith.cmpi ne, %51, %54 : vector<1x16x16xi32>
    %58 = arith.andi %56, %57 : vector<1x16x16xi1>
    %c0_16 = arith.constant 0 : index
    %c0_17 = arith.constant 0 : index
    %c0_18 = arith.constant 0 : index
    %59 = vector.load %arg6[%c0_16, %c0_17, %c0_18] : memref<1x16x1xf32, #tpu.memory_space<vmem>>, vector<1x16x1xf32>
    %c0_19 = arith.constant 0 : index
    %c0_20 = arith.constant 0 : index
    %c0_21 = arith.constant 0 : index
    %60 = vector.load %arg7[%c0_19, %c0_20, %c0_21] : memref<1x16x1xf32, #tpu.memory_space<vmem>>, vector<1x16x1xf32>
    %61 = vector.shape_cast %60 : vector<1x16x1xf32> to vector<1x1x16xf32>
    %62 = vector.broadcast %59 : vector<1x16x1xf32> to vector<1x16x16xf32>
    %63 = vector.broadcast %61 : vector<1x1x16xf32> to vector<1x16x16xf32>
    %64 = arith.mulf %62, %63 : vector<1x16x16xf32>
    %cst_22 = arith.constant 0.000000e+00 : f32
    %65 = vector.broadcast %cst_22 : f32 to vector<1x16x16xf32>
    %66 = arith.select %58, %64, %65 : vector<1x16x16xi1>, vector<1x16x16xf32>
    %67 = arith.mulf %66, %50 : vector<1x16x16xf32>
    %68 = arith.truncf %3 : vector<16x32xf32> to vector<16x32xbf16>
    %c0_23 = arith.constant 0 : index
    %c0_24 = arith.constant 0 : index
    %69 = vector.load %arg8[%c0_23, %c0_24] : memref<32x32xbf16, #tpu.memory_space<vmem>>, vector<32x32xbf16>
    %cst_25 = arith.constant dense<0.000000e+00> : vector<16x32xf32>
    %70 = tpu.matmul %68, %69, %cst_25 {dimension_numbers = #tpu.dot_dimension_numbers<[1], [0], [0], [1], [0, 0, 1, 1], [], []>} : vector<16x32xbf16>, vector<32x32xbf16>, vector<16x32xf32> -> vector<16x32xf32>
    %71 = vector.shape_cast %70 : vector<16x32xf32> to vector<1x16x1x32xf32>
    %c0_26 = arith.constant 0 : index
    %c0_27 = arith.constant 0 : index
    %c0_28 = arith.constant 0 : index
    %72 = vector.load %arg3[%c0_26, %c0_27, %c0_28] : memref<1x16x32xf32, #tpu.memory_space<vmem>>, vector<1x16x32xf32>
    %73 = vector.shape_cast %72 : vector<1x16x32xf32> to vector<16x32xf32>
    %74 = arith.truncf %73 : vector<16x32xf32> to vector<16x32xbf16>
    %c0_29 = arith.constant 0 : index
    %c0_30 = arith.constant 0 : index
    %75 = vector.load %arg9[%c0_29, %c0_30] : memref<32x32xbf16, #tpu.memory_space<vmem>>, vector<32x32xbf16>
    %cst_31 = arith.constant dense<0.000000e+00> : vector<16x32xf32>
    %76 = tpu.matmul %74, %75, %cst_31 {dimension_numbers = #tpu.dot_dimension_numbers<[1], [0], [0], [1], [0, 0, 1, 1], [], []>} : vector<16x32xbf16>, vector<32x32xbf16>, vector<16x32xf32> -> vector<16x32xf32>
    %77 = vector.shape_cast %76 : vector<16x32xf32> to vector<1x1x16x32xf32>
    %78 = vector.broadcast %71 : vector<1x16x1x32xf32> to vector<1x16x16x32xf32>
    %79 = vector.broadcast %77 : vector<1x1x16x32xf32> to vector<1x16x16x32xf32>
    %80 = arith.addf %78, %79 : vector<1x16x16x32xf32>
    %81 = vector.shape_cast %33 : vector<1x16x16xf32> to vector<1x16x16x1xf32>
    %c0_32 = arith.constant 0 : index
    %c0_33 = arith.constant 0 : index
    %82 = vector.load %arg10[%c0_32, %c0_33] : memref<1x32xf32, #tpu.memory_space<vmem>>, vector<1x32xf32>
    %83 = vector.shape_cast %82 : vector<1x32xf32> to vector<1x1x1x32xf32>
    %84 = vector.broadcast %81 : vector<1x16x16x1xf32> to vector<1x16x16x32xf32>
    %85 = vector.broadcast %83 : vector<1x1x1x32xf32> to vector<1x16x16x32xf32>
    %86 = arith.mulf %84, %85 : vector<1x16x16x32xf32>
    %87 = arith.addf %80, %86 : vector<1x16x16x32xf32>
    %c0_34 = arith.constant 0 : index
    %c0_35 = arith.constant 0 : index
    %88 = vector.load %arg11[%c0_34, %c0_35] : memref<1x32xf32, #tpu.memory_space<vmem>>, vector<1x32xf32>
    %89 = vector.shape_cast %88 : vector<1x32xf32> to vector<1x1x1x32xf32>
    %90 = vector.broadcast %89 : vector<1x1x1x32xf32> to vector<1x16x16x32xf32>
    %91 = arith.addf %87, %90 : vector<1x16x16x32xf32>
    %cst_36 = arith.constant 5.000000e-01 : f32
    %92 = vector.broadcast %cst_36 : f32 to vector<1x16x16x32xf32>
    %93 = arith.mulf %92, %91 : vector<1x16x16x32xf32>
    %94 = math.tanh %93 : vector<1x16x16x32xf32>
    %cst_37 = arith.constant 5.000000e-01 : f32
    %95 = vector.broadcast %cst_37 : f32 to vector<1x16x16x32xf32>
    %96 = arith.mulf %95, %94 : vector<1x16x16x32xf32>
    %cst_38 = arith.constant 5.000000e-01 : f32
    %97 = vector.broadcast %cst_38 : f32 to vector<1x16x16x32xf32>
    %98 = arith.addf %96, %97 : vector<1x16x16x32xf32>
    %99 = arith.mulf %91, %98 : vector<1x16x16x32xf32>
    %100 = vector.shape_cast %99 : vector<1x16x16x32xf32> to vector<256x32xf32>
    %101 = arith.truncf %100 : vector<256x32xf32> to vector<256x32xbf16>
    %c0_39 = arith.constant 0 : index
    %c0_40 = arith.constant 0 : index
    %102 = vector.load %arg12[%c0_39, %c0_40] : memref<32x32xbf16, #tpu.memory_space<vmem>>, vector<32x32xbf16>
    %cst_41 = arith.constant dense<0.000000e+00> : vector<256x32xf32>
    %103 = tpu.matmul %101, %102, %cst_41 {dimension_numbers = #tpu.dot_dimension_numbers<[1], [0], [0], [1], [0, 0, 1, 1], [], []>} : vector<256x32xbf16>, vector<32x32xbf16>, vector<256x32xf32> -> vector<256x32xf32>
    %c0_42 = arith.constant 0 : index
    %c0_43 = arith.constant 0 : index
    %104 = vector.load %arg13[%c0_42, %c0_43] : memref<1x32xf32, #tpu.memory_space<vmem>>, vector<1x32xf32>
    %105 = vector.broadcast %104 : vector<1x32xf32> to vector<256x32xf32>
    %106 = arith.addf %103, %105 : vector<256x32xf32>
    %cst_44 = arith.constant 5.000000e-01 : f32
    %107 = vector.broadcast %cst_44 : f32 to vector<256x32xf32>
    %108 = arith.mulf %107, %106 : vector<256x32xf32>
    %109 = math.tanh %108 : vector<256x32xf32>
    %cst_45 = arith.constant 5.000000e-01 : f32
    %110 = vector.broadcast %cst_45 : f32 to vector<256x32xf32>
    %111 = arith.mulf %110, %109 : vector<256x32xf32>
    %cst_46 = arith.constant 5.000000e-01 : f32
    %112 = vector.broadcast %cst_46 : f32 to vector<256x32xf32>
    %113 = arith.addf %111, %112 : vector<256x32xf32>
    %114 = arith.mulf %106, %113 : vector<256x32xf32>
    %115 = vector.shape_cast %114 : vector<256x32xf32> to vector<1x16x16x32xf32>
    %116 = vector.shape_cast %67 : vector<1x16x16xf32> to vector<1x16x16x1xf32>
    %c0_47 = arith.constant 0 : index
    %c0_48 = arith.constant 0 : index
    %c0_49 = arith.constant 0 : index
    %117 = vector.load %arg24[%c0_47, %c0_48, %c0_49] : memref<1x16x32xf32, #tpu.memory_space<vmem>>, vector<1x16x32xf32>
    %118 = vector.broadcast %116 : vector<1x16x16x1xf32> to vector<1x16x16x32xf32>
    %119 = arith.mulf %115, %118 : vector<1x16x16x32xf32>
    %cst_50 = arith.constant dense<0.000000e+00> : vector<1x16x32xf32>
    %120 = vector.multi_reduction <add>, %119, %cst_50 [2] : vector<1x16x16x32xf32> to vector<1x16x32xf32>
    %121 = arith.addf %117, %120 : vector<1x16x32xf32>
    %c0_51 = arith.constant 0 : index
    %c0_52 = arith.constant 0 : index
    %c0_53 = arith.constant 0 : index
    %122 = vector.load %arg24[%c0_51, %c0_52, %c0_53] : memref<1x16x32xf32, #tpu.memory_space<vmem>>, vector<1x16x32xf32>
    tpu.vector_store %arg24[%c0_51, %c0_52, %c0_53], %121 {strides = array<i32>} : memref<1x16x32xf32, #tpu.memory_space<vmem>>, vector<1x16x32xf32>,
    %123 = arith.truncf %114 : vector<256x32xf32> to vector<256x32xbf16>
    %c0_54 = arith.constant 0 : index
    %c0_55 = arith.constant 0 : index
    %124 = vector.load %arg19[%c0_54, %c0_55] : memref<32x32xbf16, #tpu.memory_space<vmem>>, vector<32x32xbf16>
    %cst_56 = arith.constant dense<0.000000e+00> : vector<256x32xf32>
    %125 = tpu.matmul %123, %124, %cst_56 {dimension_numbers = #tpu.dot_dimension_numbers<[1], [0], [0], [1], [0, 0, 1, 1], [], []>} : vector<256x32xbf16>, vector<32x32xbf16>, vector<256x32xf32> -> vector<256x32xf32>
    %126 = vector.shape_cast %125 : vector<256x32xf32> to vector<1x16x16x32xf32>
    %127 = vector.broadcast %116 : vector<1x16x16x1xf32> to vector<1x16x16x32xf32>
    %128 = arith.mulf %127, %126 : vector<1x16x16x32xf32>
    %c0_57 = arith.constant 0 : index
    %c0_58 = arith.constant 0 : index
    %129 = vector.load %arg20[%c0_57, %c0_58] : memref<1x32xf32, #tpu.memory_space<vmem>>, vector<1x32xf32>
    %130 = vector.shape_cast %129 : vector<1x32xf32> to vector<1x1x1x32xf32>
    %131 = vector.broadcast %130 : vector<1x1x1x32xf32> to vector<1x16x16x32xf32>
    %132 = arith.addf %128, %131 : vector<1x16x16x32xf32>
    %cst_59 = arith.constant 5.000000e-01 : f32
    %133 = vector.broadcast %cst_59 : f32 to vector<1x16x16x32xf32>
    %134 = arith.mulf %133, %132 : vector<1x16x16x32xf32>
    %135 = math.tanh %134 : vector<1x16x16x32xf32>
    %cst_60 = arith.constant 5.000000e-01 : f32
    %136 = vector.broadcast %cst_60 : f32 to vector<1x16x16x32xf32>
    %137 = arith.mulf %136, %135 : vector<1x16x16x32xf32>
    %cst_61 = arith.constant 5.000000e-01 : f32
    %138 = vector.broadcast %cst_61 : f32 to vector<1x16x16x32xf32>
    %139 = arith.addf %137, %138 : vector<1x16x16x32xf32>
    %140 = arith.mulf %132, %139 : vector<1x16x16x32xf32>
    %c0_62 = arith.constant 0 : index
    %c0_63 = arith.constant 0 : index
    %141 = vector.load %arg21[%c0_62, %c0_63] : memref<1x32xf32, #tpu.memory_space<vmem>>, vector<1x32xf32>
    %142 = vector.shape_cast %141 : vector<1x32xf32> to vector<1x1x1x32xf32>
    %143 = vector.broadcast %142 : vector<1x1x1x32xf32> to vector<1x16x16x32xf32>
    %144 = arith.mulf %140, %143 : vector<1x16x16x32xf32>
    %cst_64 = arith.constant dense<0.000000e+00> : vector<1x16x16xf32>
    %145 = vector.multi_reduction <add>, %144, %cst_64 [3] : vector<1x16x16x32xf32> to vector<1x16x16xf32>
    %146 = arith.mulf %66, %145 : vector<1x16x16xf32>
    %cst_65 = arith.constant 0.0666666701 : f32
    %147 = vector.broadcast %cst_65 : f32 to vector<1x16x16xf32>
    %148 = arith.mulf %146, %147 : vector<1x16x16xf32>
    %149 = arith.mulf %14, %148 : vector<1x16x16xf32>
    %cst_66 = arith.constant dense<0.000000e+00> : vector<1x16xf32>
    %150 = vector.multi_reduction <add>, %149, %cst_66 [2] : vector<1x16x16xf32> to vector<1x16xf32>
    %151 = arith.mulf %21, %148 : vector<1x16x16xf32>
    %cst_67 = arith.constant dense<0.000000e+00> : vector<1x16xf32>
    %152 = vector.multi_reduction <add>, %151, %cst_67 [2] : vector<1x16x16xf32> to vector<1x16xf32>
    %153 = arith.mulf %28, %148 : vector<1x16x16xf32>
    %cst_68 = arith.constant dense<0.000000e+00> : vector<1x16xf32>
    %154 = vector.multi_reduction <add>, %153, %cst_68 [2] : vector<1x16x16xf32> to vector<1x16xf32>
    %155 = vector.shape_cast %150 : vector<1x16xf32> to vector<1x16x1xf32>
    %156 = vector.shape_cast %152 : vector<1x16xf32> to vector<1x16x1xf32>
    %157 = vector.shape_cast %154 : vector<1x16xf32> to vector<1x16x1xf32>
    %158 = tpu.concatenate %155, %156, %157 in 2 : vector<1x16x1xf32>, vector<1x16x1xf32>, vector<1x16x1xf32> -> vector<1x16x3xf32>
    %c0_69 = arith.constant 0 : index
    %c0_70 = arith.constant 0 : index
    %c0_71 = arith.constant 0 : index
    %159 = vector.load %arg25[%c0_69, %c0_70, %c0_71] : memref<1x16x3xf32, #tpu.memory_space<vmem>>, vector<1x16x3xf32>
    %160 = arith.addf %159, %158 : vector<1x16x3xf32>
    %c0_72 = arith.constant 0 : index
    %c0_73 = arith.constant 0 : index
    %c0_74 = arith.constant 0 : index
    %161 = vector.load %arg25[%c0_72, %c0_73, %c0_74] : memref<1x16x3xf32, #tpu.memory_space<vmem>>, vector<1x16x3xf32>
    tpu.vector_store %arg25[%c0_72, %c0_73, %c0_74], %160 {strides = array<i32>} : memref<1x16x3xf32, #tpu.memory_space<vmem>>, vector<1x16x3xf32>,
    %c0_i32_75 = arith.constant 0 : i32
    %162 = arith.cmpi eq, %arg1, %c0_i32_75 : i32
    %163 = arith.extui %162 : i1 to i32
    %c0_i32_76 = arith.constant 0 : i32
    %164 = arith.cmpi ne, %163, %c0_i32_76 : i32
    scf.if %164 {
      %c0_77 = arith.constant 0 : index
      %c0_78 = arith.constant 0 : index
      %c0_79 = arith.constant 0 : index
      %165 = vector.load %arg24[%c0_77, %c0_78, %c0_79] : memref<1x16x32xf32, #tpu.memory_space<vmem>>, vector<1x16x32xf32>
      %166 = vector.shape_cast %165 : vector<1x16x32xf32> to vector<16x32xf32>
      %c0_80 = arith.constant 0 : index
      %c0_81 = arith.constant 0 : index
      %167 = vector.load %arg14[%c0_80, %c0_81] : memref<32x32xf32, #tpu.memory_space<vmem>>, vector<32x32xf32>
      %cst_82 = arith.constant dense<0.000000e+00> : vector<16x32xf32>
      %168 = tpu.matmul %3, %167, %cst_82 {dimension_numbers = #tpu.dot_dimension_numbers<[1], [0], [0], [1], [0, 0, 1, 1], [], []>, precision = #tpu.contract_precision<fp32>} : vector<16x32xf32>, vector<32x32xf32>, vector<16x32xf32> -> vector<16x32xf32>
      %c0_83 = arith.constant 0 : index
      %c0_84 = arith.constant 0 : index
      %169 = vector.load %arg15[%c0_83, %c0_84] : memref<32x32xf32, #tpu.memory_space<vmem>>, vector<32x32xf32>
      %cst_85 = arith.constant dense<0.000000e+00> : vector<16x32xf32>
      %170 = tpu.matmul %166, %169, %cst_85 {dimension_numbers = #tpu.dot_dimension_numbers<[1], [0], [0], [1], [0, 0, 1, 1], [], []>, precision = #tpu.contract_precision<fp32>} : vector<16x32xf32>, vector<32x32xf32>, vector<16x32xf32> -> vector<16x32xf32>
      %171 = arith.addf %168, %170 : vector<16x32xf32>
      %c0_86 = arith.constant 0 : index
      %c0_87 = arith.constant 0 : index
      %172 = vector.load %arg16[%c0_86, %c0_87] : memref<1x32xf32, #tpu.memory_space<vmem>>, vector<1x32xf32>
      %173 = vector.broadcast %172 : vector<1x32xf32> to vector<16x32xf32>
      %174 = arith.addf %171, %173 : vector<16x32xf32>
      %cst_88 = arith.constant 5.000000e-01 : f32
      %175 = vector.broadcast %cst_88 : f32 to vector<16x32xf32>
      %176 = arith.mulf %175, %174 : vector<16x32xf32>
      %177 = math.tanh %176 : vector<16x32xf32>
      %cst_89 = arith.constant 5.000000e-01 : f32
      %178 = vector.broadcast %cst_89 : f32 to vector<16x32xf32>
      %179 = arith.mulf %178, %177 : vector<16x32xf32>
      %cst_90 = arith.constant 5.000000e-01 : f32
      %180 = vector.broadcast %cst_90 : f32 to vector<16x32xf32>
      %181 = arith.addf %179, %180 : vector<16x32xf32>
      %182 = arith.mulf %174, %181 : vector<16x32xf32>
      %c0_91 = arith.constant 0 : index
      %c0_92 = arith.constant 0 : index
      %183 = vector.load %arg17[%c0_91, %c0_92] : memref<32x32xf32, #tpu.memory_space<vmem>>, vector<32x32xf32>
      %cst_93 = arith.constant dense<0.000000e+00> : vector<16x32xf32>
      %184 = tpu.matmul %182, %183, %cst_93 {dimension_numbers = #tpu.dot_dimension_numbers<[1], [0], [0], [1], [0, 0, 1, 1], [], []>, precision = #tpu.contract_precision<fp32>} : vector<16x32xf32>, vector<32x32xf32>, vector<16x32xf32> -> vector<16x32xf32>
      %c0_94 = arith.constant 0 : index
      %c0_95 = arith.constant 0 : index
      %185 = vector.load %arg18[%c0_94, %c0_95] : memref<1x32xf32, #tpu.memory_space<vmem>>, vector<1x32xf32>
      %186 = vector.broadcast %185 : vector<1x32xf32> to vector<16x32xf32>
      %187 = arith.addf %184, %186 : vector<16x32xf32>
      %188 = vector.shape_cast %187 : vector<16x32xf32> to vector<1x16x32xf32>
      %189 = arith.addf %1, %188 : vector<1x16x32xf32>
      %c0_96 = arith.constant 0 : index
      %c0_97 = arith.constant 0 : index
      %c0_98 = arith.constant 0 : index
      %190 = vector.load %arg22[%c0_96, %c0_97, %c0_98] : memref<1x16x32xf32, #tpu.memory_space<vmem>>, vector<1x16x32xf32>
      tpu.vector_store %arg22[%c0_96, %c0_97, %c0_98], %189 {strides = array<i32>} : memref<1x16x32xf32, #tpu.memory_space<vmem>>, vector<1x16x32xf32>,
      %c0_99 = arith.constant 0 : index
      %c0_100 = arith.constant 0 : index
      %c0_101 = arith.constant 0 : index
      %191 = vector.load %arg25[%c0_99, %c0_100, %c0_101] : memref<1x16x3xf32, #tpu.memory_space<vmem>>, vector<1x16x3xf32>
      %192 = arith.addf %2, %191 : vector<1x16x3xf32>
      %cst_102 = arith.constant -1.000000e+03 : f32
      %cst_103 = arith.constant 1.000000e+03 : f32
      %193 = vector.broadcast %cst_102 : f32 to vector<1x16x3xf32>
      %194 = arith.maximumf %193, %192 : vector<1x16x3xf32>
      %195 = vector.broadcast %cst_103 : f32 to vector<1x16x3xf32>
      %196 = arith.minimumf %195, %194 : vector<1x16x3xf32>
      %c0_104 = arith.constant 0 : index
      %c0_105 = arith.constant 0 : index
      %c0_106 = arith.constant 0 : index
      %197 = vector.load %arg23[%c0_104, %c0_105, %c0_106] : memref<1x16x3xf32, #tpu.memory_space<vmem>>, vector<1x16x3xf32>
      tpu.vector_store %arg23[%c0_104, %c0_105, %c0_106], %196 {strides = array<i32>} : memref<1x16x3xf32, #tpu.memory_space<vmem>>, vector<1x16x3xf32>,
    } else {
    }
    return
  }
  func.func @transform_0(%arg0: i32, %arg1: i32) -> (i32, i32, i32) {
    %c0_i32 = arith.constant 0 : i32
    %c0_i32_0 = arith.constant 0 : i32
    %c0_i32_1 = arith.constant 0 : i32
    return %arg0, %c0_i32, %c0_i32_0 : i32, i32, i32
  }
  func.func @transform_1(%arg0: i32, %arg1: i32) -> (i32, i32, i32) {
    %c0_i32 = arith.constant 0 : i32
    %c0_i32_0 = arith.constant 0 : i32
    return %arg0, %arg1, %c0_i32 : i32, i32, i32
  }
  func.func @transform_2(%arg0: i32, %arg1: i32) -> (i32, i32, i32) {
    %c0_i32 = arith.constant 0 : i32
    %c0_i32_0 = arith.constant 0 : i32
    %c0_i32_1 = arith.constant 0 : i32
    return %arg0, %c0_i32, %c0_i32_0 : i32, i32, i32
  }
  func.func @transform_3(%arg0: i32, %arg1: i32) -> (i32, i32, i32) {
    %c0_i32 = arith.constant 0 : i32
    %c0_i32_0 = arith.constant 0 : i32
    return %arg0, %arg1, %c0_i32 : i32, i32, i32
  }
  func.func @transform_4(%arg0: i32, %arg1: i32) -> (i32, i32, i32) {
    %c0_i32 = arith.constant 0 : i32
    %c0_i32_0 = arith.constant 0 : i32
    %c0_i32_1 = arith.constant 0 : i32
    return %arg0, %c0_i32, %c0_i32_0 : i32, i32, i32
  }
  func.func @transform_5(%arg0: i32, %arg1: i32) -> (i32, i32, i32) {
    %c0_i32 = arith.constant 0 : i32
    %c0_i32_0 = arith.constant 0 : i32
    return %arg0, %arg1, %c0_i32 : i32, i32, i32
  }
  func.func @transform_6(%arg0: i32, %arg1: i32) -> (i32, i32) {
    %c0_i32 = arith.constant 0 : i32
    %c0_i32_0 = arith.constant 0 : i32
    %c0_i32_1 = arith.constant 0 : i32
    return %c0_i32, %c0_i32_0 : i32, i32
  }
  func.func @transform_7(%arg0: i32, %arg1: i32) -> (i32, i32) {
    %c0_i32 = arith.constant 0 : i32
    %c0_i32_0 = arith.constant 0 : i32
    %c0_i32_1 = arith.constant 0 : i32
    return %c0_i32, %c0_i32_0 : i32, i32
  }
  func.func @transform_8(%arg0: i32, %arg1: i32) -> (i32, i32) {
    %c0_i32 = arith.constant 0 : i32
    %c0_i32_0 = arith.constant 0 : i32
    %c0_i32_1 = arith.constant 0 : i32
    return %c0_i32, %c0_i32_0 : i32, i32
  }
  func.func @transform_9(%arg0: i32, %arg1: i32) -> (i32, i32) {
    %c0_i32 = arith.constant 0 : i32
    %c0_i32_0 = arith.constant 0 : i32
    %c0_i32_1 = arith.constant 0 : i32
    return %c0_i32, %c0_i32_0 : i32, i32
  }
  func.func @transform_10(%arg0: i32, %arg1: i32) -> (i32, i32) {
    %c0_i32 = arith.constant 0 : i32
    %c0_i32_0 = arith.constant 0 : i32
    %c0_i32_1 = arith.constant 0 : i32
    return %c0_i32, %c0_i32_0 : i32, i32
  }
  func.func @transform_11(%arg0: i32, %arg1: i32) -> (i32, i32) {
    %c0_i32 = arith.constant 0 : i32
    %c0_i32_0 = arith.constant 0 : i32
    %c0_i32_1 = arith.constant 0 : i32
    return %c0_i32, %c0_i32_0 : i32, i32
  }
  func.func @transform_12(%arg0: i32, %arg1: i32) -> (i32, i32) {
    %c0_i32 = arith.constant 0 : i32
    %c0_i32_0 = arith.constant 0 : i32
    %c0_i32_1 = arith.constant 0 : i32
    return %c0_i32, %c0_i32_0 : i32, i32
  }
  func.func @transform_13(%arg0: i32, %arg1: i32) -> (i32, i32) {
    %c0_i32 = arith.constant 0 : i32
    %c0_i32_0 = arith.constant 0 : i32
    %c0_i32_1 = arith.constant 0 : i32
    return %c0_i32, %c0_i32_0 : i32, i32
  }
  func.func @transform_14(%arg0: i32, %arg1: i32) -> (i32, i32) {
    %c0_i32 = arith.constant 0 : i32
    %c0_i32_0 = arith.constant 0 : i32
    %c0_i32_1 = arith.constant 0 : i32
    return %c0_i32, %c0_i32_0 : i32, i32
  }
  func.func @transform_15(%arg0: i32, %arg1: i32) -> (i32, i32) {
    %c0_i32 = arith.constant 0 : i32
    %c0_i32_0 = arith.constant 0 : i32
    %c0_i32_1 = arith.constant 0 : i32
    return %c0_i32, %c0_i32_0 : i32, i32
  }
  func.func @transform_16(%arg0: i32, %arg1: i32) -> (i32, i32) {
    %c0_i32 = arith.constant 0 : i32
    %c0_i32_0 = arith.constant 0 : i32
    %c0_i32_1 = arith.constant 0 : i32
    return %c0_i32, %c0_i32_0 : i32, i32
  }
  func.func @transform_17(%arg0: i32, %arg1: i32) -> (i32, i32) {
    %c0_i32 = arith.constant 0 : i32
    %c0_i32_0 = arith.constant 0 : i32
    %c0_i32_1 = arith.constant 0 : i32
    return %c0_i32, %c0_i32_0 : i32, i32
  }
  func.func @transform_18(%arg0: i32, %arg1: i32) -> (i32, i32) {
    %c0_i32 = arith.constant 0 : i32
    %c0_i32_0 = arith.constant 0 : i32
    %c0_i32_1 = arith.constant 0 : i32
    return %c0_i32, %c0_i32_0 : i32, i32
  }
  func.func @transform_19(%arg0: i32, %arg1: i32) -> (i32, i32) {
    %c0_i32 = arith.constant 0 : i32
    %c0_i32_0 = arith.constant 0 : i32
    %c0_i32_1 = arith.constant 0 : i32
    return %c0_i32, %c0_i32_0 : i32, i32
  }
  func.func @transform_20(%arg0: i32, %arg1: i32) -> (i32, i32, i32) {
    %c0_i32 = arith.constant 0 : i32
    %c0_i32_0 = arith.constant 0 : i32
    %c0_i32_1 = arith.constant 0 : i32
    return %arg0, %c0_i32, %c0_i32_0 : i32, i32, i32
  }
  func.func @transform_21(%arg0: i32, %arg1: i32) -> (i32, i32, i32) {
    %c0_i32 = arith.constant 0 : i32
    %c0_i32_0 = arith.constant 0 : i32
    %c0_i32_1 = arith.constant 0 : i32
    return %arg0, %c0_i32, %c0_i32_0 : i32, i32, i32
  }
}

</mosaic_0001>

<bundles_post_ra>
// kernel: tpu_custom_call.1
= control target key start
LH: loop header
LB: loop body
LE: loop exit
PB: predicated region body
PF: predicated region fallthrough
CT: control target
= control target key end

     0   :  { %s8569_s0 = inlined_call_operand.vmem [shape: f32[2,16,32], index: 0, kind: input, shape index: {}]   ;;  %s8570_s1 = inlined_call_operand.vmem [shape: f32[2,16,32], index: 1, kind: input, shape index: {}]   ;;  %s8571_s2 = inlined_call_operand.vmem [shape: f32[2,16,3], index: 2, kind: input, shape index: {}]   ;;  %s8572_s3 = inlined_call_operand.vmem [shape: f32[2,16,3], index: 3, kind: input, shape index: {}]   ;;  %s8573_s4 = inlined_call_operand.vmem [shape: f32[2,16,1], index: 4, kind: input, shape index: {}]   ;;  %s8574_s5 = inlined_call_operand.vmem [shape: f32[2,16,1], index: 5, kind: input, shape index: {}]   ;;  %s8575_s6 = inlined_call_operand.hbm [shape: bf16[32,32], index: 6, kind: input, shape index: {}]   ;;  %s8576_s7 = inlined_call_operand.hbm [shape: bf16[32,32], index: 7, kind: input, shape index: {}]   ;;  %s8577_s8 = inlined_call_operand.vmem [shape: f32[1,32], index: 8, kind: input, shape index: {}]   ;;  %s8578_s9 = inlined_call_operand.hbm [shape: f32[1,32], index: 9, kind: input, shape index: {}]   ;;  %s8579_s10 = inlined_call_operand.vmem [shape: bf16[32,32], index: 10, kind: input, shape index: {}]   ;;  %s8580_s11 = inlined_call_operand.hbm [shape: f32[1,32], index: 11, kind: input, shape index: {}]   ;;  %s8581_s12 = inlined_call_operand.vmem [shape: f32[32,32], index: 12, kind: input, shape index: {}]   ;;  %s8582_s13 = inlined_call_operand.vmem [shape: f32[32,32], index: 13, kind: input, shape index: {}]   ;;  %s8583_s14 = inlined_call_operand.vmem [shape: f32[1,32], index: 14, kind: input, shape index: {}]   ;;  %s8584_s15 = inlined_call_operand.vmem [shape: f32[32,32], index: 15, kind: input, shape index: {}]   ;;  %s8585_s16 = inlined_call_operand.vmem [shape: f32[1,32], index: 16, kind: input, shape index: {}]   ;;  %s8586_s17 = inlined_call_operand.vmem [shape: bf16[32,32], index: 17, kind: input, shape index: {}]   ;;  %s8587_s18 = inlined_call_operand.vmem [shape: f32[1,32], index: 18, kind: input, shape index: {}]   ;;  %s8588_s19 = inlined_call_operand.vmem [shape: f32[1,32], index: 19, kind: input, shape index: {}]   ;;  %s8589_s20 = inlined_call_operand.hbm [shape: f32[2,16,32], index: 20, kind: output, shape index: {0}]   ;;  %s8590_s21 = inlined_call_operand.vmem [shape: f32[2,16,3], index: 21, kind: output, shape index: {1}]  }
   0x1   :  { %8649 = sst [smem:[#allocation52_spill]] %s8569_s0 }
   0x2   :  { %8650 = sst [smem:[#allocation53_spill]] %s8570_s1 }
   0x3   :  { %8651 = sst [smem:[#allocation54_spill]] %s8571_s2 }
   0x4   :  { %8652 = sst [smem:[#allocation55_spill]] %s8572_s3 }
   0x5   :  { %8653 = sst [smem:[#allocation56_spill]] %s8573_s4 }
   0x6   :  { %8654 = sst [smem:[#allocation57_spill]] %s8574_s5 }
   0x7   :  { %8655 = sst [smem:[#allocation58_spill]] %s8576_s7 }
   0x8   :  { %8656 = sst [smem:[#allocation59_spill]] %s8583_s14 }
   0x9   :  { %8657 = sst [smem:[#allocation60_spill]] %s8585_s16 }
   0xa   :  { %8658 = sst [smem:[#allocation61_spill]] %s8589_s20 }
   0xb   :  { %8659 = sst [smem:[#allocation62_spill]] %s8590_s21 }
   0xc   :  { %27 = vsyncpa [#allocation5], 0 }
   0xd   :  { %28 = vsyncpa [#allocation8], 0 }
   0xe   :  { %29 = vsyncpa [#allocation11], 0 }
   0xf   :  { %30 = vsyncpa [#allocation6], 0 }
  0x10   :  { %32 = vsyncpa [#allocation6 + $0x1], 0  ;;  %s6797_s2 = smov 0   ;;  %s6799_s25 = smov 0  }
  0x11   :  { %s6801_s26 = smov 0   ;;  %s6803_s27 = smov 0  }
  0x12   :  { %s6805_s3 = smov 0   ;;  %s6807_s28 = smov 0  }
  0x13 LB: > { %8660 = sst [smem:[#allocation17_spill]] %s6650_s2  ;;  %s5426_s29 = sadd.s32 4294967295, %s6670_s28   ;;  %s6670_s28 = sphi %s6807_s28, %s38_s28   ;;  %s6666_s3 = sphi %s6805_s3, %s8773_s3   ;;  %s6662_s27 = sphi %s6803_s27, %s8772_s27   ;;  %s6658_s26 = sphi %s6801_s26, %s8771_s26   ;;  %s6654_s25 = sphi %s6799_s25, %s8770_s25   ;;  %s6650_s2 = sphi %s6797_s2, %s8769_s2  }
  0x14   : > { %8661 = sst [smem:[#allocation18_spill]] %s6654_s25  ;;  %s5427_s0 = sadd.s32 4294967294, %s6670_s28  }
  0x15   : > { %8662 = sst [smem:[#allocation19_spill]] %s6658_s26  ;;  %s50_s4 = sadd.s32 1, %s6666_s3 }
  0x16   : > { %8663 = sst [smem:[#allocation20_spill]] %s6666_s3  ;;  %s513_s30 = sadd.s32 1, %s6658_s26 }
  0x17   : > { %8664 = sst [smem:[#allocation21_spill]] %s6670_s28  ;;  %p52_p0 = scmp.ge.s32.totalorder %s50_s4, 2 }
  0x18   : > { %p523_p1 = scmp.ne.s32.totalorder %s6658_s26, %s6654_s25  ;;  %p524_p2 = scmp.eq.s32.totalorder %s5426_s29, 1 }
  0x19   : > { %p529_p3 = scmp.ne.s32.totalorder %s6654_s25, %s6650_s2  ;;  %s8775_s4 = smov (%p52_p0, %s50_s4), 0 }
  0x1a   : > { %8665 = sst [smem:[#allocation22_spill]] %s8775_s4  ;;  %p6837_p4 = por %p524_p2, %p523_p1 }
  0x1b   : > { %p530_p5 = scmp.eq.s32.totalorder %s5427_s0, 1  ;;  %s510_s22 = ssub.s32 %s6666_s3, %s8775_s4 }
  0x1c   : > { %s8666_s5 = scalar_select %p6837_p4, 1, 0 }
  0x1d   : > { %p5428_p6 = scmp.ge.s32.totalorder %s6670_s28, 1  ;;  %p511_p7 = scmp.eq.s32.totalorder %s510_s22, 0 }
  0x1e   : > { %8667 = sst [smem:[#allocation23_spill]] %s8666_s5  ;;  %p6844_p8 = por %p530_p5, %p529_p3 }
  0x1f   : > { %p563_p9 = scmp.lt.s32.totalorder %s6670_s28, 3  ;;  %p6856_p11 = scmp.eq.s32.totalorder %s5426_s29, 0 }
  0x20   : > { %s8668_s23 = scalar_select %p6844_p8, 1, 0 }
  0x21   : > { %s6850_s1 = scalar_select %p511_p7, %s6658_s26, %s513_s30  }
  0x22   : > { %8669 = sst [smem:[#allocation24_spill]] %s8668_s23  ;;  %p6852_p10 = pnand %p5428_p6, %p563_p9 }
  0x23   : > { %8670 = sst [smem:[#allocation25_spill]] %s6850_s1  ;;  %s6672_s0 = smov [#allocation7]  }
  0x24   : > { %s8671_s24 = scalar_select %p6852_p10, 1, 0 }
  0x25   : > { %s8672_s2 = scalar_select %p6856_p11, 1, 0 }
  0x26   : > { %p6154_p12 = pneg %p6852_p10  ;;  %s588_s22 = sshll.u32 %s6672_s0, 4  ;;  %s589_s22 = int_to_ptr.vmem [resolvable:$true] %s588_s22 }
  0x27   : > { %s6673_s30 = smov [#allocation4]   ;;  %s8674_s7 = sld [smem:[#allocation58_spill]] }
  0x28   : > { %p6864_p13 = pnand %p6856_p11, %p6154_p12  ;;  %s575_s3 = sshll.u32 %s6673_s30, 4  ;;  %s576_s3 = int_to_ptr.vmem [resolvable:$true] %s575_s3 }
  0x2a   : > { %p6876_p1 = pneg %p6864_p13 }
  0x2d   : > { %s6468_s29 = scalar_lea.hbm %s8674_s7, 256 }
  0x2e   : > { %p6469_p0 = scmp.ne.s32.totalorder %s8674_s7, %s6468_s29  ;;  %p6475_p5 = scmp.lt.u32.totalorder %s6468_s29, %s8674_s7 }
  0x30   : > { %p6471_p2 = pnand %p6876_p1, %p6469_p0 }
  0x32   : > { %p6472_p3 = pneg %p6471_p2 }
  0x34   : > { %p6477_p6 = pnand %p6475_p5, %p6472_p3 }
  0x36   : > { %6480 = shalt.err (!%p6477_p6)
}
  0x37   : > { %s6481_s26 = scalar_lea.vmem %s589_s22, 256  ;;  %p6489_p8 = scmp.lt.s32.totalorder %s589_s22, %s589_s22 }
  0x38   : > { %p6482_p7 = scmp.ne.s32.totalorder %s589_s22, %s6481_s26  ;;  %p6490_p4 = scmp.lt.s32.totalorder %s6481_s26, %s6481_s26 }
  0x3a   : > { %p6484_p9 = pnand %p6482_p7, %p6876_p1  ;;  %p6491_p11 = por %p6490_p4, %p6489_p8 }
  0x3c   : > { %p6485_p12 = pneg %p6484_p9 }
  0x3e   : > { %p6492_p10 = pnand %p6491_p11, %p6485_p12 }
  0x40   : > { %6495 = shalt.err (!%p6492_p10)
}
  0x41   : > { %s6674_s28 = smov 64   ;;  %s6675_s23 = smov 4  }
  0x42   : > { %6160 = dma.hbm_to_vmem [thread:$0]  (!%p6864_p13), %s8674_s7, 256, %s589_s22, [#allocation8], %s6674_s28, %s6674_s28, %s6675_s23  }
  0x43   : > { %s6496_s29 = scalar_lea.hbm %s8575_s6, 256 }
  0x44   : > { %p6497_p4 = scmp.ne.s32.totalorder %s8575_s6, %s6496_s29  ;;  %p6503_p11 = scmp.lt.u32.totalorder %s6496_s29, %s8575_s6 }
  0x46   : > { %p6499_p8 = pnand %p6497_p4, %p6876_p1 }
  0x48   : > { %p6500_p10 = pneg %p6499_p8 }
  0x4a   : > { %p6505_p0 = pnand %p6503_p11, %p6500_p10 }
  0x4c   : > { %6508 = shalt.err (!%p6505_p0)
}
  0x4d   : > { %s6509_s20 = scalar_lea.vmem %s576_s3, 256  ;;  %p6517_p6 = scmp.lt.s32.totalorder %s576_s3, %s576_s3 }
  0x4e   : > { %p6510_p2 = scmp.ne.s32.totalorder %s576_s3, %s6509_s20  ;;  %p6518_p7 = scmp.lt.s32.totalorder %s6509_s20, %s6509_s20 }
  0x50   : > { %p6512_p3 = pnand %p6510_p2, %p6876_p1  ;;  %p6519_p9 = por %p6518_p7, %p6517_p6 }
  0x52   : > { %p6513_p5 = pneg %p6512_p3 }
  0x54   : > { %p6520_p12 = pnand %p6519_p9, %p6513_p5 }
  0x56   : > { %6523 = shalt.err (!%p6520_p12)
}
  0x57   : > { %6157 = dma.hbm_to_vmem [thread:$0]  (!%p6864_p13), %s8575_s6, 256, %s576_s3, [#allocation5], %s6674_s28, %s6674_s28, %s6675_s23  }
  0x58   : > { %s6676_s21 = smov [#allocation9]   ;;  %s6677_s5 = smov [#allocation10]  }
  0x59   : > { %s605_s22 = sshll.u32 %s6676_s21, 4  ;;  %s619_s1 = sshll.u32 %s6677_s5, 4  ;;  %s606_s22 = int_to_ptr.vmem [resolvable:$true] %s605_s22  ;;  %s620_s1 = int_to_ptr.vmem [resolvable:$true] %s619_s1 }
  0x5a   : > { %s6524_s26 = scalar_lea.hbm %s8578_s9, 16 }
  0x5b   : > { %p6525_p4 = scmp.ne.s32.totalorder %s8578_s9, %s6524_s26  ;;  %p6531_p11 = scmp.lt.u32.totalorder %s6524_s26, %s8578_s9 }
  0x5d   : > { %p6527_p8 = pnand %p6525_p4, %p6876_p1 }
  0x5f   : > { %p6528_p10 = pneg %p6527_p8 }
  0x61   : > { %p6533_p0 = pnand %p6531_p11, %p6528_p10 }
  0x63   : > { %6536 = shalt.err (!%p6533_p0)
}
  0x64   : > { %s6537_s3 = scalar_lea.vmem %s606_s22, 16  ;;  %s6544_s28 = scalar_lea.vmem %s606_s22, 32 }
  0x65   : > { %p6538_p2 = scmp.ne.s32.totalorder %s606_s22, %s6537_s3  ;;  %p6545_p6 = scmp.lt.s32.totalorder %s606_s22, %s606_s22 }
  0x66   : > { %p6546_p7 = scmp.lt.s32.totalorder %s6544_s28, %s6537_s3 }
  0x67   : > { %p6540_p3 = pnand %p6538_p2, %p6876_p1 }
  0x68   : > { %p6547_p9 = por %p6546_p7, %p6545_p6 }
  0x69   : > { %p6541_p5 = pneg %p6540_p3 }
  0x6b   : > { %p6548_p12 = pnand %p6547_p9, %p6541_p5 }
  0x6d   : > { %6551 = shalt.err (!%p6548_p12)
}
  0x6e   : > { %6163 = dma.hbm_to_vmem [thread:$0]  (!%p6864_p13), %s8578_s9, 16, %s606_s22, [#allocation8]  }
  0x6f   : > { %s6552_s21 = scalar_lea.hbm %s8580_s11, 16 }
  0x70   : > { %p6553_p4 = scmp.ne.s32.totalorder %s8580_s11, %s6552_s21  ;;  %p6559_p11 = scmp.lt.u32.totalorder %s6552_s21, %s8580_s11 }
  0x72   : > { %p6555_p8 = pnand %p6553_p4, %p6876_p1 }
  0x74   : > { %p6556_p10 = pneg %p6555_p8 }
  0x76   : > { %p6561_p0 = pnand %p6559_p11, %p6556_p10 }
  0x78   : > { %6564 = shalt.err (!%p6561_p0)
}
  0x79   : > { %s6565_s20 = scalar_lea.vmem %s620_s1, 16  ;;  %s6572_s22 = scalar_lea.vmem %s620_s1, 32 }
  0x7a   : > { %p6566_p2 = scmp.ne.s32.totalorder %s620_s1, %s6565_s20  ;;  %p6573_p6 = scmp.lt.s32.totalorder %s620_s1, %s620_s1 }
  0x7b   : > { %p6574_p7 = scmp.lt.s32.totalorder %s6572_s22, %s6565_s20 }
  0x7c   : > { %p6568_p3 = pnand %p6566_p2, %p6876_p1 }
  0x7d   : > { %p6575_p9 = por %p6574_p7, %p6573_p6 }
  0x7e   : > { %p6569_p5 = pneg %p6568_p3 }
  0x80   : > { %p6576_p12 = pnand %p6575_p9, %p6569_p5 }
  0x82   : > { %6579 = shalt.err (!%p6576_p12)
}
  0x83   : > { %6166 = dma.hbm_to_vmem [thread:$0]  (!%p6864_p13), %s8580_s11, 16, %s620_s1, [#allocation11]  }
  0x84   : > { %p8676_p4 = scmp.ne.s32.totalorder %s8671_s24, 0 }
  0x86   : > { %719 = sbr.rel (%p8676_p4) target bundleno = 1430 (0x596), region = 100 }
  0x8d   : > { %p8677_p8 = scmp.ne.s32.totalorder %s8672_s2, 0 }
  0x8f   : > { %6633 = dma.done.wait (%p8677_p8), [#allocation5], 256  }
  0x90   : > { %6635 = vsyncadd (%p8677_p8), [#allocation5], 4294967040 }
  0x91   : > { %6637 = dma.done.wait (%p8677_p8), [#allocation8], 272  }
  0x92   : > { %6639 = vsyncadd (%p8677_p8), [#allocation8], 4294967024 }
  0x93   : > { %6641 = dma.done.wait (%p8677_p8), [#allocation11], 16  }
  0x94   : > { %6643 = vsyncadd (%p8677_p8), [#allocation11], 4294967280  ;;  %p833_p13 = scmp.lt.s32.totalorder %s6662_s27, 1  ;;  %v6678_v0 = vmov 1   ;;  %v6679_v1 = vmov 0   ;;  %vm893_vm0 = vcmask 261120   ;;  %v919_v18 = vlaneseq }
  0x95   : > { %6243 = vset.pattern.permute.xlu1 %v6678_v0  ;;  %6242 = vset.pattern.permute.xlu0 %v6679_v1  ;;  %v8606_v2 = vmov 0.0   ;;  %vm6681_vm1 = vmmov 0   ;;  %s8678_s1 = sld [smem:[#allocation55_spill]]  ;;  %s8679_s14 = sld [smem:[#allocation52_spill]]  ;;  %v6253_v5 = vld [vmem:[#allocation4] sm:$0xff]   ;;  %v6254_v6 = vld [vmem:[#allocation4 + $0x8] sm:$0xff]  }
  0x96   : > { %s834_s4 = scalar_select %p833_p13, %s6662_s27, 1  ;;  %5668 = vmatprep.subr.bf16.mxu0 %v8606_v2  ;;  %5676 = vmatprep.subr.bf16.mxu1 %v8606_v2  ;;  %894 = vst.msk [vmem:[#allocation2] sm:$0xff] %vm893_vm0, %v8606_v2  ;;  %895 = vst.msk [vmem:[#allocation2 + $0x8] sm:$0xff] %vm893_vm0, %v8606_v2  ;;  %v6255_v7 = vld [vmem:[#allocation7] sm:$0xff]   ;;  %v6256_v10 = vld [vmem:[#allocation7 + $0x8] sm:$0xff]   ;;  %v6682_v12 = vmov 2  }
  0x97   : > { %5672 = vmatprep.mubr.msk.bf16.mxu0 %vm6681_vm1, %v8606_v2  ;;  %5680 = vmatprep.mubr.msk.bf16.mxu1 %vm6681_vm1, %v8606_v2  ;;  %s8680_s30 = sld [smem:[#allocation53_spill]]  ;;  %s8681_s22 = sld [smem:[#allocation54_spill]]  ;;  %v7000_v19 = vand.u32 127, %v919_v18  ;;  %v7003_v23 = vshrl.u32 %v919_v18, 7  ;;  %vm930_vm2 = vcmask 130112  }
  0x98   : > { %s6970_s2 = sshll.u32 %s834_s4, 4  ;;  %5669 = vmatpush3.bf16.msra.mxu0 %v6253_v5  ;;  %5677 = vmatpush3.bf16.msra.mxu1 %v6255_v7  ;;  %s8699_s7 = sld [smem:[#allocation57_spill]] }
  0x99   : > { %5670 = vmatprep.subr.bf16.mxu0 %v8606_v2  ;;  %5678 = vmatprep.subr.bf16.mxu1 %v8606_v2  ;;  %v925_v22 = vadd.s32 4294967288, %v7000_v19  ;;  %v7010_v27 = vsub.s32 %v7000_v19, %v7003_v23  ;;  %v7034_v49 = vsub.s32 0, %v7003_v23  ;;  %v7045_v56 = vsub.s32 1, %v7003_v23  ;;  %s8700_s5 = sld [smem:[#allocation56_spill]]  ;;  %s8747_s24 = sld [smem:[#allocation59_spill]] }
  0x9a   : > { %v7057_v62 = vsub.s32 2, %v7003_v23  ;;  %v7072_v7 = vsub.s32 4, %v7003_v23  ;;  %vm1061_vm5 = vcmp.ne.s32.totalorder %v7003_v23, %v7000_v19  ;;  %s8762_s20 = sld [smem:[#allocation23_spill]]  ;;  %s8763_s4 = sld [smem:[#allocation61_spill]] }
  0x9b   : > { %s861_s28 = scalar_lea.vmem %s8678_s1, %s6970_s2  ;;  %s6980_s25 = scalar_lea.vmem %s8679_s14, %s6970_s2  ;;  %v7006_v26 = vsub.s32 %v925_v22, %v7003_v23  ;;  %8683 = vst [vmem:[#allocation27_spill] sm:$0xff] %v7010_v27 }
  0x9c   : > { %v899_v3 = vld [vmem:[%s861_s28] sm:$0xff]  ;;  %v900_v4 = vld [vmem:[%s861_s28 + $0x8] sm:$0xff]  ;;  %5671 = vmatpush3.bf16.msra.mxu0 %v6254_v6  ;;  %5679 = vmatpush3.bf16.msra.mxu1 %v6256_v10  ;;  %8691 = vst [vmem:[#allocation35_spill] sm:$0xff] %v7072_v7  ;;  %s8759_s28 = sld [smem:[#allocation62_spill]]  ;;  %s6684_s1 = smov [#allocation12]  }
  0x9d   : > { %957 = vperm.xlu1 %6243, %v899_v3   ;;  %914 = vperm.xlu0 %6242, %v899_v3   ;;  %v885_v8 = vld [vmem:[%s6980_s25] sm:$0xff]  ;;  %v886_v9 = vld [vmem:[%s6980_s25 + $0x8] sm:$0xff]  ;;  %s846_s29 = scalar_lea.vmem %s8680_s30, %s6970_s2  ;;  %s6994_s16 = scalar_lea.vmem %s8681_s22, %s6970_s2  ;;  %8682 = vst [vmem:[#allocation26_spill] sm:$0xff] %v7006_v26 }
  0x9e   : > { %v1109_v11 = vpack.c.bf16 %v886_v9, %v885_v8  ;;  %v1271_v13 = vld [vmem:[%s846_s29] sm:$0xff]  ;;  %v1272_v14 = vld [vmem:[%s846_s29 + $0x8] sm:$0xff]  ;;  %s876_s23 = scalar_lea.vmem %s8699_s7, %s6970_s2  ;;  %s5517_s29 = sshll.u32 %s6662_s27, 8 }
  0x9f   : > { %v887_v15 = vld [vmem:[%s6994_s16] sm:$0xff]  ;;  %v1273_v16 = vpack.c.bf16 %v1272_v14, %v1271_v13  ;;  %v888_v17 = vld [vmem:[%s6994_s16 + $0x8] sm:$0xff]  ;;  %v7087_v13 = vsub.s32 5, %v7003_v23  ;;  %s867_s30 = scalar_lea.vmem %s8700_s5, %s6970_s2 }
  0xa0   : > { %5673 = vmatmul.mubr.msk.bf16.vlgmr.msra.gmra.mrb[0].mxu0 %vm893_vm0, %v1109_v11  ;;  %v6257_v8 = vld [vmem:[%s8579_s10] sm:$0xff]   ;;  %v6258_v14 = vld [vmem:[%s8579_s10 + $0x8] sm:$0xff]   ;;  %p8764_p10 = scmp.ne.s32.totalorder %s8762_s20, 0 }
  0xa1   : > { %960 = vperm.xlu1 %6243, %v900_v4   ;;  %917 = vperm.xlu0 %6242, %v900_v4   ;;  %8692 = vst [vmem:[#allocation36_spill] sm:$0xff] %v7087_v13 }
  0xa2   : > { %5681 = vmatmul.mubr.msk.bf16.vlgmr.msra.gmra.mrb[0].mxu1 %vm893_vm0, %v1273_v16  ;;  %5684 = vmatprep.subr.bf16.mxu0 %v6257_v8  ;;  %s882_s7 = scalar_lea.vmem %s8759_s28, %s6970_s2  ;;  %s6584_s28 = sshll.u32 %s6684_s1, 4  ;;  %s6585_s28 = int_to_ptr.vmem [resolvable:$false] %s6584_s28 }
  0xa3   : > { %6098 = vmatprep.subr.bf16.mxu1 %v6257_v8  ;;  %5685 = vmatpush3.bf16.msra.mxu0 %v6257_v8 }
  0xa4   : > { %6100 = vmatpush3.bf16.msra.mxu1 %v6257_v8  ;;  %5686 = vmatprep.subr.bf16.mxu0 %v6258_v14 }
  0xa5   : > { %6245 = vset.pattern.permute.xlu1 %v6682_v12  ;;  %6244 = vset.pattern.permute.xlu0 %v6682_v12 }
  0xa6   : > { %992 = vperm.xlu1 %6245, %v900_v4   ;;  %989 = vperm.xlu0 %6244, %v899_v3   ;;  %v7066_v4 = vsub.s32 3, %v7003_v23 }
  0xa7   : > { %6099 = vmatprep.subr.bf16.mxu1 %v6258_v14  ;;  %5687 = vmatpush3.bf16.msra.mxu0 %v6258_v14 }
  0xa8   : > { %8690 = vst [vmem:[#allocation34_spill] sm:$0xff] %v7066_v4  ;;  %6101 = vmatpush3.bf16.msra.mxu1 %v6258_v14 }
  0xaa   : > { %6246 = vset.pattern.permute.xlu1 %v6679_v1  ;;  %6247 = vset.pattern.permute.xlu0 %v6678_v0 }
  0xab   : > { %949 = vperm.xlu0 %6247, %v887_v15   ;;  %903 = vperm.xlu1 %6246, %v887_v15  }
  0xaf   : > { %953 = vperm.xlu0 %6247, %v888_v17   ;;  %6248 = vset.pattern.permute.xlu1 %v6682_v12 }
  0xb0   : > { %981 = vperm.xlu1 %6248, %v887_v15  }
  0xb3   : > { %6251 = vset.pattern.permute.xlu0 %v6679_v1 }
  0xb4   : > { %6249 = vset.pattern.permute.xlu1 %v6679_v1 }
  0xb5   : > { %908 = vperm.xlu1 %6249, %v888_v17  }
  0xb9   : > { %6250 = vset.pattern.permute.xlu1 %v6682_v12 }
  0xba   : > { %985 = vperm.xlu1 %6250, %v888_v17   ;;  %v1056_v17 = vadd.s32 8, %v7003_v23 }
  0xbc   : > { %vm1062_vm9 = vcmp.ne.s32.totalorder %v1056_v17, %v7000_v19 }
  0xbe   : > { %6252 = vset.pattern.permute.xlu1 %v6679_v1 }
 0x11c   : > { %v958_v20 = vpop.permute.xlu1 %957  ;;  %v915_v21 = vpop.permute.xlu0 %914 }
 0x11d   : > { %v924_v30 = vrot.slane %v915_v21, %v7010_v27  ;;  %v965_v33 = vrot.slane %v958_v20, %v7010_v27 }
 0x120   : > { %v961_v24 = vpop.permute.xlu1 %960  ;;  %v918_v25 = vpop.permute.xlu0 %917 }
 0x121   : > { %v969_v31 = vrot.slane %v961_v24, %v7006_v26  ;;  %v929_v32 = vrot.slane %v918_v25, %v7006_v26 }
 0x123   : > { %v970_v34 = vsel %vm930_vm2, %v969_v31, %v965_v33  ;;  %v931_v36 = vsel %vm930_vm2, %v929_v32, %v924_v30  ;;  %v7120_v30 = vsub.s32 6, %v7003_v23  ;;  %v7125_v32 = vsub.s32 7, %v7003_v23 }
 0x125   : > { %v993_v28 = vpop.permute.xlu1 %992  ;;  %v990_v29 = vpop.permute.xlu0 %989  ;;  %8697 = vst [vmem:[#allocation37_spill] sm:$0xff] %v7120_v30  ;;  %8698 = vst [vmem:[#allocation38_spill] sm:$0xff] %v7125_v32 }
 0x126   : > { %v1001_v38 = vrot.slane %v993_v28, %v7006_v26  ;;  %v997_v39 = vrot.slane %v990_v29, %v7010_v27 }
 0x128   : > { %v1002_v44 = vsel %vm930_vm2, %v1001_v38, %v997_v39  ;;  %v6683_v39 = vmov 1966171168  }
 0x12a   : > { %v950_v35 = vpop.permute.xlu0 %949  ;;  %v904_v37 = vpop.permute.xlu1 %903 }
 0x12b   : > { %v7020_v40 = vsub.f32 %v950_v35, %v970_v34  ;;  %v7022_v41 = vsub.f32 %v904_v37, %v931_v36 }
 0x12d   : > { %8684 = vst [vmem:[#allocation28_spill] sm:$0xff] %v7020_v40  ;;  %8685 = vst [vmem:[#allocation29_spill] sm:$0xff] %v7022_v41  ;;  %v1014_v42 = vmul.f32 %v7020_v40, %v7020_v40  ;;  %v1012_v43 = vmul.f32 %v7022_v41, %v7022_v41 }
 0x12e   : > { %v954_v50 = vpop.permute.xlu0 %953 }
 0x12f   : > { %v982_v45 = vpop.permute.xlu1 %981  ;;  %v1016_v47 = vadd.f32 %v1014_v42, %v1012_v43  ;;  %v7040_v54 = vsub.f32 %v954_v50, %v970_v34  ;;  %v1175_v42 = vunpack.c.l.s4 %v6683_v39  ;;  %v1065_v50 = vld [vmem:[%s867_s30] sm:$0xff] }
 0x130   : > { %v7029_v46 = vsub.f32 %v982_v45, %v1002_v44  ;;  %v1068_v45 = vld [vmem:[%s876_s23 + $0x8] sm:$0xff] }
 0x131   : > { %8688 = vst [vmem:[#allocation32_spill] sm:$0xff] %v7040_v54  ;;  %v1015_v59 = vmul.f32 %v7040_v54, %v7040_v54 }
 0x132   : > { %8686 = vst [vmem:[#allocation30_spill] sm:$0xff] %v7029_v46  ;;  %v1018_v48 = vmul.f32 %v7029_v46, %v7029_v46 }
 0x134   : > { %v7036_v51 = vadd.f32 %v1018_v48, %v1016_v47  ;;  %v909_v52 = vpop.permute.xlu1 %908  ;;  %v1067_v47 = vld [vmem:[%s876_s23] sm:$0xff]  ;;  %s8760_s23 = sld [smem:[#allocation18_spill]] }
 0x135   : > { %v7038_v53 = vsub.f32 %v909_v52, %v931_v36  ;;  %v1066_v52 = vld [vmem:[%s867_s30 + $0x8] sm:$0xff]  ;;  %s8761_s30 = sld [smem:[#allocation60_spill]] }
 0x136   : > { %v1449_v55 = vrot.slane %v7036_v51, %v7034_v49  ;;  %6261 = vrsqrt.f32 %v7036_v51  ;;  %v1460_v61 = vrot.slane %v7036_v51, %v7045_v56  ;;  %v1471_v3 = vrot.slane %v7036_v51, %v7057_v62 }
 0x137   : > { %8687 = vst [vmem:[#allocation31_spill] sm:$0xff] %v7038_v53  ;;  %v1013_v57 = vmul.f32 %v7038_v53, %v7038_v53  ;;  %v1482_v6 = vrot.slane %v7036_v51, %v7066_v4  ;;  %vm1024_vm3 = vcmp.eq.f32.partialorder %v7036_v51, inf  ;;  %v1027_v10 = vand.u32 2147483648, %v7036_v51 }
 0x138   : > { %1455 = vbcast.lane.b32.xlu1 %v1449_v55, 264  ;;  %1451 = vbcast.lane.b32.xlu0 %v1449_v55, 256  ;;  %vm1026_vm4 = vcmp.eq.f32.partialorder %v7036_v51, 0.0  ;;  %v1493_v12 = vrot.slane %v7036_v51, %v7072_v7  ;;  %v1504_v20 = vrot.slane %v7036_v51, %v7087_v13  ;;  %v1515_v31 = vrot.slane %v7036_v51, %v7120_v30 }
 0x139   : > { %v986_v58 = vpop.permute.xlu1 %985  ;;  %v1017_v63 = vadd.f32 %v1015_v59, %v1013_v57  ;;  %v1526_v33 = vrot.slane %v7036_v51, %v7125_v32 }
 0x13a   : > { %v7052_v60 = vsub.f32 %v986_v58, %v1002_v44  ;;  %v1176_v44 = vunpack.c.0.s8 %v1175_v42  ;;  %s823_s2 = sand.u32 1, %s8760_s23  }
 0x13b   : > { %s5439_s14 = sshll.u32 %s823_s2, 4  ;;  %s8523_s27 = scalar_lea.sflag [#allocation6], %s823_s2 }
 0x13c   : > { %8689 = vst [vmem:[#allocation33_spill] sm:$0xff] %v7052_v60  ;;  %v1019_v0 = vmul.f32 %v7052_v60, %v7052_v60  ;;  %1466 = vbcast.lane.b32.xlu1 %v1460_v61, 264  ;;  %1462 = vbcast.lane.b32.xlu0 %v1460_v61, 256  ;;  %v1179_v48 = vsub.s32 %v1176_v44, %v7003_v23  ;;  %s825_s26 = scalar_lea.vmem [#allocation12], %s5439_s14 }
 0x13d   : > { %s5209_s22 = sshll.u32 %s825_s26, 4  ;;  %s8518_s22 = int_to_ptr.vmem [resolvable:$true] %s5209_s22 }
 0x13e   : > { %v7061_v1 = vadd.f32 %v1019_v0, %v1017_v63  ;;  %s6580_s0 = scalar_lea.vmem %s8518_s22, 256  ;;  %p6587_p2 = scmp.lt.s32.totalorder %s8518_s22, %s6585_s28 }
 0x13f   : > { %p6581_p1 = scmp.ne.s32.totalorder %s8518_s22, %s6580_s0 }
 0x140   : > { %1477 = vbcast.lane.b32.xlu1 %v1471_v3, 264  ;;  %1473 = vbcast.lane.b32.xlu0 %v1471_v3, 256  ;;  %6263 = vrsqrt.f32 %v7061_v1  ;;  %v6262_v5 = vpop.eup %6261  ;;  %vm1031_vm8 = vcmp.eq.f32.partialorder %v7061_v1, inf  ;;  %v1034_v22 = vand.u32 2147483648, %v7061_v1  ;;  %vm1033_vm10 = vcmp.eq.f32.partialorder %v7061_v1, 0.0 }
 0x141   : > { %v1023_v9 = vmul.f32 %v6262_v5, %v7036_v51  ;;  %v1559_v25 = vrot.slane %v7061_v1, %v7057_v62  ;;  %v1570_v19 = vrot.slane %v7061_v1, %v7066_v4  ;;  %v1581_v34 = vrot.slane %v7061_v1, %v7072_v7  ;;  %p6582_p11 = pnand %p6581_p1, %p8764_p10 }
 0x142   : > { %v1592_v35 = vrot.slane %v7061_v1, %v7087_v13  ;;  %v1537_v36 = vrot.slane %v7061_v1, %v7034_v49  ;;  %v1548_v37 = vrot.slane %v7061_v1, %v7045_v56  ;;  %v1603_v38 = vrot.slane %v7061_v1, %v7120_v30 }
 0x143   : > { %v1025_v11 = vsel %vm1024_vm3, %v7036_v51, %v1023_v9  ;;  %v1614_v43 = vrot.slane %v7061_v1, %v7125_v32  ;;  %vm932_vm3 = vcmask 1041409   ;;  %p6583_p0 = pneg %p6582_p11 }
 0x144   : > { %1488 = vbcast.lane.b32.xlu1 %v1482_v6, 264  ;;  %1484 = vbcast.lane.b32.xlu0 %v1482_v6, 256  ;;  %v7092_v15 = vsel %vm1026_vm4, %v1027_v10, %v1025_v11  ;;  %vm933_vm4 = vcmask 1042434  }
 0x145   : > { %vm1059_vm6 = vcmp.lt.f32.partialorder %v7092_v15, 5.0  ;;  %vm1048_vm13 = vcmp.ge.f32.partialorder %v7092_v15, 5.0  ;;  %vm1046_vm14 = vcmp.le.f32.partialorder %v7092_v15, 0.0 }
 0x146   : > { %vm7095_vm7 = vmand %vm1059_vm6, %vm1061_vm5  ;;  %vm935_vm5 = vcmask 1043459   ;;  %vm937_vm6 = vcmask 1044484  }
 0x148   : > { %1499 = vbcast.lane.b32.xlu1 %v1493_v12, 264  ;;  %1495 = vbcast.lane.b32.xlu0 %v1493_v12, 256 }
 0x14a   : > { %v6264_v18 = vpop.eup %6263 }
 0x14b   : > { %v1030_v21 = vmul.f32 %v6264_v18, %v7061_v1 }
 0x14c   : > { %1510 = vbcast.lane.b32.xlu1 %v1504_v20, 264  ;;  %1506 = vbcast.lane.b32.xlu0 %v1504_v20, 256 }
 0x14d   : > { %v1032_v24 = vsel %vm1031_vm8, %v7061_v1, %v1030_v21  ;;  %vm941_vm8 = vcmask 1046534  }
 0x14e   : > { %v7110_v28 = vsel %vm1033_vm10, %v1034_v22, %v1032_v24  ;;  %vm3495_vm10 = vcmask 130048  }
 0x14f   : > { %vm1060_vm11 = vcmp.lt.f32.partialorder %v7110_v28, 5.0  ;;  %vm1049_vm15 = vcmp.ge.f32.partialorder %v7110_v28, 5.0  ;;  %vm1047_vm1 = vcmp.le.f32.partialorder %v7110_v28, 0.0 }
 0x150   : > { %1565 = vbcast.lane.b32.xlu1 %v1559_v25, 264  ;;  %1561 = vbcast.lane.b32.xlu0 %v1559_v25, 256  ;;  %vm7113_vm12 = vmand %vm1060_vm11, %vm1062_vm9  ;;  %vm943_vm9 = vcmask 1047559   ;;  %vm896_vm11 = vcmask 23552  }
 0x154   : > { %1576 = vbcast.lane.b32.xlu1 %v1570_v19, 264  ;;  %1572 = vbcast.lane.b32.xlu0 %v1570_v19, 256 }
 0x158   : > { %1521 = vbcast.lane.b32.xlu1 %v1515_v31, 264  ;;  %1517 = vbcast.lane.b32.xlu0 %v1515_v31, 256 }
 0x15c   : > { %1532 = vbcast.lane.b32.xlu1 %v1526_v33, 264  ;;  %1528 = vbcast.lane.b32.xlu0 %v1526_v33, 256 }
 0x160   : > { %1587 = vbcast.lane.b32.xlu1 %v1581_v34, 264  ;;  %1583 = vbcast.lane.b32.xlu0 %v1581_v34, 256 }
 0x164   : > { %1598 = vbcast.lane.b32.xlu1 %v1592_v35, 264  ;;  %1594 = vbcast.lane.b32.xlu0 %v1592_v35, 256 }
 0x168   : > { %1543 = vbcast.lane.b32.xlu1 %v1537_v36, 264  ;;  %1539 = vbcast.lane.b32.xlu0 %v1537_v36, 256 }
 0x16c   : > { %1554 = vbcast.lane.b32.xlu1 %v1548_v37, 264  ;;  %1550 = vbcast.lane.b32.xlu0 %v1548_v37, 256 }
 0x170   : > { %1609 = vbcast.lane.b32.xlu1 %v1603_v38, 264  ;;  %1605 = vbcast.lane.b32.xlu0 %v1603_v38, 256 }
 0x173   : > { %v1164_v55 = vpop.f32.mrb[0].mxu0 }
 0x174   : > { %1620 = vbcast.lane.b32.xlu1 %v1614_v43, 264  ;;  %1616 = vbcast.lane.b32.xlu0 %v1614_v43, 256  ;;  %v1173_v57 = vcombine.high %v1164_v55, %v1164_v55  ;;  %v1180_v58 = vrot.slane %v1164_v55, %v1179_v48  ;;  %v5674_v59 = vpop.f32.mrb[1].mxu0 }
 0x175   : > { %v1167_v61 = vpop.f32.mrb[2].mxu0  ;;  %v7150_v12 = vpop.f32.mrb[0].mxu1 }
 0x176   : > { %v1187_v63 = vrot.slane %v1173_v57, %v1179_v48  ;;  %v1188_v0 = vcombine.high %v1180_v58, %v1180_v58  ;;  %v1196_v3 = vrot.slane %v1180_v58, %v1179_v48  ;;  %v1222_v5 = vcombine.high %v1167_v61, %v1167_v61  ;;  %v5675_v6 = vpop.f32.mrb[3].mxu0  ;;  %v5682_v17 = vpop.f32.mrb[1].mxu1 }
 0x177   : > { %v1229_v8 = vrot.slane %v1167_v61, %v1179_v48  ;;  %v1330_v19 = vpop.f32.mrb[2].mxu1 }
 0x178   : > { %1085 = vperm.xlu1 %6252, %v1068_v45   ;;  %1082 = vperm.xlu0 %6251, %v1067_v47   ;;  %v1189_v9 = vcombine.high %v1187_v63, %v1187_v63  ;;  %v1203_v10 = vrot.slane %v1187_v63, %v1179_v48  ;;  %v1210_v23 = vrot.slane %v1188_v0, %v1179_v48  ;;  %v5683_v37 = vpop.f32.mrb[3].mxu1 }
 0x179   : > { %v1218_v11 = vcombine.high %v1196_v3, %v1196_v3  ;;  %v1337_v14 = vrot.slane %v1196_v3, %v7034_v49  ;;  %v1236_v18 = vrot.slane %v1222_v5, %v1179_v48  ;;  %v1237_v20 = vcombine.high %v1229_v8, %v1229_v8 }
 0x17a   : > { %v1245_v21 = vrot.slane %v1229_v8, %v1179_v48  ;;  %v1217_v22 = vrot.slane %v1189_v9, %v1179_v48  ;;  %v1219_v24 = vcombine.high %v1203_v10, %v1203_v10  ;;  %v1220_v25 = vcombine.high %v1210_v23, %v1210_v23 }
 0x17b   : > { %v1341_v31 = vrot.slane %v1210_v23, %v7034_v49  ;;  %v1414_v33 = vadd.f32 %v1337_v14, %v7150_v12  ;;  %v1415_v34 = vadd.f32 %v1337_v14, %v1330_v19  ;;  %v1345_v35 = vrot.slane %v1218_v11, %v7034_v49 }
 0x17c   : > { %1071 = vperm.xlu1 %6252, %v1065_v50   ;;  %1076 = vperm.xlu0 %6251, %v1066_v52   ;;  %v1238_v36 = vcombine.high %v1236_v18, %v1236_v18  ;;  %v1252_v42 = vrot.slane %v1236_v18, %v1179_v48  ;;  %v1259_v43 = vrot.slane %v1237_v20, %v1179_v48 }
 0x17d   : > { %v7157_v38 = vadd.f32 %v1341_v31, %v7150_v12  ;;  %v7159_v39 = vadd.f32 %v1341_v31, %v1330_v19  ;;  %v7162_v44 = vadd.f32 %v1345_v35, %v7150_v12  ;;  %v7164_v45 = vadd.f32 %v1345_v35, %v1330_v19 }
 0x17e   : > { %v1266_v47 = vrot.slane %v1238_v36, %v1179_v48  ;;  %v1267_v50 = vcombine.high %v1245_v21, %v1245_v21  ;;  %v1268_v52 = vcombine.high %v1252_v42, %v1252_v42  ;;  %v1269_v55 = vcombine.high %v1259_v43, %v1259_v43 }
 0x17f   : > { %v1369_v57 = vrot.slane %v1245_v21, %v7034_v49  ;;  %v1349_v58 = vrot.slane %v1220_v25, %v7034_v49  ;;  %v1353_v59 = vrot.slane %v1203_v10, %v7034_v49  ;;  %v1357_v61 = vrot.slane %v1217_v22, %v7034_v49 }
 0x180   : > { %v1377_v63 = vrot.slane %v1267_v50, %v7034_v49  ;;  %v1361_v0 = vrot.slane %v1219_v24, %v7034_v49  ;;  %v1381_v48 = vrot.slane %v1269_v55, %v7034_v49  ;;  %v1221_v6 = vcombine.high %v1217_v22, %v1217_v22 }
 0x181   : > { %v7173_v3 = vadd.f32 %v1349_v58, %v7150_v12  ;;  %v7175_v5 = vadd.f32 %v1349_v58, %v1330_v19  ;;  %v7179_v8 = vadd.f32 %v1353_v59, %v7150_v12  ;;  %v7181_v9 = vadd.f32 %v1353_v59, %v1330_v19 }
 0x182   : > { %v7184_v10 = vadd.f32 %v1357_v61, %v7150_v12  ;;  %v7186_v23 = vadd.f32 %v1357_v61, %v1330_v19  ;;  %v7189_v11 = vadd.f32 %v1377_v63, %v7150_v12  ;;  %v7191_v14 = vadd.f32 %v1377_v63, %v1330_v19 }
 0x183   : > { %v7194_v17 = vadd.f32 %v1381_v48, %v7150_v12  ;;  %v7196_v18 = vadd.f32 %v1381_v48, %v1330_v19  ;;  %v7199_v20 = vadd.f32 %v1361_v0, %v7150_v12  ;;  %v7201_v21 = vadd.f32 %v1361_v0, %v1330_v19 }
 0x184   : > { %v1365_v22 = vrot.slane %v1221_v6, %v7034_v49  ;;  %v1385_v24 = vrot.slane %v1252_v42, %v7034_v49  ;;  %v1389_v25 = vrot.slane %v1266_v47, %v7034_v49  ;;  %v7207_v31 = vadd.f32 %v1369_v57, %v7150_v12 }
 0x185   : > { %v7209_v35 = vadd.f32 %v1369_v57, %v1330_v19  ;;  %v1373_v36 = vrot.slane %v1259_v43, %v7034_v49  ;;  %v1393_v43 = vrot.slane %v1268_v52, %v7034_v49  ;;  %v1270_v63 = vcombine.high %v1266_v47, %v1266_v47 }
 0x186   : > { %v7213_v37 = vadd.f32 %v1365_v22, %v7150_v12  ;;  %v7215_v50 = vadd.f32 %v1365_v22, %v1330_v19  ;;  %v7218_v55 = vadd.f32 %v1385_v24, %v7150_v12  ;;  %v7220_v58 = vadd.f32 %v1385_v24, %v1330_v19 }
 0x187   : > { %v7223_v42 = vadd.f32 %v1389_v25, %v7150_v12  ;;  %v7225_v59 = vadd.f32 %v1389_v25, %v1330_v19  ;;  %v7228_v57 = vadd.f32 %v1373_v36, %v7150_v12  ;;  %v7230_v61 = vadd.f32 %v1373_v36, %v1330_v19  ;;  %v7247_v25 = vld [vmem:[%s8577_s8] ss:$0 sm:$0xff] }
 0x188   : > { %v7234_v0 = vadd.f32 %v1393_v43, %v7150_v12  ;;  %v7236_v48 = vadd.f32 %v1393_v43, %v1330_v19  ;;  %v1397_v6 = vrot.slane %v1270_v63, %v7034_v49  ;;  %v7251_v43 = vld [vmem:[#allocation9] ss:$0 sm:$0xff] }
 0x18a   : > { %v7240_v22 = vadd.f32 %v1397_v6, %v7150_v12  ;;  %v7242_v24 = vadd.f32 %v1397_v6, %v1330_v19 }
 0x1aa   : > { %v1452_v36 = vpop.permute.xlu0 %1451  ;;  %v1456_v52 = vpop.permute.xlu1 %1455 }
 0x1ab   : > { %v1629_v47 = vmul.f32 %v7247_v25, %v1452_v36  ;;  %v1630_v2 = vmul.f32 %v7247_v25, %v1456_v52 }
 0x1ad   : > { %v1661_v60 = vadd.f32 %v1629_v47, %v1414_v33  ;;  %v1662_v63 = vadd.f32 %v1630_v2, %v1415_v34 }
 0x1ae   : > { %v1463_v54 = vpop.permute.xlu0 %1462  ;;  %v1467_v12 = vpop.permute.xlu1 %1466 }
 0x1af   : > { %v7254_v19 = vadd.f32 %v7251_v43, %v1661_v60  ;;  %v7257_v6 = vadd.f32 %v7251_v43, %v1662_v63  ;;  %v1631_v53 = vmul.f32 %v7247_v25, %v1463_v54  ;;  %v1632_v46 = vmul.f32 %v7247_v25, %v1467_v12 }
 0x1b1   : > { %v1732_v36 = vmul.f32 0.5, %v7254_v19  ;;  %v1733_v52 = vmul.f32 0.5, %v7257_v6  ;;  %v1663_v40 = vadd.f32 %v1631_v53, %v7157_v38  ;;  %v1664_v2 = vadd.f32 %v1632_v46, %v7159_v39 }
 0x1b2   : > { %v1474_v33 = vpop.permute.xlu0 %1473  ;;  %v1478_v34 = vpop.permute.xlu1 %1477 }
 0x1b3   : > { %6265 = vtanh.f32 %v1732_v36  ;;  %v7266_v60 = vadd.f32 %v7251_v43, %v1663_v40  ;;  %v7269_v47 = vadd.f32 %v7251_v43, %v1664_v2  ;;  %v1633_v54 = vmul.f32 %v7247_v25, %v1474_v33 }
 0x1b4   : > { %6267 = vtanh.f32 %v1733_v52  ;;  %v1634_v63 = vmul.f32 %v7247_v25, %v1478_v34 }
 0x1b5   : > { %v1734_v12 = vmul.f32 0.5, %v7266_v60  ;;  %v1735_v53 = vmul.f32 0.5, %v7269_v47  ;;  %v1665_v46 = vadd.f32 %v1633_v54, %v7162_v44 }
 0x1b6   : > { %v1666_v38 = vadd.f32 %v1634_v63, %v7164_v45  ;;  %v1485_v39 = vpop.permute.xlu0 %1484  ;;  %v1489_v36 = vpop.permute.xlu1 %1488 }
 0x1b7   : > { %6269 = vtanh.f32 %v1734_v12  ;;  %v7278_v40 = vadd.f32 %v7251_v43, %v1665_v46  ;;  %v1635_v2 = vmul.f32 %v7247_v25, %v1485_v39  ;;  %v1636_v52 = vmul.f32 %v7247_v25, %v1489_v36 }
 0x1b8   : > { %6271 = vtanh.f32 %v1735_v53  ;;  %v7283_v33 = vadd.f32 %v7251_v43, %v1666_v38 }
 0x1b9   : > { %v1736_v34 = vmul.f32 0.5, %v7278_v40  ;;  %v1667_v44 = vadd.f32 %v1635_v2, %v7173_v3  ;;  %v1668_v45 = vadd.f32 %v1636_v52, %v7175_v5 }
 0x1ba   : > { %v1737_v54 = vmul.f32 0.5, %v7283_v33  ;;  %v1496_v63 = vpop.permute.xlu0 %1495  ;;  %v1500_v12 = vpop.permute.xlu1 %1499 }
 0x1bb   : > { %6273 = vtanh.f32 %v1736_v34  ;;  %v7290_v46 = vadd.f32 %v7251_v43, %v1667_v44  ;;  %v7293_v39 = vadd.f32 %v7251_v43, %v1668_v45  ;;  %v1637_v53 = vmul.f32 %v7247_v25, %v1496_v63 }
 0x1bc   : > { %6275 = vtanh.f32 %v1737_v54  ;;  %v1638_v38 = vmul.f32 %v7247_v25, %v1500_v12 }
 0x1bd   : > { %v6266_v36 = vpop.eup %6265  ;;  %v1738_v3 = vmul.f32 0.5, %v7290_v46  ;;  %v1739_v5 = vmul.f32 0.5, %v7293_v39  ;;  %v1669_v2 = vadd.f32 %v1637_v53, %v7179_v8 }
 0x1be   : > { %v6268_v52 = vpop.eup %6267  ;;  %v1796_v34 = vmul.f32 0.5, %v6266_v36  ;;  %v1670_v44 = vadd.f32 %v1638_v38, %v7181_v9  ;;  %v1507_v41 = vpop.permute.xlu0 %1506 }
 0x1bf   : > { %v1511_v32 = vpop.permute.xlu1 %1510  ;;  %v1797_v45 = vmul.f32 0.5, %v6268_v52  ;;  %6277 = vtanh.f32 %v1738_v3  ;;  %v7302_v63 = vadd.f32 %v7251_v43, %v1669_v2  ;;  %v1639_v54 = vmul.f32 %v7247_v25, %v1507_v41 }
 0x1c0   : > { %v1828_v12 = vadd.f32 0.5, %v1796_v34  ;;  %6279 = vtanh.f32 %v1739_v5  ;;  %v7306_v30 = vadd.f32 %v7251_v43, %v1670_v44  ;;  %v1640_v8 = vmul.f32 %v7247_v25, %v1511_v32 }
 0x1c1   : > { %v6270_v53 = vpop.eup %6269  ;;  %v1829_v36 = vadd.f32 0.5, %v1797_v45  ;;  %v1740_v9 = vmul.f32 0.5, %v7302_v63  ;;  %v1671_v38 = vadd.f32 %v1639_v54, %v7184_v10  ;;  %v7313_v3 = vmul.f32 %v7092_v15, %v7036_v51 }
 0x1c2   : > { %v6272_v2 = vpop.eup %6271  ;;  %v1860_v41 = vmul.f32 %v1828_v12, %v7254_v19  ;;  %v1798_v52 = vmul.f32 0.5, %v6270_v53  ;;  %v1741_v5 = vmul.f32 0.5, %v7306_v30  ;;  %v1672_v34 = vadd.f32 %v1640_v8, %v7186_v23  ;;  %v1562_v44 = vpop.permute.xlu0 %1561 }
 0x1c3   : > { %v1566_v32 = vpop.permute.xlu1 %1565  ;;  %v1861_v45 = vmul.f32 %v1829_v36, %v7257_v6  ;;  %v1799_v13 = vmul.f32 0.5, %v6272_v2  ;;  %6281 = vtanh.f32 %v1740_v9  ;;  %v7320_v10 = vadd.f32 %v7251_v43, %v1671_v38 }
 0x1c4   : > { %v1830_v54 = vadd.f32 0.5, %v1798_v52  ;;  %6283 = vtanh.f32 %v1741_v5  ;;  %v7323_v7 = vadd.f32 %v7251_v43, %v1672_v34  ;;  %v1649_v19 = vmul.f32 %v7247_v25, %v1562_v44 }
 0x1c5   : > { %v6274_v12 = vpop.eup %6273  ;;  %v1831_v53 = vadd.f32 0.5, %v1799_v13  ;;  %v1742_v23 = vmul.f32 0.5, %v7320_v10  ;;  %v1650_v8 = vmul.f32 %v7247_v25, %v1566_v32  ;;  %v1892_v4 = vpack.c.bf16 %v1861_v45, %v1860_v41 }
 0x1c6   : > { %v6276_v6 = vpop.eup %6275  ;;  %v1862_v36 = vmul.f32 %v1830_v54, %v7266_v60  ;;  %v1800_v9 = vmul.f32 0.5, %v6274_v12  ;;  %v1743_v38 = vmul.f32 0.5, %v7323_v7  ;;  %v1681_v2 = vadd.f32 %v1649_v19, %v7189_v11  ;;  %v1573_v52 = vpop.permute.xlu0 %1572 }
 0x1c7   : > { %v1577_v5 = vpop.permute.xlu1 %1576  ;;  %v1863_v34 = vmul.f32 %v1831_v53, %v7269_v47  ;;  %v1801_v44 = vmul.f32 0.5, %v6276_v6  ;;  %6285 = vtanh.f32 %v1742_v23  ;;  %v1682_v13 = vadd.f32 %v1650_v8, %v7191_v14  ;;  %5688 = vmatprep.mubr.msk.bf16.mxu0 %vm893_vm0, %v1892_v4 }
 0x1c8   : > { %v1832_v32 = vadd.f32 0.5, %v1800_v9  ;;  %6287 = vtanh.f32 %v1743_v38  ;;  %v7335_v41 = vadd.f32 %v7251_v43, %v1681_v2  ;;  %v1651_v60 = vmul.f32 %v7247_v25, %v1573_v52 }
 0x1c9   : > { %v6278_v45 = vpop.eup %6277  ;;  %v1893_v54 = vpack.c.bf16 %v1863_v34, %v1862_v36  ;;  %v1833_v11 = vadd.f32 0.5, %v1801_v44  ;;  %v7339_v19 = vadd.f32 %v7251_v43, %v1682_v13  ;;  %v1652_v47 = vmul.f32 %v7247_v25, %v1577_v5 }
 0x1ca   : > { %v6280_v12 = vpop.eup %6279  ;;  %v7343_v14 = vmul.f32 %v1832_v32, %v7278_v40  ;;  %v1802_v4 = vmul.f32 0.5, %v6278_v45  ;;  %v1752_v53 = vmul.f32 0.5, %v7335_v41  ;;  %v1683_v23 = vadd.f32 %v1651_v60, %v7194_v17  ;;  %v1518_v8 = vpop.permute.xlu0 %1517 }
 0x1cb   : > { %v1522_v6 = vpop.permute.xlu1 %1521  ;;  %v1865_v9 = vmul.f32 %v1833_v11, %v7283_v33  ;;  %v1803_v36 = vmul.f32 0.5, %v6280_v12  ;;  %v1753_v38 = vmul.f32 0.5, %v7339_v19  ;;  %v1684_v2 = vadd.f32 %v1652_v47, %v7196_v18  ;;  %5689 = vmatmul.mubr.msk.bf16.vlgmr.msra.gmra.mrb[4].mxu0 %vm893_vm0, %v1893_v54 }
 0x1cc   : > { %v1834_v52 = vadd.f32 0.5, %v1802_v4  ;;  %6289 = vtanh.f32 %v1752_v53  ;;  %v7352_v40 = vadd.f32 %v7251_v43, %v1683_v23  ;;  %v1641_v5 = vmul.f32 %v7247_v25, %v1518_v8 }
 0x1cd   : > { %v6282_v34 = vpop.eup %6281  ;;  %v1835_v17 = vadd.f32 0.5, %v1803_v36  ;;  %6291 = vtanh.f32 %v1753_v38  ;;  %v7356_v44 = vadd.f32 %v7251_v43, %v1684_v2  ;;  %v1642_v33 = vmul.f32 %v7247_v25, %v1522_v6 }
 0x1ce   : > { %v6284_v13 = vpop.eup %6283  ;;  %v1866_v18 = vmul.f32 %v1834_v52, %v7290_v46  ;;  %v1804_v32 = vmul.f32 0.5, %v6282_v34  ;;  %v1754_v60 = vmul.f32 0.5, %v7352_v40  ;;  %v1673_v45 = vadd.f32 %v1641_v5, %v7199_v20  ;;  %v1529_v54 = vpop.permute.xlu0 %1528 }
 0x1cf   : > { %v1533_v11 = vpop.permute.xlu1 %1532  ;;  %v1867_v47 = vmul.f32 %v1835_v17, %v7293_v39  ;;  %v1805_v12 = vmul.f32 0.5, %v6284_v13  ;;  %v1755_v4 = vmul.f32 0.5, %v7356_v44  ;;  %v1674_v53 = vadd.f32 %v1642_v33, %v7201_v21 }
 0x1d0   : > { %v1836_v23 = vadd.f32 0.5, %v1804_v32  ;;  %6293 = vtanh.f32 %v1754_v60  ;;  %v7366_v8 = vadd.f32 %v7251_v43, %v1673_v45  ;;  %v1643_v46 = vmul.f32 %v7247_v25, %v1529_v54 }
 0x1d1   : > { %v6286_v6 = vpop.eup %6285  ;;  %v1837_v36 = vadd.f32 0.5, %v1805_v12  ;;  %6295 = vtanh.f32 %v1755_v4  ;;  %v7370_v20 = vadd.f32 %v7251_v43, %v1674_v53  ;;  %v1644_v39 = vmul.f32 %v7247_v25, %v1533_v11 }
 0x1d2   : > { %v6288_v38 = vpop.eup %6287  ;;  %v1868_v2 = vmul.f32 %v1836_v23, %v7302_v63  ;;  %v1806_v52 = vmul.f32 0.5, %v6286_v6  ;;  %v1744_v21 = vmul.f32 0.5, %v7366_v8  ;;  %v1675_v5 = vadd.f32 %v1643_v46, %v7213_v37  ;;  %v1584_v34 = vpop.permute.xlu0 %1583 }
 0x1d3   : > { %v1588_v17 = vpop.permute.xlu1 %1587  ;;  %v1869_v33 = vmul.f32 %v1837_v36, %v7306_v30  ;;  %v1807_v13 = vmul.f32 0.5, %v6288_v38  ;;  %v1745_v32 = vmul.f32 0.5, %v7370_v20  ;;  %v1676_v60 = vadd.f32 %v1644_v39, %v7215_v50 }
 0x1d4   : > { %v1838_v45 = vadd.f32 0.5, %v1806_v52  ;;  %6297 = vtanh.f32 %v1744_v21  ;;  %v7380_v54 = vadd.f32 %v7251_v43, %v1675_v5  ;;  %v1894_v63 = vpack.c.bf16 %v1865_v9, %v7343_v14 }
 0x1d5   : > { %v1839_v11 = vadd.f32 0.5, %v1807_v13  ;;  %6299 = vtanh.f32 %v1745_v32  ;;  %v7384_v37 = vadd.f32 %v7251_v43, %v1676_v60  ;;  %v1653_v12 = vmul.f32 %v7247_v25, %v1584_v34 }
 0x1d6   : > { %v6290_v30 = vpop.eup %6289  ;;  %v7388_v4 = vmul.f32 %v1838_v45, %v7320_v10  ;;  %v1746_v50 = vmul.f32 0.5, %v7380_v54  ;;  %5692 = vmatprep.mubr.msk.bf16.mxu0 %vm893_vm0, %v1894_v63  ;;  %v1654_v53 = vmul.f32 %v7247_v25, %v1588_v17  ;;  %v1895_v23 = vpack.c.bf16 %v1867_v47, %v1866_v18  ;;  %v1595_v46 = vpop.permute.xlu0 %1594 }
 0x1d7   : > { %v1599_v14 = vpop.permute.xlu1 %1598  ;;  %v6292_v9 = vpop.eup %6291  ;;  %v7394_v6 = vmul.f32 %v1839_v11, %v7323_v7  ;;  %v1816_v36 = vmul.f32 0.5, %v6290_v30  ;;  %v1747_v39 = vmul.f32 0.5, %v7384_v37  ;;  %v1685_v38 = vadd.f32 %v1653_v12, %v7218_v55 }
 0x1d8   : > { %v1817_v10 = vmul.f32 0.5, %v6292_v9  ;;  %6301 = vtanh.f32 %v1746_v50  ;;  %v1686_v52 = vadd.f32 %v1654_v53, %v7220_v58  ;;  %5693 = vmatmul.mubr.msk.bf16.gmra.mrb[8].mxu0 %vm893_vm0, %v1895_v23  ;;  %v1655_v21 = vmul.f32 %v7247_v25, %v1595_v46 }
 0x1d9   : > { %v1848_v18 = vadd.f32 0.5, %v1816_v36  ;;  %6303 = vtanh.f32 %v1747_v39  ;;  %v7402_v47 = vadd.f32 %v7251_v43, %v1685_v38  ;;  %v1656_v7 = vmul.f32 %v7247_v25, %v1599_v14 }
 0x1da   : > { %v6294_v5 = vpop.eup %6293  ;;  %v1849_v34 = vadd.f32 0.5, %v1817_v10  ;;  %v7406_v17 = vadd.f32 %v7251_v43, %v1686_v52  ;;  %v1687_v55 = vadd.f32 %v1655_v21, %v7223_v42  ;;  %v1896_v13 = vpack.c.bf16 %v1869_v33, %v1868_v2  ;;  %v1540_v58 = vpop.permute.xlu0 %1539 }
 0x1db   : > { %v1544_v32 = vpop.permute.xlu1 %1543  ;;  %v6296_v60 = vpop.eup %6295  ;;  %v7410_v45 = vmul.f32 %v1848_v18, %v7335_v41  ;;  %v1818_v63 = vmul.f32 0.5, %v6294_v5  ;;  %v1756_v11 = vmul.f32 0.5, %v7402_v47  ;;  %v1688_v12 = vadd.f32 %v1656_v7, %v7225_v59 }
 0x1dc   : > { %v1881_v30 = vmul.f32 %v1849_v34, %v7339_v19  ;;  %v1819_v50 = vmul.f32 0.5, %v6296_v60  ;;  %v1757_v53 = vmul.f32 0.5, %v7406_v17  ;;  %v7417_v23 = vadd.f32 %v7251_v43, %v1687_v55  ;;  %5696 = vmatprep.mubr.msk.bf16.mxu0 %vm893_vm0, %v1896_v13 }
 0x1dd   : > { %v1850_v42 = vadd.f32 0.5, %v1818_v63  ;;  %6305 = vtanh.f32 %v1756_v11  ;;  %v7421_v41 = vadd.f32 %v7251_v43, %v1688_v12  ;;  %v1645_v2 = vmul.f32 %v7247_v25, %v1540_v58 }
 0x1de   : > { %v6298_v33 = vpop.eup %6297  ;;  %v1851_v46 = vadd.f32 0.5, %v1819_v50  ;;  %6307 = vtanh.f32 %v1757_v53  ;;  %v1758_v59 = vmul.f32 0.5, %v7417_v23  ;;  %v1646_v19 = vmul.f32 %v7247_v25, %v1544_v32  ;;  %v1551_v14 = vpop.permute.xlu0 %1550 }
 0x1df   : > { %v1555_v9 = vpop.permute.xlu1 %1554  ;;  %v6300_v36 = vpop.eup %6299  ;;  %v1882_v39 = vmul.f32 %v1850_v42, %v7352_v40  ;;  %v1808_v38 = vmul.f32 0.5, %v6298_v33  ;;  %v1759_v10 = vmul.f32 0.5, %v7421_v41  ;;  %v1677_v52 = vadd.f32 %v1645_v2, %v7207_v31 }
 0x1e0   : > { %v1883_v21 = vmul.f32 %v1851_v46, %v7356_v44  ;;  %v1809_v18 = vmul.f32 0.5, %v6300_v36  ;;  %6309 = vtanh.f32 %v1758_v59  ;;  %v1678_v7 = vadd.f32 %v1646_v19, %v7209_v35 }
 0x1e1   : > { %v1840_v5 = vadd.f32 0.5, %v1808_v38  ;;  %6311 = vtanh.f32 %v1759_v10  ;;  %v7432_v34 = vadd.f32 %v7251_v43, %v1677_v52  ;;  %v1897_v55 = vpack.c.bf16 %v7394_v6, %v7388_v4 }
 0x1e2   : > { %v6302_v40 = vpop.eup %6301  ;;  %v1903_v13 = vpack.c.bf16 %v1883_v21, %v1882_v39  ;;  %v1841_v58 = vadd.f32 0.5, %v1809_v18  ;;  %v7437_v32 = vadd.f32 %v7251_v43, %v1678_v7  ;;  %v1647_v31 = vmul.f32 %v7247_v25, %v1551_v14  ;;  %v1606_v44 = vpop.permute.xlu0 %1605 }
 0x1e3   : > { %v1610_v60 = vpop.permute.xlu1 %1609  ;;  %v6304_v63 = vpop.eup %6303  ;;  %v7441_v35 = vmul.f32 %v1840_v5, %v7366_v8  ;;  %v1810_v11 = vmul.f32 0.5, %v6302_v40  ;;  %v1748_v12 = vmul.f32 0.5, %v7432_v34  ;;  %5697 = vmatmul.mubr.msk.bf16.gmra.mrb[12].mxu0 %vm893_vm0, %v1897_v55  ;;  %v1648_v4 = vmul.f32 %v7247_v25, %v1555_v9 }
 0x1e4   : > { %v1873_v6 = vmul.f32 %v1841_v58, %v7370_v20  ;;  %v1811_v50 = vmul.f32 0.5, %v6304_v63  ;;  %v1749_v53 = vmul.f32 0.5, %v7437_v32  ;;  %v1679_v42 = vadd.f32 %v1647_v31, %v7228_v57 }
 0x1e5   : > { %v1842_v2 = vadd.f32 0.5, %v1810_v11  ;;  %6313 = vtanh.f32 %v1748_v12  ;;  %v1680_v33 = vadd.f32 %v1648_v4, %v7230_v61  ;;  %v1902_v8 = vpack.c.bf16 %v1881_v30, %v7410_v45 }
 0x1e6   : > { %v1843_v46 = vadd.f32 0.5, %v1811_v50  ;;  %6315 = vtanh.f32 %v1749_v53  ;;  %v7452_v59 = vadd.f32 %v7251_v43, %v1679_v42  ;;  %v1657_v19 = vmul.f32 %v7247_v25, %v1606_v44  ;;  %v1617_v14 = vpop.permute.xlu0 %1616 }
 0x1e7   : > { %v6306_v20 = vpop.eup %6305  ;;  %v1874_v9 = vmul.f32 %v1842_v2, %v7380_v54  ;;  %v7457_v36 = vadd.f32 %v7251_v43, %v1680_v33  ;;  %5708 = vmatprep.mubr.msk.bf16.mxu1 %vm893_vm0, %v1902_v8  ;;  %v1658_v57 = vmul.f32 %v7247_v25, %v1610_v60  ;;  %v1659_v61 = vmul.f32 %v7247_v25, %v1617_v14  ;;  %v1621_v45 = vpop.permute.xlu1 %1620 }
 0x1e8   : > { %v6308_v30 = vpop.eup %6307  ;;  %v1875_v39 = vmul.f32 %v1843_v46, %v7384_v37  ;;  %v1820_v38 = vmul.f32 0.5, %v6306_v20  ;;  %v1750_v10 = vmul.f32 0.5, %v7452_v59  ;;  %v1689_v52 = vadd.f32 %v1657_v19, %v7234_v0  ;;  %5709 = vmatmul.mubr.msk.bf16.vlgmr.msra.gmra.mrb[4].mxu1 %vm893_vm0, %v1903_v13 }
 0x1e9   : > { %v1821_v54 = vmul.f32 0.5, %v6308_v30  ;;  %v1751_v21 = vmul.f32 0.5, %v7457_v36  ;;  %v1690_v18 = vadd.f32 %v1658_v57, %v7236_v48  ;;  %v1691_v7 = vadd.f32 %v1659_v61, %v7240_v22 }
 0x1ea   : > { %v6310_v5 = vpop.eup %6309  ;;  %v1852_v55 = vadd.f32 0.5, %v1820_v38  ;;  %6317 = vtanh.f32 %v1750_v10  ;;  %v7470_v40 = vadd.f32 %v7251_v43, %v1689_v52  ;;  %v1660_v37 = vmul.f32 %v7247_v25, %v1621_v45 }
 0x1eb   : > { %v6312_v58 = vpop.eup %6311  ;;  %v1853_v31 = vadd.f32 0.5, %v1821_v54  ;;  %v1822_v0 = vmul.f32 0.5, %v6310_v5  ;;  %6319 = vtanh.f32 %v1751_v21  ;;  %v7474_v13 = vadd.f32 %v7251_v43, %v1690_v18 }
 0x1ec   : > { %v1884_v44 = vmul.f32 %v1852_v55, %v7402_v47  ;;  %v1823_v48 = vmul.f32 0.5, %v6312_v58  ;;  %v1760_v22 = vmul.f32 0.5, %v7470_v40  ;;  %v7479_v60 = vadd.f32 %v7251_v43, %v1691_v7 }
 0x1ed   : > { %v1885_v63 = vmul.f32 %v1853_v31, %v7406_v17  ;;  %v1854_v11 = vadd.f32 0.5, %v1822_v0  ;;  %v1761_v25 = vmul.f32 0.5, %v7474_v13  ;;  %v1692_v12 = vadd.f32 %v1660_v37, %v7242_v24 }
 0x1ee   : > { %v1855_v4 = vadd.f32 0.5, %v1823_v48  ;;  %6321 = vtanh.f32 %v1760_v22  ;;  %v1762_v50 = vmul.f32 0.5, %v7479_v60  ;;  %v1898_v53 = vpack.c.bf16 %v1873_v6, %v7441_v35 }
 0x1ef   : > { %v6314_v47 = vpop.eup %6313  ;;  %v1886_v42 = vmul.f32 %v1854_v11, %v7417_v23  ;;  %6323 = vtanh.f32 %v1761_v25  ;;  %v7488_v2 = vadd.f32 %v7251_v43, %v1692_v12  ;;  %v1899_v33 = vpack.c.bf16 %v1875_v39, %v1874_v9 }
 0x1f0   : > { %v6316_v17 = vpop.eup %6315  ;;  %v1887_v8 = vmul.f32 %v1855_v4, %v7421_v41  ;;  %v1812_v46 = vmul.f32 0.5, %v6314_v47  ;;  %6325 = vtanh.f32 %v1762_v50  ;;  %5700 = vmatprep.mubr.msk.bf16.mxu0 %vm893_vm0, %v1898_v53  ;;  %v1904_v24 = vpack.c.bf16 %v1885_v63, %v1884_v44 }
 0x1f1   : > { %v1813_v19 = vmul.f32 0.5, %v6316_v17  ;;  %v1763_v14 = vmul.f32 0.5, %v7488_v2  ;;  %5701 = vmatmul.mubr.msk.bf16.gmra.mrb[16].mxu0 %vm893_vm0, %v1899_v33  ;;  %v1036_v23 = vmul.f32 -0.06, %v7036_v51  ;;  %v1042_v41 = vmul.f32 0.004, %v7313_v3 }
 0x1f2   : > { %v1844_v35 = vadd.f32 0.5, %v1812_v46  ;;  %5712 = vmatprep.mubr.msk.bf16.mxu1 %vm893_vm0, %v1904_v24  ;;  %v1905_v43 = vpack.c.bf16 %v1887_v8, %v1886_v42  ;;  %v1037_v22 = vmul.f32 -0.06, %v7061_v1 }
 0x1f3   : > { %v1845_v6 = vadd.f32 0.5, %v1813_v19  ;;  %6327 = vtanh.f32 %v1763_v14  ;;  %v1038_v30 = vadd.f32 1.0, %v1036_v23 }
 0x1f4   : > { %v6318_v20 = vpop.eup %6317  ;;  %v1876_v9 = vmul.f32 %v1844_v35, %v7432_v34  ;;  %5713 = vmatmul.mubr.msk.bf16.gmra.mrb[8].mxu1 %vm893_vm0, %v1905_v43  ;;  %v1039_v8 = vadd.f32 1.0, %v1037_v22 }
 0x1f5   : > { %v6320_v57 = vpop.eup %6319  ;;  %v1877_v61 = vmul.f32 %v1845_v6, %v7437_v32  ;;  %v1814_v45 = vmul.f32 0.5, %v6318_v20  ;;  %v1044_v54 = vadd.f32 %v1042_v41, %v1038_v30  ;;  %v1041_v32 = vmul.f32 %v7110_v28, %v7061_v1  ;;  %v8705_v30 = vld [vmem:[#allocation36_spill] sm:$0xff] }
 0x1f6   : > { %v1815_v39 = vmul.f32 0.5, %v6320_v57 }
 0x1f7   : > { %v1846_v51 = vadd.f32 0.5, %v1814_v45  ;;  %v1900_v38 = vpack.c.bf16 %v1877_v61, %v1876_v9  ;;  %v1083_v10 = vpop.permute.xlu0 %1082  ;;  %v1086_v52 = vpop.permute.xlu1 %1085  ;;  %v1050_v63 = vsel %vm1048_vm13, 0.0, %v1044_v54  ;;  %v1043_v47 = vmul.f32 0.004, %v1041_v32  ;;  %v8703_v9 = vld [vmem:[#allocation34_spill] sm:$0xff]  ;;  %v8704_v61 = vld [vmem:[#allocation35_spill] sm:$0xff] }
 0x1f8   : > { %v6322_v21 = vpop.eup %6321  ;;  %v1847_v18 = vadd.f32 0.5, %v1815_v39  ;;  %v1090_v3 = vrot.slane %v1083_v10, %v7010_v27  ;;  %v1094_v7 = vrot.slane %v1086_v52, %v7006_v26  ;;  %v1052_v33 = vsel %vm1046_vm14, 1.0, %v1050_v63  ;;  %v8707_v10 = vld [vmem:[#allocation38_spill] sm:$0xff]  ;;  %v7560_v32 = vld [vmem:[#allocation10] ss:$0 sm:$0xff] }
 0x1f9   : > { %v6324_v34 = vpop.eup %6323  ;;  %v1878_v5 = vmul.f32 %v1846_v51, %v7452_v59  ;;  %v1824_v55 = vmul.f32 0.5, %v6322_v21  ;;  %5704 = vmatprep.mubr.msk.bf16.mxu0 %vm893_vm0, %v1900_v38  ;;  %v1045_v14 = vadd.f32 %v1043_v47, %v1039_v8  ;;  %v8706_v51 = vld [vmem:[#allocation37_spill] sm:$0xff] }
 0x1fa   : > { %v6326_v37 = vpop.eup %6325  ;;  %v1879_v58 = vmul.f32 %v1847_v18, %v7457_v36  ;;  %v1825_v31 = vmul.f32 0.5, %v6324_v34  ;;  %v1095_v0 = vsel %vm930_vm2, %v1094_v7, %v1090_v3  ;;  %v6259_v21 = vld [vmem:[%s8586_s17] sm:$0xff]   ;;  %v6260_v3 = vld [vmem:[%s8586_s17 + $0x8] sm:$0xff]  }
 0x1fb   : > { %v1856_v44 = vadd.f32 0.5, %v1824_v55  ;;  %v1826_v48 = vmul.f32 0.5, %v6326_v37  ;;  %v1072_v59 = vpop.permute.xlu1 %1071  ;;  %v1077_v17 = vpop.permute.xlu0 %1076  ;;  %v1051_v35 = vsel %vm1049_vm15, 0.0, %v1045_v14  ;;  %5720 = vmatprep.subr.bf16.mxu1 %v6259_v21 }
 0x1fc   : > { %v1857_v11 = vadd.f32 0.5, %v1825_v31  ;;  %v1901_v25 = vpack.c.bf16 %v1879_v58, %v1878_v5  ;;  %v1103_v12 = vmul.f32 %v1095_v0, %v1072_v59  ;;  %v1104_v23 = vmul.f32 %v1095_v0, %v1077_v17  ;;  %5721 = vmatpush3.bf16.msra.mxu1 %v6259_v21 }
 0x1fd   : > { %v6328_v4 = vpop.eup %6327  ;;  %v1888_v50 = vmul.f32 %v1856_v44, %v7470_v40  ;;  %v1858_v53 = vadd.f32 0.5, %v1826_v48  ;;  %5722 = vmatprep.subr.bf16.mxu1 %v6260_v3 }
 0x1fe   : > { %v1889_v36 = vmul.f32 %v1857_v11, %v7474_v13  ;;  %v1827_v42 = vmul.f32 0.5, %v6328_v4  ;;  %5705 = vmatmul.mubr.msk.bf16.gmra.mrb[20].mxu0 %vm893_vm0, %v1901_v25  ;;  %v7516_v1 = vsel %vm7095_vm7, %v1103_v12, 0.0  ;;  %vm939_vm7 = vcmask 1045509  }
 0x1ff   : > { %8701 = vst [vmem:[#allocation39_spill] sm:$0xff] %v7516_v1  ;;  %v1107_v46 = vmul.f32 %v7516_v1, %v1052_v33  ;;  %v1890_v40 = vmul.f32 %v1858_v53, %v7479_v60  ;;  %v7527_v60 = vsel %vm7113_vm12, %v1104_v23, 0.0  ;;  %v3542_v33 = vld [vmem:[%s8582_s13 + $0x10] sm:$0xff]  ;;  %vm3521_vm12 = vcmask 15360  }
 0x200   : > { %v1859_v24 = vadd.f32 0.5, %v1827_v42  ;;  %v1906_v19 = vpack.c.bf16 %v1889_v36, %v1888_v50  ;;  %8702 = vst [vmem:[#allocation40_spill] sm:$0xff] %v7527_v60  ;;  %5723 = vmatpush3.bf16.msra.mxu1 %v6260_v3  ;;  %v3540_v36 = vld [vmem:[%s8582_s13] sm:$0xff]  ;;  %v3541_v42 = vld [vmem:[%s8582_s13 + $0x8] sm:$0xff] }
 0x201   : > { %v2303_v15 = vrot.slane %v1107_v46, %v7034_v49  ;;  %v2314_v43 = vrot.slane %v1107_v46, %v7045_v56  ;;  %v2325_v41 = vrot.slane %v1107_v46, %v7057_v62  ;;  %v2336_v57 = vrot.slane %v1107_v46, %v8703_v9 }
 0x202   : > { %v1891_v13 = vmul.f32 %v1859_v24, %v7488_v2  ;;  %5716 = vmatprep.mubr.msk.bf16.mxu1 %vm893_vm0, %v1906_v19  ;;  %v1053_v2 = vsel %vm1047_vm1, 1.0, %v1051_v35  ;;  %v2347_v45 = vrot.slane %v1107_v46, %v8704_v61  ;;  %v2380_v52 = vrot.slane %v1107_v46, %v8707_v10 }
 0x203   : > { %2309 = vbcast.lane.b32.xlu0 %v2303_v15, 264  ;;  %2305 = vbcast.lane.b32.xlu1 %v2303_v15, 256  ;;  %v1108_v6 = vmul.f32 %v7527_v60, %v1053_v2  ;;  %v3551_v17 = vand.u32 4294901760, %v3540_v36  ;;  %v3554_v8 = vand.u32 4294901760, %v3541_v42 }
 0x204   : > { %v1907_v16 = vpack.c.bf16 %v1891_v13, %v1890_v40  ;;  %v3557_v40 = vand.u32 4294901760, %v3542_v33 }
 0x205   : > { %v2391_v20 = vrot.slane %v1108_v6, %v7034_v49  ;;  %v2402_v29 = vrot.slane %v1108_v6, %v7045_v56  ;;  %v2413_v28 = vrot.slane %v1108_v6, %v7057_v62  ;;  %v2424_v49 = vrot.slane %v1108_v6, %v8703_v9 }
 0x206   : > { %5717 = vmatmul.mubr.msk.bf16.gmra.mrb[12].mxu1 %vm893_vm0, %v1907_v16  ;;  %v2358_v56 = vrot.slane %v1107_v46, %v8705_v30  ;;  %v2435_v39 = vrot.slane %v1108_v6, %v8704_v61  ;;  %v2369_v62 = vrot.slane %v1107_v46, %v8706_v51  ;;  %v2446_v38 = vrot.slane %v1108_v6, %v8705_v30  ;;  %v7598_v46 = vld [vmem:[%s8582_s13 + $0x18] sm:$0xff] }
 0x207   : > { %2320 = vbcast.lane.b32.xlu0 %v2314_v43, 264  ;;  %2316 = vbcast.lane.b32.xlu1 %v2314_v43, 256  ;;  %v2457_v54 = vrot.slane %v1108_v6, %v8706_v51  ;;  %v2468_v18 = vrot.slane %v1108_v6, %v8707_v10  ;;  %v8626_v24 = vand.u32 4294901760, %v7598_v46  ;;  %v7601_v14 = vpack.c.bf16 %v3554_v8, %v3551_v17 }
 0x208   : > { %v7603_v15 = vsub.f32 %v3540_v36, %v3551_v17  ;;  %v7605_v13 = vsub.f32 %v3541_v42, %v3554_v8 }
 0x209   : > { %v7612_v35 = vpack.c.bf16 %v8626_v24, %v3557_v40  ;;  %5955 = vmatprep.subr.bf16.mxu0 %v7601_v14 }
 0x20a   : > { %5957 = vmatpush3.bf16.msra.mxu0 %v7601_v14 }
 0x20b   : > { %2331 = vbcast.lane.b32.xlu0 %v2325_v41, 264  ;;  %2327 = vbcast.lane.b32.xlu1 %v2325_v41, 256 }
 0x20c   : > { %5959 = vmatprep.subr.bf16.mxu0 %v7612_v35 }
 0x20e   : > { %5961 = vmatpush3.bf16.msra.mxu0 %v7612_v35 }
 0x20f   : > { %2397 = vbcast.lane.b32.xlu0 %v2391_v20, 264  ;;  %2393 = vbcast.lane.b32.xlu1 %v2391_v20, 256  ;;  %v8625_v20 = vand.u32 4294901760, %v7603_v15 }
 0x213   : > { %2408 = vbcast.lane.b32.xlu0 %v2402_v29, 264  ;;  %2404 = vbcast.lane.b32.xlu1 %v2402_v29, 256 }
 0x217   : > { %2342 = vbcast.lane.b32.xlu0 %v2336_v57, 264  ;;  %2338 = vbcast.lane.b32.xlu1 %v2336_v57, 256 }
 0x21b   : > { %2419 = vbcast.lane.b32.xlu0 %v2413_v28, 264  ;;  %2415 = vbcast.lane.b32.xlu1 %v2413_v28, 256 }
 0x21f   : > { %2353 = vbcast.lane.b32.xlu0 %v2347_v45, 264  ;;  %2349 = vbcast.lane.b32.xlu1 %v2347_v45, 256 }
 0x223   : > { %2430 = vbcast.lane.b32.xlu0 %v2424_v49, 264  ;;  %2426 = vbcast.lane.b32.xlu1 %v2424_v49, 256  ;;  %v8624_v49 = vand.u32 4294901760, %v7605_v13 }
 0x227   : > { %2364 = vbcast.lane.b32.xlu0 %v2358_v56, 264  ;;  %2360 = vbcast.lane.b32.xlu1 %v2358_v56, 256 }
 0x22b   : > { %2441 = vbcast.lane.b32.xlu0 %v2435_v39, 264  ;;  %2437 = vbcast.lane.b32.xlu1 %v2435_v39, 256 }
 0x22f   : > { %2375 = vbcast.lane.b32.xlu0 %v2369_v62, 264  ;;  %2371 = vbcast.lane.b32.xlu1 %v2369_v62, 256  ;;  %v3643_v62 = vsub.f32 %v7603_v15, %v8625_v20 }
 0x231   : > { %v3644_v36 = vand.u32 4294901760, %v3643_v62 }
 0x233   : > { %2452 = vbcast.lane.b32.xlu0 %v2446_v38, 264  ;;  %2448 = vbcast.lane.b32.xlu1 %v2446_v38, 256 }
 0x237   : > { %2386 = vbcast.lane.b32.xlu0 %v2380_v52, 264  ;;  %2382 = vbcast.lane.b32.xlu1 %v2380_v52, 256 }
 0x23b   : > { %2463 = vbcast.lane.b32.xlu0 %v2457_v54, 264  ;;  %2459 = vbcast.lane.b32.xlu1 %v2457_v54, 256 }
 0x23f   : > { %2474 = vbcast.lane.b32.xlu0 %v2468_v18, 264  ;;  %2470 = vbcast.lane.b32.xlu1 %v2468_v18, 256 }
 0x275   : > { %v7552_v7 = vpop.permute.xlu1 %2305  ;;  %v7554_v34 = vpop.permute.xlu0 %2309 }
 0x276   : > { %8708 = vst [vmem:[#allocation34_spill] sm:$0xff] %v7554_v34 }
 0x279   : > { %v7556_v5 = vpop.permute.xlu1 %2316  ;;  %v7558_v55 = vpop.permute.xlu0 %2320 }
 0x27d   : > { %v7568_v48 = vpop.permute.xlu1 %2327  ;;  %v7574_v11 = vpop.permute.xlu0 %2331 }
 0x27e   : > { %8709 = vst [vmem:[#allocation35_spill] sm:$0xff] %v7568_v48  ;;  %8710 = vst [vmem:[#allocation36_spill] sm:$0xff] %v7574_v11 }
 0x281   : > { %v7582_v53 = vpop.permute.xlu1 %2393  ;;  %v7584_v47 = vpop.permute.xlu0 %2397 }
 0x285   : > { %v7614_v2 = vpop.permute.xlu1 %2404  ;;  %v7621_v9 = vpop.permute.xlu0 %2408 }
 0x29e   : > { %v5690_v37 = vpop.f32.mrb[4].mxu0 }
 0x29f   : > { %v7563_v58 = vadd.f32 %v5690_v37, %v7560_v32  ;;  %v2013_v31 = vpop.f32.mrb[5].mxu0 }
 0x2a0   : > { %v7566_v0 = vadd.f32 %v7560_v32, %v2013_v31  ;;  %v5691_v44 = vpop.f32.mrb[6].mxu0 }
 0x2a1   : > { %v2142_v22 = vmul.f32 0.5, %v7563_v58  ;;  %v7572_v63 = vadd.f32 %v5691_v44, %v7560_v32  ;;  %v2016_v59 = vpop.f32.mrb[7].mxu0  ;;  %v7641_v44 = vpop.permute.xlu1 %2338 }
 0x2a2   : > { %v2140_v25 = vmul.f32 0.5, %v7566_v0  ;;  %v7578_v12 = vadd.f32 %v7560_v32, %v2016_v59  ;;  %8711 = vst [vmem:[#allocation37_spill] sm:$0xff] %v7641_v44 }
 0x2a3   : > { %6329 = vtanh.f32 %v2142_v22  ;;  %v2143_v4 = vmul.f32 0.5, %v7572_v63 }
 0x2a4   : > { %6331 = vtanh.f32 %v2140_v25  ;;  %v2141_v50 = vmul.f32 0.5, %v7578_v12  ;;  %v3650_v25 = vsub.f32 %v7605_v13, %v8624_v49 }
 0x2a5   : > { %6333 = vtanh.f32 %v2143_v4  ;;  %v7647_v4 = vpop.permute.xlu0 %2342 }
 0x2a6   : > { %6335 = vtanh.f32 %v2141_v50  ;;  %8712 = vst [vmem:[#allocation38_spill] sm:$0xff] %v7647_v4  ;;  %v3651_v8 = vand.u32 4294901760, %v3650_v25 }
 0x2ab   : > { %v5694_v19 = vpop.f32.mrb[8].mxu0 }
 0x2ac   : > { %v7608_v23 = vadd.f32 %v5694_v19, %v7560_v32  ;;  %v2029_v16 = vpop.f32.mrb[9].mxu0 }
 0x2ad   : > { %v6330_v43 = vpop.eup %6329  ;;  %v7617_v6 = vadd.f32 %v7560_v32, %v2029_v16  ;;  %v5695_v41 = vpop.f32.mrb[10].mxu0 }
 0x2ae   : > { %v6332_v29 = vpop.eup %6331  ;;  %v2206_v57 = vmul.f32 0.5, %v6330_v43  ;;  %v2146_v28 = vmul.f32 0.5, %v7608_v23  ;;  %v7625_v61 = vadd.f32 %v5695_v41, %v7560_v32  ;;  %v2032_v45 = vpop.f32.mrb[11].mxu0  ;;  %v7654_v43 = vsub.f32 %v3542_v33, %v3557_v40 }
 0x2af   : > { %v6334_v30 = vpop.eup %6333  ;;  %v2204_v56 = vmul.f32 0.5, %v6332_v29  ;;  %v2144_v39 = vmul.f32 0.5, %v7617_v6  ;;  %v7631_v51 = vadd.f32 %v7560_v32, %v2032_v45  ;;  %v7668_v33 = vpop.permute.xlu1 %2415 }
 0x2b0   : > { %v6336_v38 = vpop.eup %6335  ;;  %v2238_v10 = vadd.f32 0.5, %v2206_v57  ;;  %v2207_v52 = vmul.f32 0.5, %v6334_v30  ;;  %6337 = vtanh.f32 %v2146_v28  ;;  %v2147_v54 = vmul.f32 0.5, %v7625_v61  ;;  %8713 = vst [vmem:[#allocation41_spill] sm:$0xff] %v7668_v33 }
 0x2b1   : > { %v2236_v21 = vadd.f32 0.5, %v2204_v56  ;;  %v2205_v18 = vmul.f32 0.5, %v6336_v38  ;;  %6339 = vtanh.f32 %v2144_v39  ;;  %v2145_v3 = vmul.f32 0.5, %v7631_v51 }
 0x2b2   : > { %v2270_v37 = vmul.f32 %v2238_v10, %v7563_v58  ;;  %v2239_v31 = vadd.f32 0.5, %v2207_v52  ;;  %6341 = vtanh.f32 %v2147_v54  ;;  %v7666_v39 = vpack.c.bf16 %v3651_v8, %v3644_v36 }
 0x2b3   : > { %v2268_v22 = vmul.f32 %v2236_v21, %v7566_v0  ;;  %v2237_v59 = vadd.f32 0.5, %v2205_v18  ;;  %6343 = vtanh.f32 %v2145_v3  ;;  %v7676_v21 = vpop.permute.xlu0 %2419 }
 0x2b4   : > { %v2480_v50 = vmul.f32 %v7556_v5, %v2270_v37  ;;  %v2271_v58 = vmul.f32 %v2239_v31, %v7572_v63  ;;  %8714 = vst [vmem:[#allocation42_spill] sm:$0xff] %v7676_v21  ;;  %5963 = vmatprep.subr.bf16.mxu0 %v7666_v39 }
 0x2b5   : > { %v2478_v42 = vmul.f32 %v7552_v7, %v2268_v22  ;;  %v2269_v17 = vmul.f32 %v2237_v59, %v7578_v12 }
 0x2b6   : > { %v2481_v0 = vmul.f32 %v7558_v55, %v2271_v58  ;;  %v2691_v19 = vpack.c.bf16 %v2271_v58, %v2270_v37  ;;  %v5698_v16 = vpop.f32.mrb[12].mxu0  ;;  %v2519_v41 = vsel %vm893_vm0, %v2480_v50, 0.0 }
 0x2b7   : > { %v2479_v29 = vmul.f32 %v7554_v34, %v2269_v17  ;;  %v2690_v57 = vpack.c.bf16 %v2269_v17, %v2268_v22  ;;  %v7659_v28 = vadd.f32 %v5698_v16, %v7560_v32  ;;  %v2045_v63 = vpop.f32.mrb[13].mxu0  ;;  %v2510_v45 = vsel %vm893_vm0, %v2478_v42, 0.0 }
 0x2b8   : > { %v2520_v12 = vsel %vm893_vm0, %v2481_v0, 0.0  ;;  %v7664_v30 = vadd.f32 %v7560_v32, %v2045_v63  ;;  %v5699_v56 = vpop.f32.mrb[14].mxu0 }
 0x2b9   : > { %v2521_v40 = vadd.f32 %v2520_v12, %v2519_v41  ;;  %v2511_v62 = vsel %vm893_vm0, %v2479_v29, 0.0  ;;  %v2150_v38 = vmul.f32 0.5, %v7659_v28  ;;  %v7673_v10 = vadd.f32 %v5699_v56, %v7560_v32  ;;  %v2048_v52 = vpop.f32.mrb[15].mxu0  ;;  %5724 = vmatprep.mubr.msk.bf16.mxu1 %vm893_vm0, %v2690_v57  ;;  %v7688_v56 = vpop.permute.xlu1 %2349 }
 0x2ba   : > { %v6338_v54 = vpop.eup %6337  ;;  %v2512_v18 = vadd.f32 %v2511_v62, %v2510_v45  ;;  %v2148_v3 = vmul.f32 0.5, %v7664_v30  ;;  %v7680_v37 = vadd.f32 %v7560_v32, %v2048_v52  ;;  %5725 = vmatmul.mubr.msk.bf16.vlgmr.msra.gmra.mrb[16].mxu1 %vm893_vm0, %v2691_v19  ;;  %8715 = vst [vmem:[#allocation43_spill] sm:$0xff] %v7688_v56 }
 0x2bb   : > { %v6340_v31 = vpop.eup %6339  ;;  %v2522_v22 = vrot.slane %v2521_v40, 4  ;;  %v2210_v59 = vmul.f32 0.5, %v6338_v54  ;;  %6345 = vtanh.f32 %v2150_v38  ;;  %v2151_v25 = vmul.f32 0.5, %v7673_v10  ;;  %v5710_v50 = vpop.f32.mrb[4].mxu1 }
 0x2bc   : > { %v6342_v58 = vpop.eup %6341  ;;  %v2513_v36 = vrot.slane %v2512_v18, 4  ;;  %v2208_v42 = vmul.f32 0.5, %v6340_v31  ;;  %6347 = vtanh.f32 %v2148_v3  ;;  %v2149_v17 = vmul.f32 0.5, %v7680_v37  ;;  %v2093_v8 = vpop.f32.mrb[5].mxu1 }
 0x2bd   : > { %v6344_v0 = vpop.eup %6343  ;;  %v2523_v16 = vadd.f32 %v2522_v22, %v2521_v40  ;;  %v2242_v19 = vadd.f32 0.5, %v2210_v59  ;;  %v2211_v41 = vmul.f32 0.5, %v6342_v58  ;;  %6349 = vtanh.f32 %v2151_v25  ;;  %v5711_v29 = vpop.f32.mrb[6].mxu1 }
 0x2be   : > { %v2514_v57 = vadd.f32 %v2513_v36, %v2512_v18  ;;  %v2240_v63 = vadd.f32 0.5, %v2208_v42  ;;  %v2209_v45 = vmul.f32 0.5, %v6344_v0  ;;  %6351 = vtanh.f32 %v2149_v17  ;;  %v7686_v12 = vpop.f32.mrb[7].mxu1  ;;  %v7694_v40 = vpop.permute.xlu0 %2353 }
 0x2bf   : > { %v2524_v62 = vrot.slane %v2523_v16, 2  ;;  %v2274_v38 = vmul.f32 %v2242_v19, %v7608_v23  ;;  %v2243_v52 = vadd.f32 0.5, %v2211_v41  ;;  %v7692_v54 = vadd.f32 %v5710_v50, %v7560_v32  ;;  %8716 = vst [vmem:[#allocation44_spill] sm:$0xff] %v7694_v40 }
 0x2c0   : > { %v2515_v3 = vrot.slane %v2514_v57, 2  ;;  %v2272_v31 = vmul.f32 %v2240_v63, %v7617_v6  ;;  %v2241_v18 = vadd.f32 0.5, %v2209_v45  ;;  %v7698_v22 = vadd.f32 %v7560_v32, %v2093_v8 }
 0x2c1   : > { %v2525_v59 = vadd.f32 %v2524_v62, %v2523_v16  ;;  %v2484_v25 = vmul.f32 %v7641_v44, %v2274_v38  ;;  %v2275_v58 = vmul.f32 %v2243_v52, %v7625_v61  ;;  %v2162_v23 = vmul.f32 0.5, %v7692_v54  ;;  %v7710_v62 = vpop.permute.xlu1 %2426 }
 0x2c2   : > { %v2516_v36 = vadd.f32 %v2515_v3, %v2514_v57  ;;  %v2482_v50 = vmul.f32 %v7568_v48, %v2272_v31  ;;  %v2273_v42 = vmul.f32 %v2241_v18, %v7631_v51  ;;  %v2160_v17 = vmul.f32 0.5, %v7698_v22  ;;  %8717 = vst [vmem:[#allocation45_spill] sm:$0xff] %v7710_v62 }
 0x2c3   : > { %v2526_v0 = vrot.slane %v2525_v59, 1  ;;  %v2537_v6 = vsel %vm893_vm0, %v2484_v25, 0.0  ;;  %v2485_v8 = vmul.f32 %v7647_v4, %v2275_v58  ;;  %v2693_v19 = vpack.c.bf16 %v2275_v58, %v2274_v38  ;;  %v7718_v25 = vpop.permute.xlu0 %2430 }
 0x2c4   : > { %v2517_v16 = vrot.slane %v2516_v36, 1  ;;  %v2528_v41 = vsel %vm893_vm0, %v2482_v50, 0.0  ;;  %v2483_v61 = vmul.f32 %v7574_v11, %v2273_v42  ;;  %v2692_v63 = vpack.c.bf16 %v2273_v42, %v2272_v31  ;;  %v5702_v45 = vpop.f32.mrb[16].mxu0  ;;  %8718 = vst [vmem:[#allocation46_spill] sm:$0xff] %v7718_v25 }
 0x2c5   : > { %v6346_v57 = vpop.eup %6345  ;;  %v2527_v52 = vadd.f32 %v2526_v0, %v2525_v59  ;;  %v2538_v51 = vsel %vm893_vm0, %v2485_v8, 0.0  ;;  %6353 = vtanh.f32 %v2162_v23  ;;  %v7714_v3 = vadd.f32 %v5711_v29, %v7560_v32  ;;  %v7716_v18 = vpop.f32.mrb[17].mxu0 }
 0x2c6   : > { %v6348_v38 = vpop.eup %6347  ;;  %v2518_v58 = vadd.f32 %v2517_v16, %v2516_v36  ;;  %v2539_v50 = vadd.f32 %v2538_v51, %v2537_v6  ;;  %v2529_v31 = vsel %vm893_vm0, %v2483_v61, 0.0  ;;  %v2214_v42 = vmul.f32 0.5, %v6346_v57  ;;  %v7721_v49 = vpop.f32.mrb[18].mxu0  ;;  %5728 = vmatprep.mubr.msk.bf16.mxu1 %vm893_vm0, %v2692_v63 }
 0x2c7   : > { %v6350_v59 = vpop.eup %6349  ;;  %v2530_v0 = vadd.f32 %v2529_v31, %v2528_v41  ;;  %v2212_v23 = vmul.f32 0.5, %v6348_v38  ;;  %6355 = vtanh.f32 %v2160_v17  ;;  %v2163_v29 = vmul.f32 0.5, %v7714_v3  ;;  %v7725_v8 = vpop.f32.mrb[19].mxu0  ;;  %5729 = vmatmul.mubr.msk.bf16.gmra.mrb[20].mxu1 %vm893_vm0, %v2693_v19 }
 0x2c8   : > { %v7728_v20 = vpop.f32.mrb[8].mxu1  ;;  %v6352_v36 = vpop.eup %6351  ;;  %v7731_v6 = vsel %vm932_vm3, %v2527_v52, %v2518_v58  ;;  %v2540_v16 = vrot.slane %v2539_v50, 4  ;;  %v2246_v61 = vadd.f32 0.5, %v2214_v42  ;;  %v2215_v57 = vmul.f32 0.5, %v6350_v59 }
 0x2c9   : > { %v7733_v63 = vpop.f32.mrb[9].mxu1  ;;  %v2531_v41 = vrot.slane %v2530_v0, 4  ;;  %v2244_v51 = vadd.f32 0.5, %v2212_v23  ;;  %v2213_v17 = vmul.f32 0.5, %v6352_v36  ;;  %6357 = vtanh.f32 %v2163_v29  ;;  %v7744_v42 = vpop.permute.xlu1 %2360 }
 0x2ca   : > { %v7735_v38 = vpop.f32.mrb[10].mxu1  ;;  %v2541_v31 = vadd.f32 %v2540_v16, %v2539_v50  ;;  %v2278_v19 = vmul.f32 %v2246_v61, %v7659_v28  ;;  %v2247_v24 = vadd.f32 0.5, %v2215_v57  ;;  %v7740_v52 = vadd.f32 %v7560_v32, %v7686_v12  ;;  %8719 = vst [vmem:[#allocation47_spill] sm:$0xff] %v7744_v42  ;;  %v7753_v61 = vpop.permute.xlu0 %2364 }
 0x2cb   : > { %v7742_v58 = vpop.f32.mrb[11].mxu1  ;;  %v2532_v59 = vadd.f32 %v2531_v41, %v2530_v0  ;;  %v2276_v23 = vmul.f32 %v2244_v51, %v7664_v30  ;;  %v2245_v29 = vadd.f32 0.5, %v2213_v17  ;;  %v7748_v36 = vadd.f32 %v5702_v45, %v7560_v32  ;;  %8720 = vst [vmem:[#allocation48_spill] sm:$0xff] %v7753_v61 }
 0x2cc   : > { %v2542_v50 = vrot.slane %v2541_v31, 2  ;;  %v2488_v28 = vmul.f32 %v7744_v42, %v2278_v19  ;;  %v2279_v16 = vmul.f32 %v2247_v24, %v7673_v10  ;;  %v2161_v12 = vmul.f32 0.5, %v7740_v52 }
 0x2cd   : > { %v2533_v57 = vrot.slane %v2532_v59, 2  ;;  %v2486_v60 = vmul.f32 %v7688_v56, %v2276_v23  ;;  %v2277_v0 = vmul.f32 %v2245_v29, %v7680_v37  ;;  %v2154_v30 = vmul.f32 0.5, %v7748_v36 }
 0x2ce   : > { %v2543_v41 = vadd.f32 %v2542_v50, %v2541_v31  ;;  %v2555_v45 = vsel %vm893_vm0, %v2488_v28, 0.0  ;;  %v2489_v51 = vmul.f32 %v7753_v61, %v2279_v16  ;;  %v2695_v17 = vpack.c.bf16 %v2279_v16, %v2278_v19 }
 0x2cf   : > { %v6354_v1 = vpop.eup %6353  ;;  %v2534_v27 = vadd.f32 %v2533_v57, %v2532_v59  ;;  %v2546_v24 = vsel %vm893_vm0, %v2486_v60, 0.0  ;;  %v2487_v10 = vmul.f32 %v7694_v40, %v2277_v0  ;;  %v2694_v26 = vpack.c.bf16 %v2277_v0, %v2276_v23 }
 0x2d0   : > { %v2544_v42 = vrot.slane %v2543_v41, 1  ;;  %v2556_v56 = vsel %vm893_vm0, %v2489_v51, 0.0  ;;  %v2226_v11 = vmul.f32 0.5, %v6354_v1  ;;  %6359 = vtanh.f32 %v2161_v12  ;;  %v7770_v12 = vpop.permute.xlu1 %2437 }
 0x2d1   : > { %v6356_v37 = vpop.eup %6355  ;;  %v2535_v29 = vrot.slane %v2534_v27, 1  ;;  %v2557_v31 = vadd.f32 %v2556_v56, %v2555_v45  ;;  %v2547_v50 = vsel %vm893_vm0, %v2487_v10, 0.0  ;;  %6361 = vtanh.f32 %v2154_v30  ;;  %5732 = vmatprep.mubr.msk.bf16.mxu1 %vm893_vm0, %v2694_v26  ;;  %v7765_v19 = vpop.f32.mrb[20].mxu0 }
 0x2d2   : > { %v2545_v59 = vadd.f32 %v2544_v42, %v2543_v41  ;;  %v2548_v60 = vadd.f32 %v2547_v50, %v2546_v24  ;;  %v2258_v28 = vadd.f32 0.5, %v2226_v11  ;;  %v2224_v16 = vmul.f32 0.5, %v6356_v37  ;;  %5733 = vmatmul.mubr.msk.bf16.gmra.mrb[24].mxu1 %vm893_vm0, %v2695_v17  ;;  %v7768_v23 = vpop.f32.mrb[21].mxu0  ;;  %v7791_v24 = vpop.permute.xlu0 %2441 }
 0x2d3   : > { %v6358_v1 = vpop.eup %6357  ;;  %v2536_v57 = vadd.f32 %v2535_v29, %v2534_v27  ;;  %v2558_v56 = vrot.slane %v2557_v31, 4  ;;  %v7774_v0 = vadd.f32 %v7560_v32, %v7716_v18  ;;  %v7778_v26 = vadd.f32 %v7721_v49, %v7560_v32  ;;  %v7780_v42 = vpop.f32.mrb[22].mxu0  ;;  %8721 = vst [vmem:[#allocation49_spill] sm:$0xff] %v7791_v24 }
 0x2d4   : > { %v2549_v11 = vrot.slane %v2548_v60, 4  ;;  %v7783_v30 = vmul.f32 %v2258_v28, %v7692_v54  ;;  %v2256_v41 = vadd.f32 0.5, %v2224_v16  ;;  %v2227_v45 = vmul.f32 0.5, %v6358_v1  ;;  %v7785_v51 = vpop.f32.mrb[23].mxu0 }
 0x2d5   : > { %v2671_v27 = vsel %vm933_vm4, %v2536_v57, %v7731_v6  ;;  %v2559_v17 = vadd.f32 %v2558_v56, %v2557_v31  ;;  %v2152_v18 = vmul.f32 0.5, %v7774_v0  ;;  %v2155_v49 = vmul.f32 0.5, %v7778_v26 }
 0x2d6   : > { %v2550_v10 = vadd.f32 %v2549_v11, %v2548_v60  ;;  %v2672_v37 = vsel %vm935_vm5, %v2545_v59, %v2671_v27  ;;  %v2500_v54 = vmul.f32 %v7710_v62, %v7783_v30  ;;  %v7797_v29 = vmul.f32 %v2256_v41, %v7698_v22  ;;  %v7804_v60 = vpop.permute.xlu1 %2371 }
 0x2d7   : > { %v2560_v50 = vrot.slane %v2559_v17, 2  ;;  %v2259_v28 = vadd.f32 0.5, %v2227_v45  ;;  %6363 = vtanh.f32 %v2152_v18  ;;  %v7801_v6 = vadd.f32 %v7560_v32, %v7725_v8 }
 0x2d8   : > { %v2551_v31 = vrot.slane %v2550_v10, 2  ;;  %v2609_v16 = vsel %vm893_vm0, %v2500_v54, 0.0  ;;  %6365 = vtanh.f32 %v2155_v49  ;;  %v7812_v57 = vadd.f32 %v7728_v20, %v7560_v32 }
 0x2d9   : > { %v2561_v59 = vadd.f32 %v2560_v50, %v2559_v17  ;;  %v7807_v1 = vmul.f32 %v2259_v28, %v7714_v3  ;;  %v2153_v22 = vmul.f32 0.5, %v7801_v6  ;;  %v7814_v56 = vpop.f32.mrb[12].mxu1  ;;  %v2498_v41 = vmul.f32 %v7668_v33, %v7797_v29  ;;  %v7834_v50 = vpop.permute.xlu0 %2375 }
 0x2da   : > { %v6360_v8 = vpop.eup %6359  ;;  %v2552_v11 = vadd.f32 %v2551_v31, %v2550_v10  ;;  %v7820_v45 = vadd.f32 %v7560_v32, %v7733_v63  ;;  %v7824_v3 = vadd.f32 %v7735_v38, %v7560_v32  ;;  %v7826_v27 = vpop.f32.mrb[13].mxu1  ;;  %v2166_v38 = vmul.f32 0.5, %v7812_v57 }
 0x2db   : > { %v6362_v17 = vpop.eup %6361  ;;  %v2562_v20 = vrot.slane %v2561_v59, 1  ;;  %v2501_v18 = vmul.f32 %v7718_v25, %v7807_v1  ;;  %v2225_v10 = vmul.f32 0.5, %v6360_v8  ;;  %v7832_v54 = vpop.f32.mrb[14].mxu1  ;;  %6367 = vtanh.f32 %v2153_v22 }
 0x2dc   : > { %v2553_v63 = vrot.slane %v2552_v11, 1  ;;  %v2218_v28 = vmul.f32 0.5, %v6362_v17  ;;  %v7837_v31 = vpop.f32.mrb[15].mxu1  ;;  %v2164_v25 = vmul.f32 0.5, %v7820_v45  ;;  %6369 = vtanh.f32 %v2166_v38  ;;  %v7843_v4 = vpop.permute.xlu1 %2448 }
 0x2dd   : > { %v2563_v33 = vadd.f32 %v2562_v20, %v2561_v59  ;;  %v2610_v62 = vsel %vm893_vm0, %v2501_v18, 0.0  ;;  %v2257_v40 = vadd.f32 0.5, %v2225_v10  ;;  %v2167_v22 = vmul.f32 0.5, %v7824_v3 }
 0x2de   : > { %v2554_v61 = vadd.f32 %v2553_v63, %v2552_v11  ;;  %v7841_v49 = vadd.f32 %v2610_v62, %v2609_v16  ;;  %v2250_v8 = vadd.f32 0.5, %v2218_v28  ;;  %6371 = vtanh.f32 %v2164_v25 }
 0x2df   : > { %v7846_v17 = vmul.f32 %v2257_v40, %v7740_v52  ;;  %v7851_v59 = vadd.f32 %v7560_v32, %v7742_v58  ;;  %v7856_v62 = vadd.f32 %v7765_v19, %v7560_v32  ;;  %6373 = vtanh.f32 %v2167_v22  ;;  %v7865_v58 = vpop.permute.xlu0 %2452 }
 0x2e0   : > { %v2673_v20 = vsel %vm937_vm6, %v2554_v61, %v2672_v37  ;;  %v2600_v61 = vsel %vm893_vm0, %v2498_v41, 0.0  ;;  %v2282_v37 = vmul.f32 %v2250_v8, %v7748_v36  ;;  %v7883_v8 = vadd.f32 %v7780_v42, %v7560_v32 }
 0x2e1   : > { %v6364_v16 = vpop.eup %6363  ;;  %v2499_v11 = vmul.f32 %v7676_v21, %v7846_v17  ;;  %v7863_v25 = vsel %vm939_vm7, %v2563_v33, %v2673_v20  ;;  %v2165_v18 = vmul.f32 0.5, %v7851_v59  ;;  %v2158_v28 = vmul.f32 0.5, %v7856_v62  ;;  %v7878_v20 = vpop.permute.xlu1 %2382 }
 0x2e2   : > { %v6366_v52 = vpop.eup %6365  ;;  %v2216_v19 = vmul.f32 0.5, %v6364_v16  ;;  %v7874_v33 = vadd.f32 %v7560_v32, %v7768_v23  ;;  %8722 = vst [vmem:[#allocation50_spill] sm:$0xff] %v7878_v20 }
 0x2e3   : > { %v2601_v10 = vsel %vm893_vm0, %v2499_v11, 0.0  ;;  %v2219_v63 = vmul.f32 0.5, %v6366_v52  ;;  %6375 = vtanh.f32 %v2165_v18  ;;  %v2492_v11 = vmul.f32 %v7878_v20, %v2282_v37  ;;  %v7889_v18 = vpop.permute.xlu0 %2386 }
 0x2e4   : > { %v7876_v38 = vadd.f32 %v2601_v10, %v2600_v61  ;;  %v2248_v22 = vadd.f32 0.5, %v2216_v19  ;;  %v2156_v36 = vmul.f32 0.5, %v7874_v33  ;;  %6377 = vtanh.f32 %v2158_v28  ;;  %8723 = vst [vmem:[#allocation51_spill] sm:$0xff] %v7889_v18 }
 0x2e5   : > { %v2251_v41 = vadd.f32 0.5, %v2219_v63  ;;  %v6368_v16 = vpop.eup %6367  ;;  %v2159_v19 = vmul.f32 0.5, %v7883_v8  ;;  %v7893_v63 = vadd.f32 %v7560_v32, %v7785_v51  ;;  %v2573_v28 = vsel %vm893_vm0, %v2492_v11, 0.0 }
 0x2e6   : > { %v2280_v52 = vmul.f32 %v2248_v22, %v7774_v0  ;;  %v2217_v61 = vmul.f32 0.5, %v6368_v16  ;;  %6379 = vtanh.f32 %v2156_v36  ;;  %v6370_v10 = vpop.eup %6369 }
 0x2e7   : > { %v2283_v23 = vmul.f32 %v2251_v41, %v7778_v26  ;;  %v2230_v0 = vmul.f32 0.5, %v6370_v10  ;;  %6381 = vtanh.f32 %v2159_v19  ;;  %v2157_v11 = vmul.f32 0.5, %v7893_v63 }
 0x2e8   : > { %v6372_v42 = vpop.eup %6371  ;;  %v2249_v20 = vadd.f32 0.5, %v2217_v61  ;;  %v2490_v26 = vmul.f32 %v7804_v60, %v2280_v52 }
 0x2e9   : > { %v2493_v40 = vmul.f32 %v7889_v18, %v2283_v23  ;;  %v2697_v21 = vpack.c.bf16 %v2283_v23, %v2282_v37  ;;  %v2228_v22 = vmul.f32 0.5, %v6372_v42  ;;  %v6374_v41 = vpop.eup %6373  ;;  %v2262_v48 = vadd.f32 0.5, %v2230_v0 }
 0x2ea   : > { %v2281_v16 = vmul.f32 %v2249_v20, %v7801_v6  ;;  %v2231_v34 = vmul.f32 0.5, %v6374_v41  ;;  %v2564_v6 = vsel %vm893_vm0, %v2490_v26, 0.0  ;;  %6383 = vtanh.f32 %v2157_v11 }
 0x2eb   : > { %v2574_v36 = vsel %vm893_vm0, %v2493_v40, 0.0  ;;  %v2260_v44 = vadd.f32 0.5, %v2228_v22  ;;  %v7902_v23 = vmul.f32 %v2262_v48, %v7812_v57  ;;  %v2612_v40 = vrot.slane %v7841_v49, 4 }
 0x2ec   : > { %v2575_v51 = vadd.f32 %v2574_v36, %v2573_v28  ;;  %v2491_v18 = vmul.f32 %v7834_v50, %v2281_v16  ;;  %v2696_v37 = vpack.c.bf16 %v2281_v16, %v2280_v52  ;;  %v2263_v10 = vadd.f32 0.5, %v2231_v34 }
 0x2ed   : > { %v6376_v42 = vpop.eup %6375  ;;  %v2504_v48 = vmul.f32 %v7843_v4, %v7902_v23  ;;  %v7912_v57 = vmul.f32 %v2260_v44, %v7820_v45  ;;  %v7920_v22 = vadd.f32 %v7814_v56, %v7560_v32  ;;  %v2603_v41 = vrot.slane %v7876_v38, 4 }
 0x2ee   : > { %v2576_v61 = vrot.slane %v2575_v51, 4  ;;  %v2565_v20 = vsel %vm893_vm0, %v2491_v18, 0.0  ;;  %5736 = vmatprep.mubr.msk.bf16.mxu1 %vm893_vm0, %v2696_v37  ;;  %v6378_v19 = vpop.eup %6377  ;;  %v7916_v28 = vmul.f32 %v2263_v10, %v7824_v3  ;;  %v2229_v26 = vmul.f32 0.5, %v6376_v42 }
 0x2ef   : > { %v2566_v52 = vadd.f32 %v2565_v20, %v2564_v6  ;;  %5737 = vmatmul.mubr.msk.bf16.gmra.mrb[28].mxu1 %vm893_vm0, %v2697_v21  ;;  %v2222_v18 = vmul.f32 0.5, %v6378_v19  ;;  %v2502_v56 = vmul.f32 %v7770_v12, %v7912_v57  ;;  %v2627_v42 = vsel %vm893_vm0, %v2504_v48, 0.0 }
 0x2f0   : > { %v2577_v0 = vadd.f32 %v2576_v61, %v2575_v51  ;;  %v6380_v34 = vpop.eup %6379  ;;  %v2505_v44 = vmul.f32 %v7865_v58, %v7916_v28  ;;  %v2261_v45 = vadd.f32 0.5, %v2229_v26  ;;  %v2170_v19 = vmul.f32 0.5, %v7920_v22 }
 0x2f1   : > { %v2567_v16 = vrot.slane %v2566_v52, 4  ;;  %v2220_v51 = vmul.f32 0.5, %v6380_v34  ;;  %v2254_v3 = vadd.f32 0.5, %v2222_v18  ;;  %v6382_v10 = vpop.eup %6381  ;;  %v7942_v48 = vadd.f32 %v7560_v32, %v7826_v27 }
 0x2f2   : > { %v2578_v36 = vrot.slane %v2577_v0, 2  ;;  %v2628_v6 = vsel %vm893_vm0, %v2505_v44, 0.0  ;;  %v7932_v20 = vmul.f32 %v2261_v45, %v7851_v59  ;;  %v2613_v59 = vadd.f32 %v2612_v40, %v7841_v49 }
 0x2f3   : > { %v2568_v11 = vadd.f32 %v2567_v16, %v2566_v52  ;;  %v2252_v61 = vadd.f32 0.5, %v2220_v51  ;;  %v2629_v18 = vadd.f32 %v2628_v6, %v2627_v42  ;;  %v2223_v16 = vmul.f32 0.5, %v6382_v10 }
 0x2f4   : > { %v2579_v37 = vadd.f32 %v2578_v36, %v2577_v0  ;;  %v2286_v0 = vmul.f32 %v2254_v3, %v7856_v62  ;;  %v2503_v52 = vmul.f32 %v7791_v24, %v7932_v20  ;;  %v2604_v51 = vadd.f32 %v2603_v41, %v7876_v38  ;;  %v6384_v42 = vpop.eup %6383 }
 0x2f5   : > { %v2569_v26 = vrot.slane %v2568_v11, 2  ;;  %v2284_v45 = vmul.f32 %v2252_v61, %v7874_v33  ;;  %v2618_v62 = vsel %vm893_vm0, %v2502_v56, 0.0  ;;  %v2255_v6 = vadd.f32 0.5, %v2223_v16  ;;  %v2476_v56 = vld [vmem:[#allocation2] sm:$0xff] }
 0x2f6   : > { %v2580_v34 = vrot.slane %v2579_v37, 1  ;;  %v2619_v3 = vsel %vm893_vm0, %v2503_v52, 0.0  ;;  %6385 = vtanh.f32 %v2170_v19  ;;  %v2496_v27 = vmul.f32 %v7614_v2, %v2286_v0 }
 0x2f7   : > { %v2570_v44 = vadd.f32 %v2569_v26, %v2568_v11  ;;  %v2620_v36 = vadd.f32 %v2619_v3, %v2618_v62  ;;  %v2287_v24 = vmul.f32 %v2255_v6, %v7883_v8  ;;  %v2221_v49 = vmul.f32 0.5, %v6384_v42 }
 0x2f8   : > { %v2581_v21 = vadd.f32 %v2580_v34, %v2579_v37  ;;  %v2168_v38 = vmul.f32 0.5, %v7942_v48  ;;  %v7954_v33 = vadd.f32 %v7832_v54, %v7560_v32  ;;  %v2630_v41 = vrot.slane %v2629_v18, 4 }
 0x2f9   : > { %v2571_v10 = vrot.slane %v2570_v44, 1  ;;  %v2494_v11 = vmul.f32 %v7582_v53, %v2284_v45  ;;  %v7959_v37 = vadd.f32 %v7560_v32, %v7837_v31  ;;  %v2497_v61 = vmul.f32 %v7621_v9, %v2287_v24 }
 0x2fa   : > { %v2699_v19 = vpack.c.bf16 %v2287_v24, %v2286_v0  ;;  %v2253_v8 = vadd.f32 0.5, %v2221_v49  ;;  %6387 = vtanh.f32 %v2168_v38  ;;  %v2621_v26 = vrot.slane %v2620_v36, 4 }
 0x2fb   : > { %v2572_v40 = vadd.f32 %v2571_v10, %v2570_v44  ;;  %v2591_v54 = vsel %vm893_vm0, %v2496_v27, 0.0  ;;  %v2171_v52 = vmul.f32 0.5, %v7954_v33  ;;  %v2592_v44 = vsel %vm893_vm0, %v2497_v61, 0.0 }
 0x2fc   : > { %v2285_v32 = vmul.f32 %v2253_v8, %v7893_v63  ;;  %v2169_v31 = vmul.f32 0.5, %v7959_v37  ;;  %v2593_v24 = vadd.f32 %v2592_v44, %v2591_v54  ;;  %v2631_v0 = vadd.f32 %v2630_v41, %v2629_v18  ;;  %v7980_v44 = vpop.permute.xlu1 %2459 }
 0x2fd   : > { %v2675_v34 = vsel %vm941_vm8, %v2572_v40, %v7863_v25  ;;  %6389 = vtanh.f32 %v2171_v52  ;;  %v2622_v25 = vadd.f32 %v2621_v26, %v2620_v36  ;;  %v2605_v27 = vrot.slane %v2604_v51, 2 }
 0x2fe   : > { %v2676_v16 = vsel %vm943_vm9, %v2581_v21, %v2675_v34  ;;  %v2495_v62 = vmul.f32 %v7584_v47, %v2285_v32  ;;  %v2698_v3 = vpack.c.bf16 %v2285_v32, %v2284_v45  ;;  %v2594_v6 = vrot.slane %v2593_v24, 4 }
 0x2ff   : > { %v2686_v42 = vadd.f32 %v2676_v16, %v2476_v56  ;;  %6391 = vtanh.f32 %v2169_v31  ;;  %v2614_v21 = vrot.slane %v2613_v59, 2  ;;  %v2582_v49 = vsel %vm893_vm0, %v2494_v11, 0.0 }
 0x300   : > { %v6386_v10 = vpop.eup %6385  ;;  %v2583_v63 = vsel %vm893_vm0, %v2495_v62, 0.0  ;;  %5740 = vmatprep.mubr.msk.bf16.mxu1 %vm893_vm0, %v2698_v3  ;;  %v2595_v38 = vadd.f32 %v2594_v6, %v2593_v24  ;;  %v2632_v45 = vrot.slane %v2631_v0, 2  ;;  %v8724_v36 = vpack.c.bf16 %v7846_v17, %v7797_v29  ;;  %v7983_v6 = vpop.permute.xlu0 %2463 }
 0x301   : > { %2688 = vst.msk [vmem:[#allocation2] sm:$0xff] %vm893_vm0, %v2686_v42  ;;  %v2584_v18 = vadd.f32 %v2583_v63, %v2582_v49  ;;  %v2234_v40 = vmul.f32 0.5, %v6386_v10  ;;  %5741 = vmatmul.mubr.msk.bf16.gmra.mrb[32].mxu1 %vm893_vm0, %v2699_v19  ;;  %v2623_v41 = vrot.slane %v2622_v25, 2  ;;  %v2615_v11 = vadd.f32 %v2614_v21, %v2613_v59 }
 0x302   : > { %5744 = vmatprep.mubr.msk.bf16.mxu1 %vm893_vm0, %v8724_v36  ;;  %v2596_v56 = vrot.slane %v2595_v38, 2  ;;  %v2606_v34 = vadd.f32 %v2605_v27, %v2604_v51  ;;  %v2633_v32 = vadd.f32 %v2632_v45, %v2631_v0  ;;  %v8725_v27 = vpack.c.bf16 %v7807_v1, %v7783_v30  ;;  %v7997_v36 = vpop.permute.xlu1 %2470 }
 0x303   : > { %v2585_v61 = vrot.slane %v2584_v18, 4  ;;  %v2266_v52 = vadd.f32 0.5, %v2234_v40  ;;  %v2624_v31 = vadd.f32 %v2623_v41, %v2622_v25  ;;  %v2616_v59 = vrot.slane %v2615_v11, 1 }
 0x304   : > { %v6388_v8 = vpop.eup %6387  ;;  %v2597_v26 = vadd.f32 %v2596_v56, %v2595_v38  ;;  %v2607_v51 = vrot.slane %v2606_v34, 1  ;;  %v8726_v63 = vpack.c.bf16 %v7932_v20, %v7912_v57 }
 0x305   : > { %v2586_v54 = vadd.f32 %v2585_v61, %v2584_v18  ;;  %v2232_v16 = vmul.f32 0.5, %v6388_v8  ;;  %v2298_v21 = vmul.f32 %v2266_v52, %v7920_v22  ;;  %v2634_v18 = vrot.slane %v2633_v32, 1 }
 0x306   : > { %v2598_v42 = vrot.slane %v2597_v26, 1  ;;  %v2625_v40 = vrot.slane %v2624_v31, 1  ;;  %v2617_v52 = vadd.f32 %v2616_v59, %v2615_v11 }
 0x307   : > { %v2587_v24 = vrot.slane %v2586_v54, 2  ;;  %v2264_v29 = vadd.f32 0.5, %v2232_v16  ;;  %v6390_v17 = vpop.eup %6389  ;;  %v2508_v61 = vmul.f32 %v7997_v36, %v2298_v21  ;;  %v2635_v16 = vadd.f32 %v2634_v18, %v2633_v32 }
 0x308   : > { %v3534_v19 = vld [vmem:[#allocation2] sm:$0xff]  ;;  %v2235_v25 = vmul.f32 0.5, %v6390_v17  ;;  %v2599_v45 = vadd.f32 %v2598_v42, %v2597_v26 }
 0x309   : > { %v3545_v62 = vsel %vm893_vm0, %v3534_v19, 0  ;;  %v6392_v3 = vpop.eup %6391  ;;  %v2588_v10 = vadd.f32 %v2587_v24, %v2586_v54  ;;  %5745 = vmatmul.mubr.msk.bf16.gmra.mrb[36].mxu1 %vm893_vm0, %v8725_v27  ;;  %v2296_v0 = vmul.f32 %v2264_v29, %v7942_v48  ;;  %v2608_v48 = vadd.f32 %v2607_v51, %v2606_v34  ;;  %v8007_v54 = vpop.permute.xlu0 %2474 }
 0x30a   : > { %v2233_v49 = vmul.f32 0.5, %v6392_v3  ;;  %5748 = vmatprep.mubr.msk.bf16.mxu1 %vm893_vm0, %v8726_v63  ;;  %v7995_v38 = vand.u32 4294901760, %v3545_v62  ;;  %v2267_v30 = vadd.f32 0.5, %v2235_v25  ;;  %v2626_v19 = vadd.f32 %v2625_v40, %v2624_v31 }
 0x30b   : > { %v2589_v22 = vrot.slane %v2588_v10, 1  ;;  %v2506_v57 = vmul.f32 %v7980_v44, %v2296_v0  ;;  %v8727_v3 = vpack.c.bf16 %v7916_v28, %v7902_v23 }
 0x30c   : > { %v2265_v1 = vadd.f32 0.5, %v2233_v49  ;;  %v8000_v41 = vsub.f32 %v3545_v62, %v7995_v38  ;;  %v2299_v20 = vmul.f32 %v2267_v30, %v7954_v33 }
 0x30d   : > { %v2590_v56 = vadd.f32 %v2589_v22, %v2588_v10  ;;  %v2636_v32 = vsel %vm893_vm0, %v2506_v57, 0.0 }
 0x30e   : > { %v2297_v8 = vmul.f32 %v2265_v1, %v7959_v37  ;;  %v3621_v26 = vand.u32 4294901760, %v8000_v41  ;;  %v2509_v24 = vmul.f32 %v8007_v54, %v2299_v20  ;;  %v2705_v29 = vpack.c.bf16 %v2299_v20, %v2298_v21 }
 0x30f   : > { %v2677_v42 = vsel %vm932_vm3, %v2599_v45, %v2590_v56  ;;  %v2645_v37 = vsel %vm893_vm0, %v2508_v61, 0.0  ;;  %v2477_v56 = vld [vmem:[#allocation2 + $0x8] sm:$0xff] }
 0x310   : > { %v2678_v34 = vsel %vm933_vm4, %v2608_v48, %v2677_v42  ;;  %v2507_v17 = vmul.f32 %v7983_v6, %v2297_v8  ;;  %v2704_v62 = vpack.c.bf16 %v2297_v8, %v2296_v0  ;;  %v3622_v11 = vsub.f32 %v8000_v41, %v3621_v26  ;;  %v6461_v8 = vld [vmem:[%s8582_s13 + $0x18] sm:$0xff] }
 0x311   : > { %v2679_v33 = vsel %vm935_vm5, %v2617_v52, %v2678_v34  ;;  %5749 = vmatmul.mubr.msk.bf16.gmra.mrb[40].mxu1 %vm893_vm0, %v8727_v3  ;;  %v2646_v31 = vsel %vm893_vm0, %v2509_v24, 0.0  ;;  %v8728_v52 = vand.u32 4294901760, %v7598_v46 }
 0x312   : > { %v2637_v59 = vsel %vm893_vm0, %v2507_v17, 0.0  ;;  %v2680_v51 = vsel %vm937_vm6, %v2626_v19, %v2679_v33  ;;  %v2647_v10 = vadd.f32 %v2646_v31, %v2645_v37  ;;  %5752 = vmatprep.mubr.msk.bf16.mxu1 %vm893_vm0, %v2704_v62  ;;  %v3623_v23 = vand.u32 4294901760, %v3622_v11 }
 0x313   : > { %v2638_v21 = vadd.f32 %v2637_v59, %v2636_v32  ;;  %v2681_v27 = vsel %vm939_vm7, %v2635_v16, %v2680_v51  ;;  %v3662_v16 = vsub.f32 %v6461_v8, %v8728_v52  ;;  %v3656_v19 = vand.u32 4294901760, %v7654_v43 }
 0x314   : > { %v2648_v28 = vrot.slane %v2647_v10, 4  ;;  %5764 = vmatprep.mubr.f32.mxu0 %v3623_v23  ;;  %v5970_v59 = vpack.c.bf16 %v7605_v13, %v7603_v15  ;;  %v3536_v23 = vld [vmem:[%s8581_s12] sm:$0xff] }
 0x315   : > { %v2639_v0 = vrot.slane %v2638_v21, 4  ;;  %v3663_v42 = vand.u32 4294901760, %v3662_v16  ;;  %v3657_v17 = vsub.f32 %v7654_v43, %v3656_v19  ;;  %v5974_v51 = vpack.c.bf16 %v3662_v16, %v7654_v43 }
 0x316   : > { %v2649_v25 = vadd.f32 %v2648_v28, %v2647_v10  ;;  %v8729_v43 = vand.u32 4294901760, %v7603_v15  ;;  %v4085_v28 = vand.u32 4294901760, %v3536_v23 }
 0x317   : > { %v2640_v49 = vadd.f32 %v2639_v0, %v2638_v21  ;;  %v3664_v33 = vsub.f32 %v3662_v16, %v3663_v42  ;;  %v3658_v3 = vand.u32 4294901760, %v3657_v17  ;;  %v6462_v21 = vld [vmem:[%s6980_s25] sm:$0xff]  ;;  %v5990_v15 = vpack.c.bf16 %v3663_v42, %v3656_v19  ;;  %v3538_v0 = vld [vmem:[%s8581_s12 + $0x10] sm:$0xff] }
 0x318   : > { %v2650_v63 = vrot.slane %v2649_v25, 2 }
 0x319   : > { %v2641_v18 = vrot.slane %v2640_v49, 2  ;;  %5753 = vmatmul.mubr.msk.bf16.gmra.mrb[44].mxu1 %vm893_vm0, %v2705_v29  ;;  %v3665_v11 = vand.u32 4294901760, %v3664_v33 }
 0x31a   : > { %v2651_v40 = vadd.f32 %v2650_v63, %v2649_v25  ;;  %v3539_v25 = vld [vmem:[%s8581_s12 + $0x18] sm:$0xff] }
 0x31b   : > { %v2642_v45 = vadd.f32 %v2641_v18, %v2640_v49  ;;  %v5966_v46 = vpack.c.bf16 %v3665_v11, %v3658_v3  ;;  %v6463_v49 = vld [vmem:[%s6980_s25 + $0x8] sm:$0xff] }
 0x31c   : > { %v2652_v22 = vrot.slane %v2651_v40, 1  ;;  %v4082_v63 = vsel %vm893_vm0, %v6463_v49, 0 }
 0x31d   : > { %v2643_v30 = vrot.slane %v2642_v45, 1 }
 0x31e   : > { %v2653_v48 = vadd.f32 %v2652_v22, %v2651_v40  ;;  %v4091_v40 = vand.u32 4294901760, %v3538_v0  ;;  %v4175_v22 = vsub.f32 %v3536_v23, %v4085_v28 }
 0x31f   : > { %v2644_v1 = vadd.f32 %v2643_v30, %v2642_v45  ;;  %v4094_v45 = vand.u32 4294901760, %v3539_v25 }
 0x321   : > { %v2682_v61 = vsel %vm941_vm8, %v2644_v1, %v2681_v27  ;;  %v4079_v27 = vsel %vm893_vm0, %v6462_v21, 0  ;;  %v8080_v1 = vand.u32 4294901760, %v4082_v63  ;;  %v6006_v33 = vpack.c.bf16 %v4094_v45, %v4091_v40  ;;  %v8098_v21 = vld [vmem:[%s8587_s18] ss:$0 sm:$0xff] }
 0x322   : > { %v2683_v57 = vsel %vm943_vm9, %v2653_v48, %v2682_v61 }
 0x323   : > { %v2687_v20 = vadd.f32 %v2683_v57, %v2477_v56  ;;  %v4176_v56 = vand.u32 4294901760, %v4175_v22  ;;  %v4189_v57 = vsub.f32 %v3538_v0, %v4091_v40  ;;  %v4164_v8 = vsub.f32 %v4082_v63, %v8080_v1 }
 0x325   : > { %2689 = vst.msk [vmem:[#allocation2 + $0x8] sm:$0xff] %vm893_vm0, %v2687_v20  ;;  %v4196_v20 = vsub.f32 %v3539_v25, %v4094_v45  ;;  %v4177_v19 = vsub.f32 %v4175_v22, %v4176_v56  ;;  %v4165_v17 = vand.u32 4294901760, %v4164_v8  ;;  %v8731_v25 = vld [vmem:[#allocation34_spill] sm:$0xff] }
 0x326   : > { %v8112_v45 = vld [vmem:[%s8584_s15] sm:$0xff] }
 0x32c   : > { %v3535_v34 = vld [vmem:[#allocation2 + $0x8] sm:$0xff] }
 0x32d   : > { %v3548_v24 = vsel %vm893_vm0, %v3535_v34, 0  ;;  %v4190_v34 = vand.u32 4294901760, %v4189_v57 }
 0x32e   : > { %v8039_v29 = vand.u32 4294901760, %v3548_v24 }
 0x32f   : > { %v4191_v11 = vsub.f32 %v4189_v57, %v4190_v34 }
 0x330   : > { %v3630_v37 = vsub.f32 %v3548_v24, %v8039_v29  ;;  %v4197_v24 = vand.u32 4294901760, %v4196_v20 }
 0x332   : > { %v3631_v62 = vand.u32 4294901760, %v3630_v37 }
 0x334   : > { %v3632_v32 = vsub.f32 %v3630_v37, %v3631_v62 }
 0x336   : > { %v3633_v31 = vand.u32 4294901760, %v3632_v32 }
 0x338   : > { %5765 = vmatmul.mubr.f32.vlgmr.msra.gmra.mrb[24].mxu0 %v3633_v31  ;;  %v4192_v31 = vand.u32 4294901760, %v4191_v11 }
 0x339   : > { %5965 = vmatpush3.bf16.msra.mxu0 %v7666_v39  ;;  %5775 = vmatprep.mubr.f32.mxu0 %v7995_v38  ;;  %v8730_v39 = vand.u32 4294901760, %v7605_v13 }
 0x33a   : > { %5967 = vmatprep.subr.bf16.mxu0 %v5966_v46 }
 0x33b   : > { %v5986_v10 = vpack.c.bf16 %v8730_v39, %v8729_v43  ;;  %v6038_v39 = vpack.c.bf16 %v4197_v24, %v4190_v34 }
 0x33d   : > { %5969 = vmatpush3.bf16.msra.mxu0 %v5966_v46 }
 0x33e   : > { %5971 = vmatprep.subr.bf16.mxu0 %v5970_v59 }
 0x340   : > { %5776 = vmatmul.mubr.f32.vlgmr.msra.gmra.mrb[24].mxu0 %v8039_v29 }
 0x341   : > { %5973 = vmatpush3.bf16.msra.mxu0 %v5970_v59  ;;  %5786 = vmatprep.mubr.f32.mxu0 %v8000_v41  ;;  %v3537_v41 = vld [vmem:[%s8581_s12 + $0x8] sm:$0xff] }
 0x342   : > { %5975 = vmatprep.subr.bf16.mxu0 %v5974_v51  ;;  %v4088_v13 = vand.u32 4294901760, %v3537_v41 }
 0x344   : > { %v4182_v30 = vsub.f32 %v3537_v41, %v4088_v13  ;;  %v6002_v52 = vpack.c.bf16 %v4088_v13, %v4085_v28 }
 0x345   : > { %5977 = vmatpush3.bf16.msra.mxu0 %v5974_v51 }
 0x346   : > { %5979 = vmatprep.subr.bf16.mxu0 %v7601_v14  ;;  %v4183_v61 = vand.u32 4294901760, %v4182_v30  ;;  %v6018_v51 = vpack.c.bf16 %v4182_v30, %v4175_v22 }
 0x348   : > { %5787 = vmatmul.mubr.f32.vlgmr.msra.gmra.mrb[24].mxu0 %v3630_v37  ;;  %v4184_v42 = vsub.f32 %v4182_v30, %v4183_v61  ;;  %v6034_v43 = vpack.c.bf16 %v4183_v61, %v4176_v56  ;;  %v4649_v30 = vand.u32 4294901760, %v8112_v45  ;;  %v8732_v61 = vld [vmem:[#allocation37_spill] sm:$0xff] }
 0x349   : > { %5981 = vmatpush3.bf16.msra.mxu0 %v7601_v14  ;;  %5797 = vmatprep.mubr.f32.mxu0 %v3621_v26  ;;  %v8068_v26 = vand.u32 4294901760, %v4079_v27 }
 0x34a   : > { %5983 = vmatprep.subr.bf16.mxu0 %v7612_v35  ;;  %v4185_v3 = vand.u32 4294901760, %v4184_v42  ;;  %v8734_v42 = vld [vmem:[#allocation38_spill] sm:$0xff] }
 0x34b   : > { %v4154_v18 = vsub.f32 %v4079_v27, %v8068_v26 }
 0x34d   : > { %5985 = vmatpush3.bf16.msra.mxu0 %v7612_v35  ;;  %v4155_v48 = vand.u32 4294901760, %v4154_v18 }
 0x34e   : > { %5987 = vmatprep.subr.bf16.mxu0 %v5986_v10 }
 0x34f   : > { %v4156_v16 = vsub.f32 %v4154_v18, %v4155_v48 }
 0x350   : > { %5798 = vmatmul.mubr.f32.vlgmr.msra.gmra.mrb[24].mxu0 %v3631_v62  ;;  %v4178_v62 = vand.u32 4294901760, %v4177_v19 }
 0x351   : > { %5989 = vmatpush3.bf16.msra.mxu0 %v5986_v10  ;;  %5808 = vmatprep.mubr.f32.mxu0 %v7995_v38  ;;  %v4157_v37 = vand.u32 4294901760, %v4156_v16 }
 0x352   : > { %5991 = vmatprep.subr.bf16.mxu0 %v5990_v15  ;;  %v6010_v32 = vpack.c.bf16 %v4185_v3, %v4178_v62 }
 0x355   : > { %5993 = vmatpush3.bf16.msra.mxu0 %v5990_v15 }
 0x356   : > { %5995 = vmatprep.subr.bf16.mxu0 %v7601_v14 }
 0x358   : > { %5809 = vmatmul.mubr.f32.vlgmr.msra.gmra.mrb[24].mxu0 %v8039_v29 }
 0x359   : > { %5997 = vmatpush3.bf16.msra.mxu0 %v7601_v14  ;;  %5819 = vmatprep.mubr.f32.mxu0 %v7995_v38  ;;  %v4198_v14 = vsub.f32 %v4196_v20, %v4197_v24  ;;  %v4166_v38 = vsub.f32 %v4164_v8, %v4165_v17 }
 0x35a   : > { %5999 = vmatprep.subr.bf16.mxu0 %v7612_v35 }
 0x35b   : > { %v4199_v46 = vand.u32 4294901760, %v4198_v14  ;;  %v4167_v59 = vand.u32 4294901760, %v4166_v38 }
 0x35d   : > { %6001 = vmatpush3.bf16.msra.mxu0 %v7612_v35  ;;  %v6014_v35 = vpack.c.bf16 %v4199_v46, %v4192_v31 }
 0x35e   : > { %6003 = vmatprep.subr.bf16.mxu0 %v6002_v52 }
 0x360   : > { %5820 = vmatmul.mubr.f32.vlgmr.msra.gmra.mrb[24].mxu0 %v8039_v29  ;;  %v6022_v29 = vpack.c.bf16 %v4196_v20, %v4189_v57 }
 0x361   : > { %6005 = vmatpush3.bf16.msra.mxu0 %v6002_v52  ;;  %5830 = vmatprep.mubr.f32.mxu0 %v4157_v37  ;;  %v8735_v37 = vld [vmem:[#allocation36_spill] sm:$0xff] }
 0x362   : > { %6007 = vmatprep.subr.bf16.mxu0 %v6006_v33 }
 0x365   : > { %6009 = vmatpush3.bf16.msra.mxu0 %v6006_v33 }
 0x366   : > { %6011 = vmatprep.subr.bf16.mxu0 %v6010_v32 }
 0x368   : > { %5831 = vmatmul.mubr.f32.vlgmr.msra.gmra.mrb[24].mxu0 %v4167_v59 }
 0x369   : > { %6013 = vmatpush3.bf16.msra.mxu0 %v6010_v32  ;;  %5841 = vmatprep.mubr.f32.mxu0 %v8068_v26 }
 0x36a   : > { %6015 = vmatprep.subr.bf16.mxu0 %v6014_v35 }
 0x36d   : > { %6017 = vmatpush3.bf16.msra.mxu0 %v6014_v35 }
 0x36e   : > { %6019 = vmatprep.subr.bf16.mxu0 %v6018_v51 }
 0x370   : > { %5842 = vmatmul.mubr.f32.vlgmr.msra.gmra.mrb[24].mxu0 %v8080_v1 }
 0x371   : > { %6021 = vmatpush3.bf16.msra.mxu0 %v6018_v51  ;;  %5852 = vmatprep.mubr.f32.mxu0 %v4154_v18 }
 0x372   : > { %6023 = vmatprep.subr.bf16.mxu0 %v6022_v29 }
 0x375   : > { %6025 = vmatpush3.bf16.msra.mxu0 %v6022_v29 }
 0x376   : > { %6027 = vmatprep.subr.bf16.mxu0 %v6002_v52 }
 0x378   : > { %5853 = vmatmul.mubr.f32.vlgmr.msra.gmra.mrb[24].mxu0 %v4164_v8  ;;  %v8733_v8 = vld [vmem:[#allocation35_spill] sm:$0xff] }
 0x379   : > { %6029 = vmatpush3.bf16.msra.mxu0 %v6002_v52  ;;  %5863 = vmatprep.mubr.f32.mxu0 %v4155_v48 }
 0x37a   : > { %6031 = vmatprep.subr.bf16.mxu0 %v6006_v33 }
 0x37d   : > { %6033 = vmatpush3.bf16.msra.mxu0 %v6006_v33 }
 0x37e   : > { %6035 = vmatprep.subr.bf16.mxu0 %v6034_v43 }
 0x380   : > { %5864 = vmatmul.mubr.f32.vlgmr.msra.gmra.mrb[24].mxu0 %v4165_v17 }
 0x381   : > { %6037 = vmatpush3.bf16.msra.mxu0 %v6034_v43  ;;  %5874 = vmatprep.mubr.f32.mxu0 %v8068_v26 }
 0x382   : > { %6039 = vmatprep.subr.bf16.mxu0 %v6038_v39 }
 0x385   : > { %6041 = vmatpush3.bf16.msra.mxu0 %v6038_v39 }
 0x386   : > { %6043 = vmatprep.subr.bf16.mxu0 %v6002_v52 }
 0x388   : > { %5875 = vmatmul.mubr.f32.vlgmr.msra.gmra.mrb[24].mxu0 %v8080_v1 }
 0x389   : > { %6045 = vmatpush3.bf16.msra.mxu0 %v6002_v52  ;;  %5885 = vmatprep.mubr.f32.mxu0 %v8068_v26 }
 0x38a   : > { %6047 = vmatprep.subr.bf16.mxu0 %v6006_v33 }
 0x38d   : > { %v5726_v10 = vpop.f32.mrb[16].mxu1  ;;  %6049 = vmatpush3.bf16.msra.mxu0 %v6006_v33 }
 0x38e   : > { %v2933_v27 = vmul.f32 %v5726_v10, %v7556_v5  ;;  %v2804_v23 = vpop.f32.mrb[17].mxu1  ;;  %v8152_v10 = vld [vmem:[%s8588_s19] ss:$0 sm:$0xff] }
 0x38f   : > { %v2931_v41 = vmul.f32 %v2804_v23, %v7552_v7  ;;  %v5727_v15 = vpop.f32.mrb[18].mxu1 }
 0x390   : > { %v2972_v28 = vadd.f32 %v8098_v21, %v2933_v27  ;;  %v2934_v13 = vmul.f32 %v5727_v15, %v7558_v55  ;;  %v2807_v0 = vpop.f32.mrb[19].mxu1  ;;  %5886 = vmatmul.mubr.f32.vlgmr.msra.gmra.mrb[24].mxu0 %v8080_v1  ;;  %v8117_v55 = vld [vmem:[%s8584_s15 + $0x8] sm:$0xff] }
 0x391   : > { %v2970_v26 = vadd.f32 %v8098_v21, %v2931_v41  ;;  %v2932_v49 = vmul.f32 %v2807_v0, %v8731_v25  ;;  %v4652_v1 = vand.u32 4294901760, %v8117_v55 }
 0x392   : > { %v3004_v63 = vmul.f32 0.5, %v2972_v28  ;;  %v2973_v18 = vadd.f32 %v8098_v21, %v2934_v13 }
 0x393   : > { %v3002_v5 = vmul.f32 0.5, %v2970_v26  ;;  %v2971_v40 = vadd.f32 %v8098_v21, %v2932_v49  ;;  %v8125_v48 = vpack.c.bf16 %v4652_v1, %v4649_v30 }
 0x394   : > { %6393 = vtanh.f32 %v3004_v63  ;;  %v3005_v7 = vmul.f32 0.5, %v2973_v18 }
 0x395   : > { %6395 = vtanh.f32 %v3002_v5  ;;  %v3003_v22 = vmul.f32 0.5, %v2971_v40  ;;  %6051 = vmatprep.subr.bf16.mxu1 %v8125_v48  ;;  %v8736_v5 = vld [vmem:[#allocation47_spill] sm:$0xff] }
 0x396   : > { %6397 = vtanh.f32 %v3005_v7  ;;  %6053 = vmatpush3.bf16.msra.mxu1 %v8125_v48 }
 0x397   : > { %6399 = vtanh.f32 %v3003_v22 }
 0x39a   : > { %v5730_v56 = vpop.f32.mrb[20].mxu1 }
 0x39b   : > { %v2937_v57 = vmul.f32 %v5730_v56, %v8732_v61  ;;  %v2820_v20 = vpop.f32.mrb[21].mxu1 }
 0x39c   : > { %v2935_v52 = vmul.f32 %v2820_v20, %v8733_v8  ;;  %v5731_v16 = vpop.f32.mrb[22].mxu1 }
 0x39d   : > { %v8132_v19 = vadd.f32 %v8098_v21, %v2937_v57  ;;  %v2938_v34 = vmul.f32 %v5731_v16, %v8734_v42  ;;  %v2823_v24 = vpop.f32.mrb[23].mxu1  ;;  %v8737_v57 = vld [vmem:[#allocation43_spill] sm:$0xff]  ;;  %v8738_v16 = vld [vmem:[#allocation48_spill] sm:$0xff] }
 0x39e   : > { %v6394_v17 = vpop.eup %6393  ;;  %v8136_v33 = vadd.f32 %v8098_v21, %v2935_v52  ;;  %v2936_v62 = vmul.f32 %v2823_v24, %v8735_v37 }
 0x39f   : > { %v6396_v3 = vpop.eup %6395  ;;  %v3008_v11 = vmul.f32 0.5, %v8132_v19  ;;  %v8141_v14 = vadd.f32 %v8098_v21, %v2938_v34  ;;  %v3068_v38 = vmul.f32 0.5, %v6394_v17 }
 0x3a0   : > { %v6398_v32 = vpop.eup %6397  ;;  %v3006_v31 = vmul.f32 0.5, %v8136_v33  ;;  %v8145_v46 = vadd.f32 %v8098_v21, %v2936_v62  ;;  %v3066_v59 = vmul.f32 0.5, %v6396_v3 }
 0x3a1   : > { %v6400_v35 = vpop.eup %6399  ;;  %6401 = vtanh.f32 %v3008_v11  ;;  %v3009_v51 = vmul.f32 0.5, %v8141_v14  ;;  %v3100_v29 = vadd.f32 0.5, %v3068_v38  ;;  %v3069_v43 = vmul.f32 0.5, %v6398_v32 }
 0x3a2   : > { %6403 = vtanh.f32 %v3006_v31  ;;  %v3007_v39 = vmul.f32 0.5, %v8145_v46  ;;  %v3098_v27 = vadd.f32 0.5, %v3066_v59  ;;  %v3067_v23 = vmul.f32 0.5, %v6400_v35 }
 0x3a3   : > { %6405 = vtanh.f32 %v3009_v51  ;;  %v3132_v41 = vmul.f32 %v3100_v29, %v2972_v28  ;;  %v3101_v15 = vadd.f32 0.5, %v3069_v43 }
 0x3a4   : > { %6407 = vtanh.f32 %v3007_v39  ;;  %v3130_v13 = vmul.f32 %v3098_v27, %v2970_v26  ;;  %v3099_v0 = vadd.f32 0.5, %v3067_v23 }
 0x3a5   : > { %v5734_v25 = vpop.f32.mrb[24].mxu1  ;;  %v3171_v49 = vmul.f32 %v8152_v10, %v3132_v41  ;;  %v3133_v63 = vmul.f32 %v3101_v15, %v2973_v18 }
 0x3a6   : > { %v2941_v7 = vmul.f32 %v5734_v25, %v8736_v5  ;;  %v2836_v22 = vpop.f32.mrb[25].mxu1  ;;  %v3169_v56 = vmul.f32 %v8152_v10, %v3130_v13  ;;  %v3131_v61 = vmul.f32 %v3099_v0, %v2971_v40  ;;  %v8739_v40 = vld [vmem:[#allocation44_spill] sm:$0xff] }
 0x3a7   : > { %v2939_v20 = vmul.f32 %v2836_v22, %v8737_v57  ;;  %v5735_v8 = vpop.f32.mrb[26].mxu1  ;;  %v3207_v52 = vsel %vm893_vm0, %v3171_v49, 0.0  ;;  %v3172_v28 = vmul.f32 %v8152_v10, %v3133_v63 }
 0x3a8   : > { %v2980_v26 = vadd.f32 %v8098_v21, %v2941_v7  ;;  %v2942_v42 = vmul.f32 %v5735_v8, %v8738_v16  ;;  %v2839_v34 = vpop.f32.mrb[27].mxu1  ;;  %3208 = vadd.xlane.f32.xlu0 %v3207_v52  ;;  %v3201_v18 = vsel %vm893_vm0, %v3169_v56, 0.0  ;;  %v3170_v24 = vmul.f32 %v8152_v10, %v3131_v61 }
 0x3a9   : > { %v2978_v17 = vadd.f32 %v8098_v21, %v2939_v20  ;;  %v2940_v37 = vmul.f32 %v2839_v34, %v8739_v40  ;;  %3202 = vadd.xlane.f32.xlu1 %v3201_v18  ;;  %v3210_v51 = vsel %vm893_vm0, %v3172_v28, 0.0 }
 0x3aa   : > { %v3012_v62 = vmul.f32 0.5, %v2980_v26  ;;  %v2981_v3 = vadd.f32 %v8098_v21, %v2942_v42  ;;  %v3204_v11 = vsel %vm893_vm0, %v3170_v24, 0.0 }
 0x3ab   : > { %v6402_v38 = vpop.eup %6401  ;;  %v3010_v32 = vmul.f32 0.5, %v2978_v17  ;;  %v2979_v31 = vadd.f32 %v8098_v21, %v2940_v37 }
 0x3ac   : > { %v6404_v59 = vpop.eup %6403  ;;  %6409 = vtanh.f32 %v3012_v62  ;;  %v3013_v35 = vmul.f32 0.5, %v2981_v3  ;;  %3205 = vadd.xlane.f32.xlu0 %v3204_v11  ;;  %v3072_v29 = vmul.f32 0.5, %v6402_v38 }
 0x3ad   : > { %v6406_v43 = vpop.eup %6405  ;;  %6411 = vtanh.f32 %v3010_v32  ;;  %v3011_v39 = vmul.f32 0.5, %v2979_v31  ;;  %3211 = vadd.xlane.f32.xlu1 %v3210_v51  ;;  %v3070_v27 = vmul.f32 0.5, %v6404_v59 }
 0x3ae   : > { %v6408_v23 = vpop.eup %6407  ;;  %6413 = vtanh.f32 %v3013_v35  ;;  %v3104_v41 = vadd.f32 0.5, %v3072_v29  ;;  %v3073_v15 = vmul.f32 0.5, %v6406_v43 }
 0x3af   : > { %6415 = vtanh.f32 %v3011_v39  ;;  %v3102_v13 = vadd.f32 0.5, %v3070_v27  ;;  %v3071_v0 = vmul.f32 0.5, %v6408_v23 }
 0x3b0   : > { %v3136_v25 = vmul.f32 %v3104_v41, %v8132_v19  ;;  %v3105_v49 = vadd.f32 0.5, %v3073_v15  ;;  %v8740_v41 = vld [vmem:[#allocation50_spill] sm:$0xff] }
 0x3b1   : > { %v3134_v63 = vmul.f32 %v3102_v13, %v8136_v33  ;;  %v3103_v5 = vadd.f32 0.5, %v3071_v0 }
 0x3b2   : > { %v3175_v7 = vmul.f32 %v8152_v10, %v3136_v25  ;;  %v3137_v22 = vmul.f32 %v3105_v49, %v8141_v14  ;;  %v8741_v49 = vld [vmem:[#allocation51_spill] sm:$0xff] }
 0x3b3   : > { %v3135_v56 = vmul.f32 %v3103_v5, %v8145_v46  ;;  %v3173_v20 = vmul.f32 %v8152_v10, %v3134_v63 }
 0x3b4   : > { %v3219_v61 = vsel %vm893_vm0, %v3175_v7, 0.0  ;;  %v3176_v57 = vmul.f32 %v8152_v10, %v3137_v22 }
 0x3b5   : > { %3220 = vadd.xlane.f32.xlu0 %v3219_v61  ;;  %v3174_v52 = vmul.f32 %v8152_v10, %v3135_v56  ;;  %v3213_v14 = vsel %vm893_vm0, %v3173_v20, 0.0 }
 0x3b6   : > { %v6410_v8 = vpop.eup %6409  ;;  %v3222_v19 = vsel %vm893_vm0, %v3176_v57, 0.0 }
 0x3b7   : > { %v6412_v33 = vpop.eup %6411  ;;  %3223 = vadd.xlane.f32.xlu1 %v3222_v19  ;;  %v3076_v28 = vmul.f32 0.5, %v6410_v8  ;;  %v3216_v24 = vsel %vm893_vm0, %v3174_v52, 0.0 }
 0x3b8   : > { %v6414_v16 = vpop.eup %6413  ;;  %v3074_v42 = vmul.f32 0.5, %v6412_v33 }
 0x3b9   : > { %v6416_v46 = vpop.eup %6415  ;;  %3214 = vadd.xlane.f32.xlu0 %v3213_v14  ;;  %v3108_v34 = vadd.f32 0.5, %v3076_v28  ;;  %v3077_v18 = vmul.f32 0.5, %v6414_v16 }
 0x3ba   : > { %v3106_v40 = vadd.f32 0.5, %v3074_v42  ;;  %v3075_v37 = vmul.f32 0.5, %v6416_v46 }
 0x3bb   : > { %3217 = vadd.xlane.f32.xlu1 %v3216_v24  ;;  %v3140_v62 = vmul.f32 %v3108_v34, %v2980_v26  ;;  %v3109_v11 = vadd.f32 0.5, %v3077_v18 }
 0x3bc   : > { %v3138_v38 = vmul.f32 %v3106_v40, %v2978_v17  ;;  %v3107_v32 = vadd.f32 0.5, %v3075_v37 }
 0x3bd   : > { %v3179_v59 = vmul.f32 %v8152_v10, %v3140_v62  ;;  %v3141_v35 = vmul.f32 %v3109_v11, %v2981_v3 }
 0x3be   : > { %v3139_v51 = vmul.f32 %v3107_v32, %v2979_v31  ;;  %v3177_v39 = vmul.f32 %v8152_v10, %v3138_v38 }
 0x3bf   : > { %v3231_v29 = vsel %vm893_vm0, %v3179_v59, 0.0  ;;  %v3180_v43 = vmul.f32 %v8152_v10, %v3141_v35 }
 0x3c0   : > { %3232 = vadd.xlane.f32.xlu0 %v3231_v29  ;;  %v3178_v23 = vmul.f32 %v8152_v10, %v3139_v51  ;;  %v3225_v17 = vsel %vm893_vm0, %v3177_v39, 0.0 }
 0x3c1   : > { %v3234_v27 = vsel %vm893_vm0, %v3180_v43, 0.0 }
 0x3c2   : > { %3235 = vadd.xlane.f32.xlu1 %v3234_v27  ;;  %v5738_v26 = vpop.f32.mrb[28].mxu1  ;;  %v3228_v0 = vsel %vm893_vm0, %v3178_v23, 0.0 }
 0x3c3   : > { %v2945_v15 = vmul.f32 %v5738_v26, %v8740_v41  ;;  %v2852_v13 = vpop.f32.mrb[29].mxu1 }
 0x3c4   : > { %3226 = vadd.xlane.f32.xlu0 %v3225_v17  ;;  %v2943_v3 = vmul.f32 %v2852_v13, %v7804_v60  ;;  %v5739_v31 = vpop.f32.mrb[30].mxu1 }
 0x3c5   : > { %v2984_v25 = vadd.f32 %v8098_v21, %v2945_v15  ;;  %v2946_v63 = vmul.f32 %v5739_v31, %v8741_v49  ;;  %v2855_v5 = vpop.f32.mrb[31].mxu1  ;;  %v8742_v49 = vld [vmem:[#allocation45_spill] sm:$0xff] }
 0x3c6   : > { %3229 = vadd.xlane.f32.xlu1 %v3228_v0  ;;  %v2982_v7 = vadd.f32 %v8098_v21, %v2943_v3  ;;  %v2944_v22 = vmul.f32 %v2855_v5, %v7834_v50 }
 0x3c7   : > { %v3016_v56 = vmul.f32 0.5, %v2984_v25  ;;  %v2985_v61 = vadd.f32 %v8098_v21, %v2946_v63 }
 0x3c8   : > { %v3014_v57 = vmul.f32 0.5, %v2982_v7  ;;  %v2983_v20 = vadd.f32 %v8098_v21, %v2944_v22 }
 0x3c9   : > { %6417 = vtanh.f32 %v3016_v56  ;;  %v3017_v60 = vmul.f32 0.5, %v2985_v61 }
 0x3ca   : > { %6419 = vtanh.f32 %v3014_v57  ;;  %v3015_v8 = vmul.f32 0.5, %v2983_v20 }
 0x3cb   : > { %6421 = vtanh.f32 %v3017_v60 }
 0x3cc   : > { %6423 = vtanh.f32 %v3015_v8 }
 0x3d3   : > { %v6418_v19 = vpop.eup %6417 }
 0x3d4   : > { %v6420_v52 = vpop.eup %6419  ;;  %v3080_v33 = vmul.f32 0.5, %v6418_v19  ;;  %v5742_v42 = vpop.f32.mrb[32].mxu1 }
 0x3d5   : > { %v6422_v28 = vpop.eup %6421  ;;  %v3078_v16 = vmul.f32 0.5, %v6420_v52  ;;  %v2949_v34 = vmul.f32 %v5742_v42, %v7614_v2  ;;  %v2868_v18 = vpop.f32.mrb[33].mxu1  ;;  %v8745_v52 = vld [vmem:[#allocation42_spill] sm:$0xff] }
 0x3d6   : > { %v6424_v14 = vpop.eup %6423  ;;  %v3112_v50 = vadd.f32 0.5, %v3080_v33  ;;  %v3081_v46 = vmul.f32 0.5, %v6422_v28  ;;  %v2947_v37 = vmul.f32 %v2868_v18, %v7582_v53  ;;  %v5743_v62 = vpop.f32.mrb[34].mxu1 }
 0x3d7   : > { %v3110_v24 = vadd.f32 0.5, %v3078_v16  ;;  %v3079_v40 = vmul.f32 0.5, %v6424_v14  ;;  %v8201_v32 = vadd.f32 %v8098_v21, %v2949_v34  ;;  %v2950_v59 = vmul.f32 %v5743_v62, %v7621_v9  ;;  %v2871_v35 = vpop.f32.mrb[35].mxu1 }
 0x3d8   : > { %v3144_v11 = vmul.f32 %v3112_v50, %v2984_v25  ;;  %v3113_v38 = vadd.f32 0.5, %v3081_v46  ;;  %v8205_v43 = vadd.f32 %v8098_v21, %v2947_v37  ;;  %v2948_v2 = vmul.f32 %v2871_v35, %v7584_v47 }
 0x3d9   : > { %v3142_v51 = vmul.f32 %v3110_v24, %v2982_v7  ;;  %v3111_v29 = vadd.f32 0.5, %v3079_v40  ;;  %v3020_v53 = vmul.f32 0.5, %v8201_v32  ;;  %v8211_v23 = vadd.f32 %v8098_v21, %v2950_v59  ;;  %v8743_v7 = vld [vmem:[#allocation41_spill] sm:$0xff] }
 0x3da   : > { %v3183_v39 = vmul.f32 %v8152_v10, %v3144_v11  ;;  %v3145_v27 = vmul.f32 %v3113_v38, %v2985_v61  ;;  %v3018_v9 = vmul.f32 0.5, %v8205_v43  ;;  %v8216_v41 = vadd.f32 %v8098_v21, %v2948_v2 }
 0x3db   : > { %v3181_v26 = vmul.f32 %v8152_v10, %v3142_v51  ;;  %v3143_v17 = vmul.f32 %v3111_v29, %v2983_v20  ;;  %6425 = vtanh.f32 %v3020_v53  ;;  %v3021_v13 = vmul.f32 0.5, %v8211_v23  ;;  %v8744_v20 = vld [vmem:[#allocation46_spill] sm:$0xff] }
 0x3dc   : > { %v3243_v15 = vsel %vm893_vm0, %v3183_v39, 0.0  ;;  %v3184_v47 = vmul.f32 %v8152_v10, %v3145_v27  ;;  %6427 = vtanh.f32 %v3018_v9  ;;  %v3019_v3 = vmul.f32 0.5, %v8216_v41  ;;  %v5746_v31 = vpop.f32.mrb[36].mxu1 }
 0x3dd   : > { %3244 = vadd.xlane.f32.xlu0 %v3243_v15  ;;  %v3182_v25 = vmul.f32 %v8152_v10, %v3143_v17  ;;  %6429 = vtanh.f32 %v3021_v13  ;;  %v2953_v63 = vmul.f32 %v5746_v31, %v8742_v49  ;;  %v2884_v5 = vpop.f32.mrb[37].mxu1  ;;  %v3237_v61 = vsel %vm893_vm0, %v3181_v26, 0.0 }
 0x3de   : > { %v3246_v0 = vsel %vm893_vm0, %v3184_v47, 0.0  ;;  %6431 = vtanh.f32 %v3019_v3  ;;  %v2951_v22 = vmul.f32 %v2884_v5, %v8743_v7  ;;  %v5747_v56 = vpop.f32.mrb[38].mxu1 }
 0x3df   : > { %3247 = vadd.xlane.f32.xlu1 %v3246_v0  ;;  %v8228_v57 = vadd.f32 %v8098_v21, %v2953_v63  ;;  %v2954_v60 = vmul.f32 %v5747_v56, %v8744_v20  ;;  %v2887_v8 = vpop.f32.mrb[39].mxu1  ;;  %v3240_v28 = vsel %vm893_vm0, %v3182_v25, 0.0 }
 0x3e0   : > { %v8232_v19 = vadd.f32 %v8098_v21, %v2951_v22  ;;  %v2952_v33 = vmul.f32 %v2887_v8, %v8745_v52 }
 0x3e1   : > { %3238 = vadd.xlane.f32.xlu0 %v3237_v61  ;;  %v3024_v16 = vmul.f32 0.5, %v8228_v57  ;;  %v8238_v14 = vadd.f32 %v8098_v21, %v2954_v60 }
 0x3e2   : > { %v3022_v42 = vmul.f32 0.5, %v8232_v19  ;;  %v8242_v50 = vadd.f32 %v8098_v21, %v2952_v33 }
 0x3e3   : > { %3241 = vadd.xlane.f32.xlu1 %v3240_v28  ;;  %6433 = vtanh.f32 %v3024_v16  ;;  %v3025_v46 = vmul.f32 0.5, %v8238_v14 }
 0x3e4   : > { %6435 = vtanh.f32 %v3022_v42  ;;  %v3023_v34 = vmul.f32 0.5, %v8242_v50  ;;  %v5750_v18 = vpop.f32.mrb[40].mxu1 }
 0x3e5   : > { %v6426_v24 = vpop.eup %6425  ;;  %6437 = vtanh.f32 %v3025_v46  ;;  %v2957_v40 = vmul.f32 %v5750_v18, %v7843_v4  ;;  %v2900_v37 = vpop.f32.mrb[41].mxu1  ;;  %v8746_v4 = vld [vmem:[#allocation49_spill] sm:$0xff] }
 0x3e6   : > { %v6428_v62 = vpop.eup %6427  ;;  %6439 = vtanh.f32 %v3023_v34  ;;  %v2955_v11 = vmul.f32 %v2900_v37, %v7770_v12  ;;  %v5751_v38 = vpop.f32.mrb[42].mxu1  ;;  %v3084_v59 = vmul.f32 0.5, %v6426_v24 }
 0x3e7   : > { %v6430_v35 = vpop.eup %6429  ;;  %v8249_v51 = vadd.f32 %v8098_v21, %v2957_v40  ;;  %v2958_v29 = vmul.f32 %v5751_v38, %v7865_v58  ;;  %v2903_v2 = vpop.f32.mrb[43].mxu1  ;;  %v3082_v39 = vmul.f32 0.5, %v6428_v62 }
 0x3e8   : > { %v6432_v27 = vpop.eup %6431  ;;  %v3085_v53 = vmul.f32 0.5, %v6430_v35  ;;  %v8253_v26 = vadd.f32 %v8098_v21, %v2955_v11  ;;  %v2956_v17 = vmul.f32 %v2903_v2, %v8746_v4  ;;  %v3116_v9 = vadd.f32 0.5, %v3084_v59 }
 0x3e9   : > { %v3083_v15 = vmul.f32 0.5, %v6432_v27  ;;  %v3028_v12 = vmul.f32 0.5, %v8249_v51  ;;  %v8258_v47 = vadd.f32 %v8098_v21, %v2958_v29  ;;  %v3114_v13 = vadd.f32 0.5, %v3082_v39 }
 0x3ea   : > { %v3117_v3 = vadd.f32 0.5, %v3085_v53  ;;  %v3026_v58 = vmul.f32 0.5, %v8253_v26  ;;  %v8262_v31 = vadd.f32 %v8098_v21, %v2956_v17  ;;  %v3148_v0 = vmul.f32 %v3116_v9, %v8201_v32 }
 0x3eb   : > { %v3115_v25 = vadd.f32 0.5, %v3083_v15  ;;  %6441 = vtanh.f32 %v3028_v12  ;;  %v3029_v49 = vmul.f32 0.5, %v8258_v47  ;;  %v3146_v63 = vmul.f32 %v3114_v13, %v8205_v43 }
 0x3ec   : > { %v3149_v5 = vmul.f32 %v3117_v3, %v8211_v23  ;;  %6443 = vtanh.f32 %v3026_v58  ;;  %v3027_v7 = vmul.f32 0.5, %v8262_v31  ;;  %v5754_v22 = vpop.f32.mrb[44].mxu1  ;;  %v3187_v56 = vmul.f32 %v8152_v10, %v3148_v0 }
 0x3ed   : > { %v6434_v61 = vpop.eup %6433  ;;  %v3147_v20 = vmul.f32 %v3115_v25, %v8216_v41  ;;  %6445 = vtanh.f32 %v3029_v49  ;;  %v2961_v32 = vmul.f32 %v5754_v22, %v7997_v36  ;;  %v2916_v60 = vpop.f32.mrb[45].mxu1  ;;  %v3185_v8 = vmul.f32 %v8152_v10, %v3146_v63 }
 0x3ee   : > { %v6436_v52 = vpop.eup %6435  ;;  %v3088_v33 = vmul.f32 0.5, %v6434_v61  ;;  %6447 = vtanh.f32 %v3027_v7  ;;  %v2959_v43 = vmul.f32 %v2916_v60, %v7980_v44  ;;  %v5755_v23 = vpop.f32.mrb[46].mxu1  ;;  %v3255_v28 = vsel %vm893_vm0, %v3187_v56, 0.0 }
 0x3ef   : > { %v6438_v16 = vpop.eup %6437  ;;  %v3086_v42 = vmul.f32 0.5, %v6436_v52  ;;  %v8276_v46 = vadd.f32 %v8098_v21, %v2961_v32  ;;  %v2962_v41 = vmul.f32 %v5755_v23, %v8007_v54  ;;  %3256 = vadd.xlane.f32.xlu0 %v3255_v28  ;;  %v2919_v36 = vpop.f32.mrb[47].mxu1  ;;  %v3188_v34 = vmul.f32 %v8152_v10, %v3149_v5 }
 0x3f0   : > { %v6440_v18 = vpop.eup %6439  ;;  %v3120_v24 = vadd.f32 0.5, %v3088_v33  ;;  %v3089_v40 = vmul.f32 0.5, %v6438_v16  ;;  %v8281_v37 = vadd.f32 %v8098_v21, %v2959_v43  ;;  %v2960_v44 = vmul.f32 %v2919_v36, %v7983_v6  ;;  %v4634_v36 = vld [vmem:[%s8584_s15 + $0x18] sm:$0xff] }
 0x3f1   : > { %v3118_v62 = vadd.f32 0.5, %v3086_v42  ;;  %v3087_v11 = vmul.f32 0.5, %v6440_v18  ;;  %v3032_v38 = vmul.f32 0.5, %v8276_v46  ;;  %v8286_v59 = vadd.f32 %v8098_v21, %v2962_v41  ;;  %v4633_v41 = vld [vmem:[%s8584_s15 + $0x10] sm:$0xff] }
 0x3f2   : > { %v3152_v54 = vmul.f32 %v3120_v24, %v8228_v57  ;;  %v3121_v35 = vadd.f32 0.5, %v3089_v40  ;;  %v3030_v29 = vmul.f32 0.5, %v8281_v37  ;;  %v8291_v2 = vadd.f32 %v8098_v21, %v2960_v44 }
 0x3f3   : > { %v3119_v39 = vadd.f32 0.5, %v3087_v11  ;;  %6449 = vtanh.f32 %v3032_v38  ;;  %v3033_v27 = vmul.f32 0.5, %v8286_v59  ;;  %v3258_v4 = vsel %vm893_vm0, %v3188_v34, 0.0 }
 0x3f4   : > { %v3153_v6 = vmul.f32 %v3121_v35, %v8238_v14  ;;  %6451 = vtanh.f32 %v3030_v29  ;;  %v3031_v53 = vmul.f32 0.5, %v8291_v2  ;;  %v3150_v57 = vmul.f32 %v3118_v62, %v8232_v19  ;;  %3259 = vadd.xlane.f32.xlu1 %v3258_v4 }
 0x3f5   : > { %v6442_v17 = vpop.eup %6441  ;;  %6453 = vtanh.f32 %v3033_v27  ;;  %v3249_v9 = vsel %vm893_vm0, %v3185_v8, 0.0  ;;  %v3186_v21 = vmul.f32 %v8152_v10, %v3147_v20  ;;  %v3191_v14 = vmul.f32 %v8152_v10, %v3152_v54 }
 0x3f6   : > { %v6444_v15 = vpop.eup %6443  ;;  %v3092_v12 = vmul.f32 0.5, %v6442_v17  ;;  %6455 = vtanh.f32 %v3031_v53  ;;  %3250 = vadd.xlane.f32.xlu0 %v3249_v9  ;;  %v3192_v13 = vmul.f32 %v8152_v10, %v3153_v6  ;;  %v3151_v58 = vmul.f32 %v3119_v39, %v8242_v50 }
 0x3f7   : > { %v6446_v3 = vpop.eup %6445  ;;  %v3090_v0 = vmul.f32 0.5, %v6444_v15  ;;  %v3252_v63 = vsel %vm893_vm0, %v3186_v21, 0.0  ;;  %v3267_v5 = vsel %vm893_vm0, %v3191_v14, 0.0  ;;  %v3189_v56 = vmul.f32 %v8152_v10, %v3150_v57 }
 0x3f8   : > { %v6448_v25 = vpop.eup %6447  ;;  %v3124_v19 = vadd.f32 0.5, %v3092_v12  ;;  %v3093_v49 = vmul.f32 0.5, %v6446_v3  ;;  %3253 = vadd.xlane.f32.xlu1 %v3252_v63  ;;  %v3270_v32 = vsel %vm893_vm0, %v3192_v13, 0.0  ;;  %v3190_v52 = vmul.f32 %v8152_v10, %v3151_v58 }
 0x3f9   : > { %v3122_v7 = vadd.f32 0.5, %v3090_v0  ;;  %v3091_v22 = vmul.f32 0.5, %v6448_v25  ;;  %v3261_v23 = vsel %vm893_vm0, %v3189_v56, 0.0  ;;  %v4655_v18 = vand.u32 4294901760, %v4633_v41 }
 0x3fa   : > { %v3156_v61 = vmul.f32 %v3124_v19, %v8249_v51  ;;  %v3125_v20 = vadd.f32 0.5, %v3093_v49  ;;  %3268 = vadd.xlane.f32.xlu0 %v3267_v5  ;;  %v8317_v51 = vsub.f32 %v8112_v45, %v4649_v30  ;;  %v4746_v45 = vsub.f32 %v8117_v55, %v4652_v1 }
 0x3fb   : > { %v3154_v50 = vmul.f32 %v3122_v7, %v8253_v26  ;;  %v3123_v60 = vadd.f32 0.5, %v3091_v22  ;;  %v3264_v62 = vsel %vm893_vm0, %v3190_v52, 0.0  ;;  %v4658_v11 = vand.u32 4294901760, %v4634_v36 }
 0x3fc   : > { %v3157_v8 = vmul.f32 %v3125_v20, %v8258_v47  ;;  %v3195_v33 = vmul.f32 %v8152_v10, %v3156_v61  ;;  %3271 = vadd.xlane.f32.xlu1 %v3270_v32  ;;  %v4740_v29 = vand.u32 4294901760, %v8317_v51  ;;  %v4747_v27 = vand.u32 4294901760, %v4746_v45 }
 0x3fd   : > { %v6450_v43 = vpop.eup %6449  ;;  %v3193_v28 = vmul.f32 %v8152_v10, %v3154_v50  ;;  %v3155_v26 = vmul.f32 %v3123_v60, %v8262_v31  ;;  %v8336_v39 = vpack.c.bf16 %v4658_v11, %v4655_v18  ;;  %v4753_v17 = vsub.f32 %v4633_v41, %v4655_v18  ;;  %v5501_v41 = vld [vmem:[%s8747_s24] ss:$0 sm:$0xff]  ;;  %s8516_s24 = scalar_lea.hbm %s8763_s4, %s5517_s29 }
 0x3fe   : > { %v6452_v16 = vpop.eup %6451  ;;  %v3096_v42 = vmul.f32 0.5, %v6450_v43  ;;  %3262 = vadd.xlane.f32.xlu0 %v3261_v23  ;;  %v3196_v47 = vmul.f32 %v8152_v10, %v3157_v8  ;;  %v3279_v31 = vsel %vm893_vm0, %v3195_v33, 0.0  ;;  %v4741_v4 = vsub.f32 %v8317_v51, %v4740_v29 }
 0x3ff   : > { %v6454_v30 = vpop.eup %6453  ;;  %v3094_v34 = vmul.f32 0.5, %v6452_v16  ;;  %v3273_v35 = vsel %vm893_vm0, %v3193_v28, 0.0  ;;  %v3194_v1 = vmul.f32 %v8152_v10, %v3155_v26  ;;  %6055 = vmatprep.subr.bf16.mxu1 %v8336_v39  ;;  %v4748_v21 = vsub.f32 %v4746_v45, %v4747_v27 }
 0x400   : > { %v6456_v24 = vpop.eup %6455  ;;  %v3128_v40 = vadd.f32 0.5, %v3096_v42  ;;  %v3097_v44 = vmul.f32 0.5, %v6454_v30  ;;  %3265 = vadd.xlane.f32.xlu1 %v3264_v62  ;;  %v3282_v55 = vsel %vm893_vm0, %v3196_v47, 0.0  ;;  %v4760_v15 = vsub.f32 %v4634_v36, %v4658_v11  ;;  %6057 = vmatpush3.bf16.msra.mxu1 %v8336_v39  ;;  %v8748_v36 = vld [vmem:[#allocation26_spill] sm:$0xff] }
 0x401   : > { %v3126_v38 = vadd.f32 0.5, %v3094_v34  ;;  %v3095_v54 = vmul.f32 0.5, %v6456_v24  ;;  %v4742_v13 = vand.u32 4294901760, %v4741_v4  ;;  %v4749_v3 = vand.u32 4294901760, %v4748_v21  ;;  %v8749_v24 = vld [vmem:[#allocation27_spill] sm:$0xff] }
 0x402   : > { %3280 = vadd.xlane.f32.xlu0 %v3279_v31  ;;  %v3160_v57 = vmul.f32 %v3128_v40, %v8276_v46  ;;  %v3129_v9 = vadd.f32 0.5, %v3097_v44  ;;  %v4761_v58 = vand.u32 4294901760, %v4760_v15  ;;  %v3276_v49 = vsel %vm893_vm0, %v3194_v1, 0.0 }
 0x403   : > { %v3158_v6 = vmul.f32 %v3126_v38, %v8281_v37  ;;  %v3127_v53 = vadd.f32 0.5, %v3095_v54  ;;  %v4754_v37 = vand.u32 4294901760, %v4753_v17  ;;  %v8355_v61 = vpack.c.bf16 %v4746_v45, %v8317_v51 }
 0x404   : > { %3283 = vadd.xlane.f32.xlu1 %v3282_v55  ;;  %v3161_v19 = vmul.f32 %v3129_v9, %v8286_v59  ;;  %v4762_v63 = vsub.f32 %v4760_v15, %v4761_v58  ;;  %v3199_v5 = vmul.f32 %v8152_v10, %v3160_v57  ;;  %v8361_v50 = vpack.c.bf16 %v4760_v15, %v4753_v17 }
 0x405   : > { %v3159_v12 = vmul.f32 %v3127_v53, %v8291_v2  ;;  %v3197_v14 = vmul.f32 %v8152_v10, %v3158_v6  ;;  %v4755_v25 = vsub.f32 %v4753_v17, %v4754_v37  ;;  %v8349_v2 = vpack.c.bf16 %v4749_v3, %v4742_v13 }
 0x406   : > { %3274 = vadd.xlane.f32.xlu0 %v3273_v35  ;;  %v4763_v56 = vand.u32 4294901760, %v4762_v63  ;;  %v3200_v59 = vmul.f32 %v8152_v10, %v3161_v19  ;;  %v3291_v32 = vsel %vm893_vm0, %v3199_v5, 0.0  ;;  %v8364_v8 = vpack.c.bf16 %v4747_v27, %v4740_v29 }
 0x407   : > { %v3285_v0 = vsel %vm893_vm0, %v3197_v14, 0.0  ;;  %v3198_v46 = vmul.f32 %v8152_v10, %v3159_v12  ;;  %v4756_v7 = vand.u32 4294901760, %v4755_v25  ;;  %6059 = vmatprep.subr.bf16.mxu1 %v8349_v2  ;;  %v8366_v52 = vpack.c.bf16 %v4761_v58, %v4754_v37 }
 0x408   : > { %3277 = vadd.xlane.f32.xlu1 %v3276_v49  ;;  %v3294_v60 = vsel %vm893_vm0, %v3200_v59, 0.0 }
 0x409   : > { %v3288_v22 = vsel %vm893_vm0, %v3198_v46, 0.0  ;;  %v8358_v20 = vpack.c.bf16 %v4763_v56, %v4756_v7 }
 0x40a   : > { %3286 = vadd.xlane.f32.xlu0 %v3285_v0 }
 0x40c   : > { %3289 = vadd.xlane.f32.xlu1 %v3288_v22 }
 0x40e   : > { %3292 = vadd.xlane.f32.xlu0 %v3291_v32 }
 0x410   : > { %3295 = vadd.xlane.f32.xlu1 %v3294_v60 }
 0x435   : > { %v3209_v33 = vpop.xlane.xlu0 %3208 }
 0x436   : > { %v3203_v43 = vpop.xlane.xlu1 %3202  ;;  %v3341_v40 = vrot.slane %v3209_v33, %v8749_v24 }
 0x437   : > { %v3332_v44 = vrot.slane %v3203_v43, %v8749_v24 }
 0x439   : > { %v3206_v23 = vpop.xlane.xlu0 %3205 }
 0x43a   : > { %v3212_v28 = vpop.xlane.xlu1 %3211  ;;  %v3336_v45 = vrot.slane %v3206_v23, %v8748_v36 }
 0x43b   : > { %v3345_v30 = vrot.slane %v3212_v28, %v8748_v36 }
 0x43c   : > { %v3337_v29 = vsel %vm930_vm2, %v3336_v45, %v3332_v44  ;;  %v8751_v45 = vld [vmem:[#allocation29_spill] sm:$0xff]  ;;  %v8752_v44 = vld [vmem:[#allocation28_spill] sm:$0xff] }
 0x43d   : > { %v3346_v55 = vsel %vm930_vm2, %v3345_v30, %v3341_v40 }
 0x43e   : > { %v3473_v57 = vsel %vm932_vm3, %v3346_v55, %v3337_v29 }
 0x442   : > { %v3221_v10 = vpop.xlane.xlu0 %3220 }
 0x443   : > { %v3359_v21 = vrot.slane %v3221_v10, %v8749_v24  ;;  %v8750_v10 = vld [vmem:[#allocation39_spill] sm:$0xff] }
 0x444   : > { %v3224_v51 = vpop.xlane.xlu1 %3223 }
 0x445   : > { %v3363_v4 = vrot.slane %v3224_v51, %v8748_v36 }
 0x446   : > { %v3215_v16 = vpop.xlane.xlu0 %3214 }
 0x447   : > { %v3350_v54 = vrot.slane %v3215_v16, %v8749_v24  ;;  %v3364_v13 = vsel %vm930_vm2, %v3363_v4, %v3359_v21 }
 0x448   : > { %v3218_v26 = vpop.xlane.xlu1 %3217 }
 0x449   : > { %v3354_v31 = vrot.slane %v3218_v26, %v8748_v36 }
 0x44b   : > { %v3355_v27 = vsel %vm930_vm2, %v3354_v31, %v3350_v54 }
 0x44c   : > { %v3474_v15 = vsel %vm933_vm4, %v3355_v27, %v3473_v57 }
 0x44d   : > { %v3233_v42 = vpop.xlane.xlu0 %3232  ;;  %v3475_v58 = vsel %vm935_vm5, %v3364_v13, %v3474_v15 }
 0x44e   : > { %v3377_v0 = vrot.slane %v3233_v42, %v8749_v24 }
 0x44f   : > { %v3236_v47 = vpop.xlane.xlu1 %3235 }
 0x450   : > { %v3381_v37 = vrot.slane %v3236_v47, %v8748_v36 }
 0x451   : > { %v3227_v18 = vpop.xlane.xlu0 %3226 }
 0x452   : > { %v3368_v9 = vrot.slane %v3227_v18, %v8749_v24  ;;  %v3382_v5 = vsel %vm930_vm2, %v3381_v37, %v3377_v0 }
 0x453   : > { %v3230_v38 = vpop.xlane.xlu1 %3229 }
 0x454   : > { %v3372_v53 = vrot.slane %v3230_v38, %v8748_v36 }
 0x456   : > { %v3373_v14 = vsel %vm930_vm2, %v3372_v53, %v3368_v9 }
 0x457   : > { %v3476_v46 = vsel %vm937_vm6, %v3373_v14, %v3475_v58  ;;  %v8754_v58 = vmov 0.0  }
 0x458   : > { %v3477_v22 = vsel %vm939_vm7, %v3382_v5, %v3476_v46  ;;  %897 = vst.msk [vmem:[#allocation3] sm:$0xff] %vm896_vm11, %v8754_v58  ;;  %898 = vst.msk [vmem:[#allocation3 + $0x8] sm:$0xff] %vm896_vm11, %v8754_v58 }
 0x463   : > { %v5887_v34 = vpop.f32.mrb[24].mxu0 }
 0x464   : > { %v4620_v62 = vadd.f32 %v5887_v34, %v5501_v41  ;;  %v4602_v11 = vpop.f32.mrb[25].mxu0 }
 0x465   : > { %v4619_v35 = vadd.f32 %v5501_v41, %v4602_v11 }
 0x466   : > { %v4622_v1 = vmul.f32 0.5, %v4620_v62 }
 0x467   : > { %v4621_v6 = vmul.f32 0.5, %v4619_v35 }
 0x468   : > { %6457 = vtanh.f32 %v4622_v1  ;;  %v8753_v1 = vld [vmem:[#allocation30_spill] sm:$0xff] }
 0x469   : > { %6459 = vtanh.f32 %v4621_v6 }
 0x46a   : > { %v3245_v17 = vpop.xlane.xlu0 %3244 }
 0x46b   : > { %v3395_v7 = vrot.slane %v3245_v17, %v8749_v24 }
 0x46c   : > { %v3248_v12 = vpop.xlane.xlu1 %3247 }
 0x46d   : > { %v3399_v25 = vrot.slane %v3248_v12, %v8748_v36 }
 0x46e   : > { %v3239_v3 = vpop.xlane.xlu0 %3238 }
 0x46f   : > { %v3386_v49 = vrot.slane %v3239_v3, %v8749_v24  ;;  %v3400_v32 = vsel %vm930_vm2, %v3399_v25, %v3395_v7 }
 0x470   : > { %v3242_v19 = vpop.xlane.xlu1 %3241 }
 0x471   : > { %v3390_v63 = vrot.slane %v3242_v19, %v8748_v36 }
 0x472   : > { %v6458_v59 = vpop.eup %6457 }
 0x473   : > { %v3391_v56 = vsel %vm930_vm2, %v3390_v63, %v3386_v49  ;;  %v6460_v33 = vpop.eup %6459  ;;  %v4626_v43 = vmul.f32 0.5, %v6458_v59 }
 0x474   : > { %v3478_v60 = vsel %vm941_vm8, %v3391_v56, %v3477_v22  ;;  %v4625_v28 = vmul.f32 0.5, %v6460_v33 }
 0x475   : > { %v3479_v23 = vsel %vm943_vm9, %v3400_v32, %v3478_v60  ;;  %v4628_v16 = vadd.f32 0.5, %v4626_v43 }
 0x476   : > { %v3489_v51 = vmul.f32 %v3479_v23, %v8750_v10  ;;  %v4627_v26 = vadd.f32 0.5, %v4625_v28 }
 0x477   : > { %v4630_v47 = vmul.f32 %v4628_v16, %v4620_v62 }
 0x478   : > { %v3491_v42 = vmul.f32 0.06666667, %v3489_v51  ;;  %v4629_v41 = vmul.f32 %v4627_v26, %v4619_v35 }
 0x479   : > { %v4646_v34 = vsel %vm893_vm0, %v4630_v47, 0 }
 0x47a   : > { %v3493_v30 = vmul.f32 %v3491_v42, %v8751_v45  ;;  %v8405_v31 = vand.u32 4294901760, %v4646_v34  ;;  %v4643_v18 = vsel %vm893_vm0, %v4629_v41, 0  ;;  %v3502_v11 = vmul.f32 %v3491_v42, %v8752_v44 }
 0x47b   : > { %v8410_v38 = vand.u32 4294901760, %v4643_v18  ;;  %v3510_v27 = vmul.f32 %v3491_v42, %v8753_v1 }
 0x47c   : > { %v3496_v40 = vsel %vm3495_vm10, %v3493_v30, 0.0  ;;  %v8413_v54 = vsub.f32 %v4646_v34, %v8405_v31  ;;  %v3257_v35 = vpop.xlane.xlu0 %3256  ;;  %v3504_v55 = vsel %vm3495_vm10, %v3502_v11, 0.0 }
 0x47d   : > { %3497 = vadd.xlane.f32.xlu0 %v3496_v40  ;;  %v4718_v62 = vsub.f32 %v4643_v18, %v8410_v38  ;;  %v3512_v57 = vsel %vm3495_vm10, %v3510_v27, 0.0 }
 0x47e   : > { %v4729_v29 = vand.u32 4294901760, %v8413_v54 }
 0x47f   : > { %v4719_v6 = vand.u32 4294901760, %v4718_v62 }
 0x480   : > { %v4730_v53 = vsub.f32 %v8413_v54, %v4729_v29 }
 0x481   : > { %3505 = vadd.xlane.f32.xlu0 %v3504_v55  ;;  %v4720_v4 = vsub.f32 %v4718_v62, %v4719_v6  ;;  %v3260_v17 = vpop.xlane.xlu1 %3259  ;;  %v8755_v55 = vld [vmem:[#allocation40_spill] sm:$0xff] }
 0x482   : > { %v4731_v15 = vand.u32 4294901760, %v4730_v53  ;;  %v3417_v25 = vrot.slane %v3260_v17, %v8748_v36 }
 0x483   : > { %v4721_v9 = vand.u32 4294901760, %v4720_v4  ;;  %v3251_v21 = vpop.xlane.xlu0 %3250  ;;  %v8758_v4 = vld [vmem:[#allocation33_spill] sm:$0xff] }
 0x484   : > { %v3404_v19 = vrot.slane %v3251_v21, %v8749_v24 }
 0x485   : > { %3513 = vadd.xlane.f32.xlu0 %v3512_v57  ;;  %5896 = vmatprep.mubr.f32.mxu1 %v4721_v9  ;;  %v3254_v12 = vpop.xlane.xlu1 %3253  ;;  %v3524_v9 = vld [vmem:[#allocation3] sm:$0xff] }
 0x486   : > { %5897 = vmatmul.mubr.f32.vlgmr.msra.gmra.mrb[48].mxu1 %v4731_v15 }
 0x487   : > { %6061 = vmatpush3.bf16.msra.mxu1 %v8349_v2  ;;  %5907 = vmatprep.mubr.f32.mxu1 %v8410_v38  ;;  %v3269_v14 = vpop.xlane.xlu0 %3268 }
 0x488   : > { %6063 = vmatprep.subr.bf16.mxu1 %v8358_v20  ;;  %v3431_v43 = vrot.slane %v3269_v14, %v8749_v24  ;;  %v6464_v14 = vld [vmem:[%s6994_s16] sm:$0xff] }
 0x489   : > { %v3272_v13 = vpop.xlane.xlu1 %3271 }
 0x48a   : > { %v3435_v59 = vrot.slane %v3272_v13, %v8748_v36 }
 0x48b   : > { %6065 = vmatpush3.bf16.msra.mxu1 %v8358_v20  ;;  %v3263_v37 = vpop.xlane.xlu0 %3262  ;;  %v3408_v20 = vrot.slane %v3254_v12, %v8748_v36 }
 0x48c   : > { %6067 = vmatprep.subr.bf16.mxu1 %v8355_v61  ;;  %v3422_v63 = vrot.slane %v3263_v37, %v8749_v24  ;;  %v3436_v51 = vsel %vm930_vm2, %v3435_v59, %v3431_v43 }
 0x48d   : > { %v3266_v3 = vpop.xlane.xlu1 %3265  ;;  %v3409_v5 = vsel %vm930_vm2, %v3408_v20, %v3404_v19 }
 0x48e   : > { %5908 = vmatmul.mubr.f32.vlgmr.msra.gmra.mrb[48].mxu1 %v8405_v31  ;;  %v3426_v0 = vrot.slane %v3266_v3, %v8748_v36 }
 0x48f   : > { %6069 = vmatpush3.bf16.msra.mxu1 %v8355_v61  ;;  %5918 = vmatprep.mubr.f32.mxu1 %v4718_v62  ;;  %v3281_v2 = vpop.xlane.xlu0 %3280  ;;  %v3413_v61 = vrot.slane %v3257_v35, %v8749_v24 }
 0x490   : > { %6071 = vmatprep.subr.bf16.mxu1 %v8361_v50  ;;  %v3427_v7 = vsel %vm930_vm2, %v3426_v0, %v3422_v63  ;;  %v3449_v45 = vrot.slane %v3281_v2, %v8749_v24  ;;  %v3525_v2 = vld [vmem:[#allocation3 + $0x8] sm:$0xff] }
 0x491   : > { %v3284_v46 = vpop.xlane.xlu1 %3283  ;;  %v3418_v56 = vsel %vm930_vm2, %v3417_v25, %v3413_v61 }
 0x492   : > { %v3480_v60 = vsel %vm932_vm3, %v3418_v56, %v3409_v5  ;;  %v3453_v16 = vrot.slane %v3284_v46, %v8748_v36  ;;  %v5502_v5 = vld [vmem:[%s8761_s30] ss:$0 sm:$0xff] }
 0x493   : > { %6073 = vmatpush3.bf16.msra.mxu1 %v8361_v50  ;;  %v3275_v49 = vpop.xlane.xlu0 %3274  ;;  %v3481_v23 = vsel %vm933_vm4, %v3427_v7, %v3480_v60  ;;  %v6467_v60 = vld [vmem:[%s6980_s25] sm:$0xff] }
 0x494   : > { %6075 = vmatprep.subr.bf16.mxu1 %v8125_v48  ;;  %v3440_v33 = vrot.slane %v3275_v49, %v8749_v24  ;;  %v3482_v42 = vsel %vm935_vm5, %v3436_v51, %v3481_v23  ;;  %v3454_v40 = vsel %vm930_vm2, %v3453_v16, %v3449_v45  ;;  %v6465_v49 = vld [vmem:[%s6994_s16 + $0x8] sm:$0xff] }
 0x495   : > { %v3278_v22 = vpop.xlane.xlu1 %3277 }
 0x496   : > { %5919 = vmatmul.mubr.f32.vlgmr.msra.gmra.mrb[48].mxu1 %v8413_v54  ;;  %v3444_v50 = vrot.slane %v3278_v22, %v8748_v36 }
 0x497   : > { %6077 = vmatpush3.bf16.msra.mxu1 %v8125_v48  ;;  %5929 = vmatprep.mubr.f32.mxu1 %v4719_v6  ;;  %v3287_v32 = vpop.xlane.xlu0 %3286  ;;  %v8757_v6 = vld [vmem:[#allocation32_spill] sm:$0xff] }
 0x498   : > { %6079 = vmatprep.subr.bf16.mxu1 %v8336_v39  ;;  %v3445_v28 = vsel %vm930_vm2, %v3444_v50, %v3440_v33  ;;  %v3458_v47 = vrot.slane %v3287_v32, %v8749_v24  ;;  %v6466_v50 = vld [vmem:[%s6980_s25 + $0x8] sm:$0xff] }
 0x499   : > { %v3290_v10 = vpop.xlane.xlu1 %3289  ;;  %v3483_v30 = vsel %vm937_vm6, %v3445_v28, %v3482_v42 }
 0x49a   : > { %v3462_v26 = vrot.slane %v3290_v10, %v8748_v36  ;;  %v3484_v62 = vsel %vm939_vm7, %v3454_v40, %v3483_v30 }
 0x49b   : > { %6081 = vmatpush3.bf16.msra.mxu1 %v8336_v39  ;;  %v3293_v41 = vpop.xlane.xlu0 %3292 }
 0x49c   : > { %6083 = vmatprep.subr.bf16.mxu1 %v8364_v8  ;;  %v3463_v34 = vsel %vm930_vm2, %v3462_v26, %v3458_v47  ;;  %v3467_v44 = vrot.slane %v3293_v41, %v8749_v24 }
 0x49d   : > { %v3296_v18 = vpop.xlane.xlu1 %3295  ;;  %v3485_v54 = vsel %vm941_vm8, %v3463_v34, %v3484_v62 }
 0x49e   : > { %5930 = vmatmul.mubr.f32.vlgmr.msra.gmra.mrb[48].mxu1 %v4729_v29  ;;  %v3471_v11 = vrot.slane %v3296_v18, %v8748_v36  ;;  %v8756_v36 = vld [vmem:[#allocation31_spill] sm:$0xff] }
 0x49f   : > { %6085 = vmatpush3.bf16.msra.mxu1 %v8364_v8  ;;  %5940 = vmatprep.mubr.f32.mxu1 %v8410_v38 }
 0x4a0   : > { %6087 = vmatprep.subr.bf16.mxu1 %v8366_v52  ;;  %v3472_v35 = vsel %vm930_vm2, %v3471_v11, %v3467_v44  ;;  %vm3518_vm2 = vcmask 7168  }
 0x4a1   : > { %v3486_v29 = vsel %vm943_vm9, %v3472_v35, %v3485_v54 }
 0x4a2   : > { %v3490_v8 = vmul.f32 %v3486_v29, %v8755_v55 }
 0x4a3   : > { %6089 = vmatpush3.bf16.msra.mxu1 %v8366_v52 }
 0x4a4   : > { %6091 = vmatprep.subr.bf16.mxu1 %v8125_v48  ;;  %v3492_v1 = vmul.f32 0.06666667, %v3490_v8 }
 0x4a6   : > { %5941 = vmatmul.mubr.f32.vlgmr.msra.gmra.mrb[48].mxu1 %v8405_v31  ;;  %v3494_v24 = vmul.f32 %v3492_v1, %v8756_v36  ;;  %v3503_v53 = vmul.f32 %v3492_v1, %v8757_v6  ;;  %v3511_v17 = vmul.f32 %v3492_v1, %v8758_v4 }
 0x4a7   : > { %6093 = vmatpush3.bf16.msra.mxu1 %v8125_v48  ;;  %5951 = vmatprep.mubr.f32.mxu1 %v8410_v38 }
 0x4a8   : > { %6095 = vmatprep.subr.bf16.mxu1 %v8336_v39  ;;  %v3499_v27 = vsel %vm3495_vm10, %v3494_v24, 0.0  ;;  %v3507_v52 = vsel %vm3495_vm10, %v3503_v53, 0.0  ;;  %v3515_v48 = vsel %vm3495_vm10, %v3511_v17, 0.0 }
 0x4a9   : > { %3500 = vadd.xlane.f32.xlu1 %v3499_v27 }
 0x4ab   : > { %6097 = vmatpush3.bf16.msra.mxu1 %v8336_v39 }
 0x4ad   : > { %3508 = vadd.xlane.f32.xlu1 %v3507_v52 }
 0x4ae   : > { %5952 = vmatmul.mubr.f32.vlgmr.msra.gmra.mrb[48].mxu1 %v8405_v31 }
 0x4b1   : > { %3516 = vadd.xlane.f32.xlu1 %v3515_v48 }
 0x50a   : > { %v3498_v38 = vpop.xlane.xlu0 %3497 }
 0x50e   : > { %v3506_v57 = vpop.xlane.xlu0 %3505 }
 0x50f   : > { %v3519_v21 = vsel %vm3518_vm2, %v3498_v38, %v3506_v57 }
 0x512   : > { %v3514_v39 = vpop.xlane.xlu0 %3513 }
 0x513   : > { %v3522_v15 = vsel %vm3521_vm12, %v3519_v21, %v3514_v39 }
 0x514   : > { %v3526_v12 = vadd.f32 %v3524_v9, %v3522_v15 }
 0x516   : > { %3529 = vst.msk [vmem:[#allocation3] sm:$0xff] %vm896_vm11, %v3526_v12 }
 0x51d   : > { %v5180_v31 = vld [vmem:[#allocation3] sm:$0xff] }
 0x51e   : > { %v5182_v13 = vadd.f32 %v6464_v14, %v5180_v31 }
 0x520   : > { %v5503_v37 = vclamps-f32 %v5182_v13, 1000.0 }
 0x522   : > { %5188 = vst.msk [vmem:[%s882_s7] sm:$0xff] %vm896_vm11, %v5503_v37 }
 0x536   : > { %v3501_v3 = vpop.xlane.xlu1 %3500 }
 0x53a   : > { %v3509_v58 = vpop.xlane.xlu1 %3508 }
 0x53b   : > { %v3520_v20 = vsel %vm3518_vm2, %v3501_v3, %v3509_v58 }
 0x53e   : > { %v3517_v0 = vpop.xlane.xlu1 %3516 }
 0x53f   : > { %v3523_v46 = vsel %vm3521_vm12, %v3520_v20, %v3517_v0 }
 0x540   : > { %v3527_v25 = vadd.f32 %v3525_v2, %v3523_v46 }
 0x542   : > { %3530 = vst.msk [vmem:[#allocation3 + $0x8] sm:$0xff] %vm896_vm11, %v3527_v25 }
 0x549   : > { %v5181_v19 = vld [vmem:[#allocation3 + $0x8] sm:$0xff] }
 0x54a   : > { %v5183_v63 = vadd.f32 %v6465_v49, %v5181_v19 }
 0x54c   : > { %v5504_v61 = vclamps-f32 %v5183_v63, 1000.0 }
 0x54e   : > { %5189 = vst.msk [vmem:[%s882_s7 + $0x8] sm:$0xff] %vm896_vm11, %v5504_v61  ;;  %s6586_s7 = scalar_lea.vmem %s6585_s28, 512 }
 0x54f   : > { %p6588_p3 = scmp.lt.s32.totalorder %s6586_s7, %s6580_s0 }
 0x551   : > { %p6589_p5 = por %p6588_p3, %p6587_p2 }
 0x553   : > { %p6590_p6 = pnand %p6589_p5, %p6583_p0 }
 0x581   : > { %v5953_v7 = vpop.f32.mrb[48].mxu1 }
 0x582   : > { %v6102_v22 = vadd.f32 %v5953_v7, %v5502_v5  ;;  %v5166_v56 = vpop.f32.mrb[49].mxu1 }
 0x583   : > { %v6103_v59 = vadd.f32 %v5502_v5, %v5166_v56 }
 0x584   : > { %v5177_v32 = vadd.f32 %v6466_v50, %v6102_v22 }
 0x585   : > { %v5176_v33 = vadd.f32 %v6467_v60, %v6103_v59 }
 0x586   : > { %5179 = vst.msk [vmem:[%s825_s26 + $0x8] sm:$0xff] %vm893_vm0, %v5177_v32 }
 0x587   : > { %5178 = vst.msk [vmem:[%s825_s26] sm:$0xff] %vm893_vm0, %v5176_v33 }
 0x588   : > { %6593 = shalt.err (!%p6590_p6)
}
 0x589   : > { %s6594_s25 = scalar_lea.hbm %s8516_s24, 256  ;;  %s6598_s14 = scalar_lea.hbm %s8763_s4, 512 }
 0x58a   : > { %p6595_p7 = scmp.ne.s32.totalorder %s8516_s24, %s6594_s25  ;;  %p6599_p4 = scmp.lt.u32.totalorder %s8516_s24, %s8763_s4 }
 0x58b   : > { %p6600_p8 = scmp.lt.u32.totalorder %s6598_s14, %s6594_s25  ;;  %p6602_p1 = scmp.lt.u32.totalorder %s6594_s25, %s8516_s24 }
 0x58c   : > { %p6596_p9 = pnand %p6595_p7, %p8764_p10 }
 0x58d   : > { %p6601_p13 = por %p6600_p8, %p6599_p4 }
 0x58e   : > { %p6597_p12 = pneg %p6596_p9 }
 0x58f   : > { %p6603_p11 = por %p6602_p1, %p6601_p13 }
 0x591   : > { %p6604_p0 = pnand %p6603_p11, %p6597_p12 }
 0x593   : > { %6607 = shalt.err (!%p6604_p0)
}
 0x594   : > { %s6685_s30 = smov 128   ;;  %s6686_s29 = smov 8  }
 0x595   : > { %6152 = dma.vmem_to_hbm [thread:$0]  (%p8764_p10), %s8518_s22, 256, %s8516_s24, %s8523_s27, %s6685_s30, %s6685_s30, %s6686_s29  }
 0x596 PF: > { %s8765_s26 = sld [smem:[#allocation21_spill]]  ;;  %s8766_s16 = sld [smem:[#allocation17_spill]] }
 0x597   : > { %s8767_s3 = sld [smem:[#allocation24_spill]] }
 0x59c   : > { %p6179_p2 = scmp.ge.s32.totalorder %s8765_s26, 2  ;;  %s5227_s0 = sand.u32 1, %s8766_s16  }
 0x59d   : > { %p8768_p3 = scmp.ne.s32.totalorder %s8767_s3, 0  ;;  %s5228_s1 = scalar_lea.sflag [#allocation6], %s5227_s0 }
 0x59f   : > { %p6168_p5 = pnand %p6179_p2, %p8768_p3 }
 0x5a1   : > { %6645 = dma.done.wait (!%p6168_p5), %s5228_s1, 256  }
 0x5a2   : > { %6647 = vsyncadd (!%p6168_p5), %s5228_s1, 4294967040  ;;  %s38_s28 = sadd.s32 1, %s8765_s26   ;;  %s8769_s2 = sld [smem:[#allocation18_spill]] }
 0x5a3   : > { %p35_p6 = scmp.ge.s32.totalorder %s38_s28, 4   ;;  %s8770_s25 = sld [smem:[#allocation19_spill]] }
 0x5a4   : > { %s8771_s26 = sld [smem:[#allocation25_spill]]  ;;  %s8772_s27 = sld [smem:[#allocation20_spill]] }
 0x5a5   : > { %s8773_s3 = sld [smem:[#allocation22_spill]]  ;;  %37 = sbr.rel (!%p35_p6) target bundleno = 19 (0x13), region = 187 }
 0x5ac   :  { %5241 = vsyncpa [#allocation5], 1 }
 0x5ad   :  { %5243 = vsyncpa [#allocation5 + $0x1], 1 }
 0x5ae   :  { %5244 = vsyncpa [#allocation8], 1 }
 0x5af   :  { %5245 = vsyncpa [#allocation11], 1 }
 0x5b0   :  { %5246 = vsyncpa [#allocation6], 1 }
 0x5b1   :  { %5248 = vsyncpa [#allocation6 + $0x1], 1 }

</bundles_post_ra>
